<compile_context>
chip_gen: v5e
topology: v5e:2x2
jax: 0.10.0
libtpu: 0.0.40
codegen_flags: <defaults>
</compile_context>

<pallas_src>
import functools

import jax
import jax.numpy as jnp
from jax import lax
from jax.experimental import pallas as pl
from jax.experimental.pallas import tpu as pltpu
from jax.scipy.linalg import block_diag


# --------------------------- the fused kernel ---------------------------

def _ts_encoder_kernel(*refs, n_mlp, hidden0, CH):
    (x_st_ref, x_ts_ref, fc_wT_ref, fc_b_ref,
     wx0_ref, wx1_ref, wx2_ref,
     wh0_ref, wh1_ref, wh2_ref,
     bih_ref, bhh_ref) = refs[:12]
    mlp_refs = [(refs[12 + 2 * i], refs[13 + 2 * i]) for i in range(n_mlp)]
    off = 12 + 2 * n_mlp
    wlast_ref, blast_ref = refs[off], refs[off + 1]
    out_ref = refs[off + 2]
    comb_ref, gx0_ref = refs[off + 3], refs[off + 4]

    f32 = jnp.float32
    B = x_st_ref.shape[0]

    # ---- static branch: ReLU(BN(Linear(x_static))) with BN folded into the weights.
    # (the second ReLU after eval-mode Dropout is a no-op)
    static_out = jnp.maximum(
        jnp.dot(x_st_ref[...], fc_wT_ref[...], preferred_element_type=f32) + fc_b_ref[...],
        0.0)
    comb_ref[:, :hidden0] = static_out

    # ---- GRU stack: all channels packed via block-diagonal weights, gates fused (r|z|n
    # occupy contiguous CH-wide lane blocks).  The layer-0 input projection is hoisted out
    # of the recurrence (one matmul over the whole sequence).
    # gate biases: loaded once, reused every step.
    bih0, bih1, bih2 = bih_ref[0:1, :], bih_ref[1:2, :], bih_ref[2:3, :]
    bhh0, bhh1, bhh2 = bhh_ref[0:1, :], bhh_ref[1:2, :], bhh_ref[2:3, :]

    gx0_ref[...] = (jnp.dot(x_ts_ref[...], wx0_ref[...], preferred_element_type=f32)
                    + bih0)

    def gru_cell(gx, gh, h_prev):
        r = jax.nn.sigmoid(gx[:, 0:CH] + gh[:, 0:CH])
        z = jax.nn.sigmoid(gx[:, CH:2 * CH] + gh[:, CH:2 * CH])
        n = jnp.tanh(gx[:, 2 * CH:3 * CH] + r * gh[:, 2 * CH:3 * CH])
        return (1.0 - z) * n + z * h_prev

    def step(t, carry):
        h0, h1, h2 = carry
        # layer 0: gx already hoisted, only the hidden projection stays in the loop
        gh0 = jnp.dot(h0, wh0_ref[...], preferred_element_type=f32) + bhh0
        h0 = gru_cell(gx0_ref[pl.ds(t, 1), :], gh0, h0)
        # layer 1
        gx1 = jnp.dot(h0, wx1_ref[...], preferred_element_type=f32) + bih1
        gh1 = jnp.dot(h1, wh1_ref[...], preferred_element_type=f32) + bhh1
        h1 = gru_cell(gx1, gh1, h1)
        # layer 2
        gx2 = jnp.dot(h1, wx2_ref[...], preferred_element_type=f32) + bih2
        gh2 = jnp.dot(h2, wh2_ref[...], preferred_element_type=f32) + bhh2
        h2 = gru_cell(gx2, gh2, h2)
        # row t of torch.cat(rnn_outputs, dim=1), written lane-dense next to static_out
        comb_ref[pl.ds(t, 1), hidden0:] = h2
        return (h0, h1, h2)

    h_init = jnp.zeros((1, CH), f32)
    _ = lax.fori_loop(0, B, step, (h_init, h_init, h_init), unroll=True)

    # ---- MLP head (BN folded into the linears, eval-mode Dropout = identity)
    h = comb_ref[...]
    for wT_ref, b_ref in mlp_refs:
        h = jnp.maximum(jnp.dot(h, wT_ref[...], preferred_element_type=f32) + b_ref[...], 0.0)
    out_ref[...] = (jnp.dot(h, wlast_ref[...], preferred_element_type=f32)
                    + blast_ref[...]).astype(out_ref.dtype)


def ts_encoder_forward(packed, x_static, x_ts):
    """Single fused pallas_call for the whole TSEncoder forward (eval mode)."""
    B, _ = x_static.shape
    _, n_ch, L = x_ts.shape
    hidden0 = packed["fc_wT"].shape[1]
    CH = packed["wh0"].shape[0]            # n_ch * rnn_hidden_size
    n_basis = packed["w_lastT"].shape[1]
    n_mlp = len(packed["mlp"])

    # pad_sequence on a rectangular tensor is the identity; packing channels along lanes
    # gives the block-diagonal GRU formulation its (B, n_ch*L) input.
    x_ts_packed = jnp.reshape(x_ts.astype(jnp.float32), (B, n_ch * L))

    inputs = [x_static.astype(jnp.float32), x_ts_packed,
              packed["fc_wT"], packed["fc_b"],
              packed["wx0"], packed["wx1"], packed["wx2"],
              packed["wh0"], packed["wh1"], packed["wh2"],
              packed["bih"], packed["bhh"]]
    for wT, b in packed["mlp"]:
        inputs += [wT, b]
    inputs += [packed["w_lastT"], packed["b_last"]]

    kernel = functools.partial(_ts_encoder_kernel, n_mlp=n_mlp, hidden0=hidden0, CH=CH)
    return pl.pallas_call(
        kernel,
        out_shape=jax.ShapeDtypeStruct((B, n_basis), jnp.float32),
        scratch_shapes=[
            pltpu.VMEM((B, hidden0 + CH), jnp.float32),  # [static_out | rnn_combined]
            pltpu.VMEM((B, 3 * CH), jnp.float32),        # hoisted layer-0 gate inputs
        ],
    )(*inputs)


# --------------------------- parameters: init, BN folding, GRU packing ---------------------------

def init_params(key, cfg):
    """Raw (PyTorch-layout) parameters with default eval-mode BN statistics."""
    n_static = cfg["n_static_features"]
    n_ch = cfg["n_features"]
    L = cfg["ts_length"]
    H = cfg["rnn_hidden_size"]
    hidden = cfg["hidden_sizes"]
    n_basis = cfg["n_basis"]

    keys = iter(jax.random.split(key, 256))

    def unif(shape, bound):
        return jax.random.uniform(next(keys), shape, jnp.float32, -bound, bound)

    def bn_params(n):
        return dict(gamma=jnp.ones((n,), jnp.float32), beta=jnp.zeros((n,), jnp.float32),
                    mean=jnp.zeros((n,), jnp.float32), var=jnp.ones((n,), jnp.float32))

    params = {}
    b0 = n_static ** -0.5
    params["fc"] = dict(w=unif((hidden[0], n_static), b0), b=unif((hidden[0],), b0),
                        bn=bn_params(hidden[0]))

    bH = H ** -0.5
    grus = []
    for _c in range(n_ch):
        layers = []
        for l in range(3):
            in_dim = L if l == 0 else H
            layers.append(dict(w_ih=unif((3 * H, in_dim), bH),
                               w_hh=unif((3 * H, H), bH),
                               b_ih=unif((3 * H,), bH),
                               b_hh=unif((3 * H,), bH)))
        grus.append(layers)
    params["gru"] = grus

    in_dim = H * n_ch + hidden[0]
    dims = [in_dim] + list(hidden)
    mlp = []
    for i in range(len(hidden)):
        bnd = dims[i] ** -0.5
        mlp.append(dict(w=unif((dims[i + 1], dims[i]), bnd), b=unif((dims[i + 1],), bnd),
                        bn=bn_params(dims[i + 1])))
    params["mlp"] = mlp
    bnd = hidden[-1] ** -0.5
    params["mlp_last"] = dict(w=unif((n_basis, hidden[-1]), bnd), b=unif((n_basis,), bnd))
    return params


def _fold_bn_linear(w, b, bn, eps=1e-5):
    """Fold eval-mode BatchNorm1d into the preceding Linear: y = x @ wT' + b'."""
    scale = bn["gamma"] * lax.rsqrt(bn["var"] + eps)
    wT = (w.T * scale[None, :]).astype(jnp.float32)          # (in, out)
    b2 = ((b - bn["mean"]) * scale + bn["beta"]).reshape(1, -1).astype(jnp.float32)
    return wT, b2


def pack_params(params, cfg):
    """Pack raw parameters into the fused-kernel layout (done once, wrapper-side)."""
    n_ch = cfg["n_features"]
    H = cfg["rnn_hidden_size"]

    packed = {}
    packed["fc_wT"], packed["fc_b"] = _fold_bn_linear(params["fc"]["w"], params["fc"]["b"],
                                                      params["fc"]["bn"])

    # GRU: for each layer l and gate g (r,z,n), build a block-diagonal matrix over channels
    # of the transposed per-channel gate weight, then concatenate the gates along lanes.
    wx, wh, bih, bhh = [], [], [], []
    for l in range(3):
        wx_g, wh_g, bih_g, bhh_g = [], [], [], []
        for g in range(3):
            wx_g.append(block_diag(*[
                params["gru"][c][l]["w_ih"][g * H:(g + 1) * H, :].T for c in range(n_ch)]))
            wh_g.append(block_diag(*[
                params["gru"][c][l]["w_hh"][g * H:(g + 1) * H, :].T for c in range(n_ch)]))
            bih_g.append(jnp.concatenate(
                [params["gru"][c][l]["b_ih"][g * H:(g + 1) * H] for c in range(n_ch)]))
            bhh_g.append(jnp.concatenate(
                [params["gru"][c][l]["b_hh"][g * H:(g + 1) * H] for c in range(n_ch)]))
        wx.append(jnp.concatenate(wx_g, axis=1).astype(jnp.float32))   # (n_ch*in, 3*n_ch*H)
        wh.append(jnp.concatenate(wh_g, axis=1).astype(jnp.float32))   # (n_ch*H,  3*n_ch*H)
        bih.append(jnp.concatenate(bih_g))
        bhh.append(jnp.concatenate(bhh_g))
    packed["wx0"], packed["wx1"], packed["wx2"] = wx
    packed["wh0"], packed["wh1"], packed["wh2"] = wh
    packed["bih"] = jnp.stack(bih).astype(jnp.float32)   # (3, 3*n_ch*H)
    packed["bhh"] = jnp.stack(bhh).astype(jnp.float32)

    packed["mlp"] = [_fold_bn_linear(layer["w"], layer["b"], layer["bn"])
                     for layer in params["mlp"]]
    packed["w_lastT"] = params["mlp_last"]["w"].T.astype(jnp.float32)
    packed["b_last"] = params["mlp_last"]["b"].reshape(1, -1).astype(jnp.float32)
    return packed


# --------------------------- pure-JAX reference (semantics check) ---------------------------

def ts_encoder_reference(params, x_static, x_ts, cfg, eps=1e-5):
    hp = lax.Precision.HIGHEST
    H = cfg["rnn_hidden_size"]

    def bn(x, p):
        return (x - p["mean"]) / jnp.sqrt(p["var"] + eps) * p["gamma"] + p["beta"]

    def linear(x, w, b):
        return jnp.dot(x, w.T, precision=hp) + b

    static_out = jax.nn.relu(bn(linear(x_static, params["fc"]["w"], params["fc"]["b"]),
                                params["fc"]["bn"]))

    def gru_layer(seq, lp):                       # seq: (T, in) unbatched sequence
        def cell(h, x_t):
            gi = jnp.dot(x_t, lp["w_ih"].T, precision=hp) + lp["b_ih"]
            gh = jnp.dot(h, lp["w_hh"].T, precision=hp) + lp["b_hh"]
            r = jax.nn.sigmoid(gi[0:H] + gh[0:H])
            z = jax.nn.sigmoid(gi[H:2 * H] + gh[H:2 * H])
            n = jnp.tanh(gi[2 * H:3 * H] + r * gh[2 * H:3 * H])
            h_new = (1.0 - z) * n + z * h
            return h_new, h_new
        _, out = lax.scan(cell, jnp.zeros((H,), jnp.float32), seq)
        return out

    rnn_outs = []
    for c in range(cfg["n_features"]):
        seq = x_ts[:, c, :]                       # torch sees this as an unbatched sequence
        for l in range(3):
            seq = gru_layer(seq, params["gru"][c][l])
        rnn_outs.append(seq)                      # (B, H)

    h = jnp.concatenate([static_out] + rnn_outs, axis=1)
    for layer in params["mlp"]:
        h = jax.nn.relu(bn(linear(h, layer["w"], layer["b"]), layer["bn"]))
    return linear(h, params["mlp_last"]["w"], params["mlp_last"]["b"])


# --------------------------- demo ---------------------------

if __name__ == "__main__":
    cfg = dict(
        n_static_features=6,    # config.n_static_features
        n_features=3,           # config.n_features == number of time series
        n_basis=5,              # latent size (dynamic_bias disabled)
        ts_length=16,           # GRU input_size
        rnn_hidden_size=32,     # config.rnn.hidden_size
        hidden_sizes=[32, 32],  # config.encoder.hidden_sizes
    )
    B = 4
    key = jax.random.PRNGKey(0)
    k_params, k_static, k_ts = jax.random.split(key, 3)
    params = init_params(k_params, cfg)
    packed = pack_params(params, cfg)

    x_static = jax.random.normal(k_static, (B, cfg["n_static_features"]), jnp.float32)
    x_ts = jax.random.normal(k_ts, (B, cfg["n_features"], cfg["ts_length"]), jnp.float32)

    fwd = jax.jit(ts_encoder_forward)
    out = fwd(packed, x_static, x_ts)
    jax.block_until_ready(out)
    assert out.shape == (B, cfg["n_basis"]) and out.dtype == jnp.float32

    ref = ts_encoder_reference(params, x_static, x_ts, cfg)
    assert jnp.allclose(out, ref, rtol=2e-2, atol=2e-2), float(jnp.max(jnp.abs(out - ref)))
    print("KERNEL_OK")
</pallas_src>

<mosaic_0001>
module attributes {stable_mosaic.version = 11 : i64} {
  func.func @_ts_encoder_kernel(%arg0: memref<4x6xf32, #tpu.memory_space<vmem>>, %arg1: memref<4x48xf32, #tpu.memory_space<vmem>>, %arg2: memref<6x32xf32, #tpu.memory_space<vmem>>, %arg3: memref<1x32xf32, #tpu.memory_space<vmem>>, %arg4: memref<48x288xf32, #tpu.memory_space<vmem>>, %arg5: memref<96x288xf32, #tpu.memory_space<vmem>>, %arg6: memref<96x288xf32, #tpu.memory_space<vmem>>, %arg7: memref<96x288xf32, #tpu.memory_space<vmem>>, %arg8: memref<96x288xf32, #tpu.memory_space<vmem>>, %arg9: memref<96x288xf32, #tpu.memory_space<vmem>>, %arg10: memref<3x288xf32, #tpu.memory_space<vmem>>, %arg11: memref<3x288xf32, #tpu.memory_space<vmem>>, %arg12: memref<128x32xf32, #tpu.memory_space<vmem>>, %arg13: memref<1x32xf32, #tpu.memory_space<vmem>>, %arg14: memref<32x32xf32, #tpu.memory_space<vmem>>, %arg15: memref<1x32xf32, #tpu.memory_space<vmem>>, %arg16: memref<32x5xf32, #tpu.memory_space<vmem>>, %arg17: memref<1x5xf32, #tpu.memory_space<vmem>>, %arg18: memref<4x5xf32, #tpu.memory_space<vmem>>, %arg19: memref<4x128xf32, #tpu.memory_space<vmem>>, %arg20: memref<4x288xf32, #tpu.memory_space<vmem>>) attributes {dimension_semantics = [], scalar_prefetch = 0 : i64, scratch_operands = 2 : i64, tpu.core_type = #tpu.core_type<tc>} {
    %c0 = arith.constant 0 : index
    %c0_0 = arith.constant 0 : index
    %0 = vector.load %arg0[%c0, %c0_0] : memref<4x6xf32, #tpu.memory_space<vmem>>, vector<4x6xf32>
    %c0_1 = arith.constant 0 : index
    %c0_2 = arith.constant 0 : index
    %1 = vector.load %arg2[%c0_1, %c0_2] : memref<6x32xf32, #tpu.memory_space<vmem>>, vector<6x32xf32>
    %cst = arith.constant dense<0.000000e+00> : vector<4x32xf32>
    %2 = tpu.matmul %0, %1, %cst {dimension_numbers = #tpu.dot_dimension_numbers<[1], [0], [0], [1], [0, 0, 1, 1], [], []>} : vector<4x6xf32>, vector<6x32xf32>, vector<4x32xf32> -> vector<4x32xf32>
    %c0_3 = arith.constant 0 : index
    %c0_4 = arith.constant 0 : index
    %3 = vector.load %arg3[%c0_3, %c0_4] : memref<1x32xf32, #tpu.memory_space<vmem>>, vector<1x32xf32>
    %4 = vector.broadcast %3 : vector<1x32xf32> to vector<4x32xf32>
    %5 = arith.addf %2, %4 : vector<4x32xf32>
    %cst_5 = arith.constant 0.000000e+00 : f32
    %6 = vector.broadcast %cst_5 : f32 to vector<4x32xf32>
    %7 = arith.maximumf %5, %6 : vector<4x32xf32>
    %c0_6 = arith.constant 0 : index
    %c0_7 = arith.constant 0 : index
    %8 = vector.load %arg19[%c0_6, %c0_7] : memref<4x128xf32, #tpu.memory_space<vmem>>, vector<4x32xf32>
    tpu.vector_store %arg19[%c0_6, %c0_7], %7 {strides = array<i32>} : memref<4x128xf32, #tpu.memory_space<vmem>>, vector<4x32xf32>,
    %c0_8 = arith.constant 0 : index
    %c0_9 = arith.constant 0 : index
    %9 = vector.load %arg10[%c0_8, %c0_9] : memref<3x288xf32, #tpu.memory_space<vmem>>, vector<1x288xf32>
    %c1 = arith.constant 1 : index
    %c0_10 = arith.constant 0 : index
    %10 = vector.load %arg10[%c1, %c0_10] : memref<3x288xf32, #tpu.memory_space<vmem>>, vector<1x288xf32>
    %c2 = arith.constant 2 : index
    %c0_11 = arith.constant 0 : index
    %11 = vector.load %arg10[%c2, %c0_11] : memref<3x288xf32, #tpu.memory_space<vmem>>, vector<1x288xf32>
    %c0_12 = arith.constant 0 : index
    %c0_13 = arith.constant 0 : index
    %12 = vector.load %arg11[%c0_12, %c0_13] : memref<3x288xf32, #tpu.memory_space<vmem>>, vector<1x288xf32>
    %c1_14 = arith.constant 1 : index
    %c0_15 = arith.constant 0 : index
    %13 = vector.load %arg11[%c1_14, %c0_15] : memref<3x288xf32, #tpu.memory_space<vmem>>, vector<1x288xf32>
    %c2_16 = arith.constant 2 : index
    %c0_17 = arith.constant 0 : index
    %14 = vector.load %arg11[%c2_16, %c0_17] : memref<3x288xf32, #tpu.memory_space<vmem>>, vector<1x288xf32>
    %c0_18 = arith.constant 0 : index
    %c0_19 = arith.constant 0 : index
    %15 = vector.load %arg1[%c0_18, %c0_19] : memref<4x48xf32, #tpu.memory_space<vmem>>, vector<4x48xf32>
    %c0_20 = arith.constant 0 : index
    %c0_21 = arith.constant 0 : index
    %16 = vector.load %arg4[%c0_20, %c0_21] : memref<48x288xf32, #tpu.memory_space<vmem>>, vector<48x288xf32>
    %cst_22 = arith.constant dense<0.000000e+00> : vector<4x288xf32>
    %17 = tpu.matmul %15, %16, %cst_22 {dimension_numbers = #tpu.dot_dimension_numbers<[1], [0], [0], [1], [0, 0, 1, 1], [], []>} : vector<4x48xf32>, vector<48x288xf32>, vector<4x288xf32> -> vector<4x288xf32>
    %18 = vector.broadcast %9 : vector<1x288xf32> to vector<4x288xf32>
    %19 = arith.addf %17, %18 : vector<4x288xf32>
    %c0_23 = arith.constant 0 : index
    %c0_24 = arith.constant 0 : index
    %20 = vector.load %arg20[%c0_23, %c0_24] : memref<4x288xf32, #tpu.memory_space<vmem>>, vector<4x288xf32>
    tpu.vector_store %arg20[%c0_23, %c0_24], %19 {strides = array<i32>} : memref<4x288xf32, #tpu.memory_space<vmem>>, vector<4x288xf32>,
    %cst_25 = arith.constant 0.000000e+00 : f32
    %21 = vector.broadcast %cst_25 : f32 to vector<1x96xf32>
    %c0_i32 = arith.constant 0 : i32
    %c0_26 = arith.constant 0 : index
    %c0_27 = arith.constant 0 : index
    %22 = vector.load %arg7[%c0_26, %c0_27] : memref<96x288xf32, #tpu.memory_space<vmem>>, vector<96x288xf32>
    %cst_28 = arith.constant dense<0.000000e+00> : vector<1x288xf32>
    %23 = tpu.matmul %21, %22, %cst_28 {dimension_numbers = #tpu.dot_dimension_numbers<[1], [0], [0], [1], [0, 0, 1, 1], [], []>} : vector<1x96xf32>, vector<96x288xf32>, vector<1x288xf32> -> vector<1x288xf32>
    %24 = arith.addf %23, %12 : vector<1x288xf32>
    %25 = arith.index_cast %c0_i32 : i32 to index
    %c0_29 = arith.constant 0 : index
    %26 = vector.load %arg20[%25, %c0_29] : memref<4x288xf32, #tpu.memory_space<vmem>>, vector<1x288xf32>
    %27 = vector.extract_strided_slice %26 {offsets = [0, 0], sizes = [1, 96], strides = [1, 1]} : vector<1x288xf32> to vector<1x96xf32>
    %28 = vector.extract_strided_slice %24 {offsets = [0, 0], sizes = [1, 96], strides = [1, 1]} : vector<1x288xf32> to vector<1x96xf32>
    %29 = arith.addf %27, %28 : vector<1x96xf32>
    %30 = arith.negf %29 : vector<1x96xf32>
    %31 = math.exp %30 : vector<1x96xf32>
    %cst_30 = arith.constant 1.000000e+00 : f32
    %32 = vector.broadcast %cst_30 : f32 to vector<1x96xf32>
    %33 = arith.addf %32, %31 : vector<1x96xf32>
    %34 = arith.divf %32, %33 : vector<1x96xf32>
    %35 = vector.extract_strided_slice %26 {offsets = [0, 96], sizes = [1, 96], strides = [1, 1]} : vector<1x288xf32> to vector<1x96xf32>
    %36 = vector.extract_strided_slice %24 {offsets = [0, 96], sizes = [1, 96], strides = [1, 1]} : vector<1x288xf32> to vector<1x96xf32>
    %37 = arith.addf %35, %36 : vector<1x96xf32>
    %38 = arith.negf %37 : vector<1x96xf32>
    %39 = math.exp %38 : vector<1x96xf32>
    %cst_31 = arith.constant 1.000000e+00 : f32
    %40 = vector.broadcast %cst_31 : f32 to vector<1x96xf32>
    %41 = arith.addf %40, %39 : vector<1x96xf32>
    %42 = arith.divf %40, %41 : vector<1x96xf32>
    %43 = vector.extract_strided_slice %26 {offsets = [0, 192], sizes = [1, 96], strides = [1, 1]} : vector<1x288xf32> to vector<1x96xf32>
    %44 = vector.extract_strided_slice %24 {offsets = [0, 192], sizes = [1, 96], strides = [1, 1]} : vector<1x288xf32> to vector<1x96xf32>
    %45 = arith.mulf %34, %44 : vector<1x96xf32>
    %46 = arith.addf %43, %45 : vector<1x96xf32>
    %47 = math.tanh %46 : vector<1x96xf32>
    %cst_32 = arith.constant 1.000000e+00 : f32
    %48 = vector.broadcast %cst_32 : f32 to vector<1x96xf32>
    %49 = arith.subf %48, %42 : vector<1x96xf32>
    %50 = arith.mulf %49, %47 : vector<1x96xf32>
    %51 = arith.mulf %42, %21 : vector<1x96xf32>
    %52 = arith.addf %50, %51 : vector<1x96xf32>
    %c0_33 = arith.constant 0 : index
    %c0_34 = arith.constant 0 : index
    %53 = vector.load %arg5[%c0_33, %c0_34] : memref<96x288xf32, #tpu.memory_space<vmem>>, vector<96x288xf32>
    %cst_35 = arith.constant dense<0.000000e+00> : vector<1x288xf32>
    %54 = tpu.matmul %52, %53, %cst_35 {dimension_numbers = #tpu.dot_dimension_numbers<[1], [0], [0], [1], [0, 0, 1, 1], [], []>} : vector<1x96xf32>, vector<96x288xf32>, vector<1x288xf32> -> vector<1x288xf32>
    %55 = arith.addf %54, %10 : vector<1x288xf32>
    %c0_36 = arith.constant 0 : index
    %c0_37 = arith.constant 0 : index
    %56 = vector.load %arg8[%c0_36, %c0_37] : memref<96x288xf32, #tpu.memory_space<vmem>>, vector<96x288xf32>
    %cst_38 = arith.constant dense<0.000000e+00> : vector<1x288xf32>
    %57 = tpu.matmul %21, %56, %cst_38 {dimension_numbers = #tpu.dot_dimension_numbers<[1], [0], [0], [1], [0, 0, 1, 1], [], []>} : vector<1x96xf32>, vector<96x288xf32>, vector<1x288xf32> -> vector<1x288xf32>
    %58 = arith.addf %57, %13 : vector<1x288xf32>
    %59 = vector.extract_strided_slice %55 {offsets = [0, 0], sizes = [1, 96], strides = [1, 1]} : vector<1x288xf32> to vector<1x96xf32>
    %60 = vector.extract_strided_slice %58 {offsets = [0, 0], sizes = [1, 96], strides = [1, 1]} : vector<1x288xf32> to vector<1x96xf32>
    %61 = arith.addf %59, %60 : vector<1x96xf32>
    %62 = arith.negf %61 : vector<1x96xf32>
    %63 = math.exp %62 : vector<1x96xf32>
    %cst_39 = arith.constant 1.000000e+00 : f32
    %64 = vector.broadcast %cst_39 : f32 to vector<1x96xf32>
    %65 = arith.addf %64, %63 : vector<1x96xf32>
    %66 = arith.divf %64, %65 : vector<1x96xf32>
    %67 = vector.extract_strided_slice %55 {offsets = [0, 96], sizes = [1, 96], strides = [1, 1]} : vector<1x288xf32> to vector<1x96xf32>
    %68 = vector.extract_strided_slice %58 {offsets = [0, 96], sizes = [1, 96], strides = [1, 1]} : vector<1x288xf32> to vector<1x96xf32>
    %69 = arith.addf %67, %68 : vector<1x96xf32>
    %70 = arith.negf %69 : vector<1x96xf32>
    %71 = math.exp %70 : vector<1x96xf32>
    %cst_40 = arith.constant 1.000000e+00 : f32
    %72 = vector.broadcast %cst_40 : f32 to vector<1x96xf32>
    %73 = arith.addf %72, %71 : vector<1x96xf32>
    %74 = arith.divf %72, %73 : vector<1x96xf32>
    %75 = vector.extract_strided_slice %55 {offsets = [0, 192], sizes = [1, 96], strides = [1, 1]} : vector<1x288xf32> to vector<1x96xf32>
    %76 = vector.extract_strided_slice %58 {offsets = [0, 192], sizes = [1, 96], strides = [1, 1]} : vector<1x288xf32> to vector<1x96xf32>
    %77 = arith.mulf %66, %76 : vector<1x96xf32>
    %78 = arith.addf %75, %77 : vector<1x96xf32>
    %79 = math.tanh %78 : vector<1x96xf32>
    %cst_41 = arith.constant 1.000000e+00 : f32
    %80 = vector.broadcast %cst_41 : f32 to vector<1x96xf32>
    %81 = arith.subf %80, %74 : vector<1x96xf32>
    %82 = arith.mulf %81, %79 : vector<1x96xf32>
    %83 = arith.mulf %74, %21 : vector<1x96xf32>
    %84 = arith.addf %82, %83 : vector<1x96xf32>
    %c0_42 = arith.constant 0 : index
    %c0_43 = arith.constant 0 : index
    %85 = vector.load %arg6[%c0_42, %c0_43] : memref<96x288xf32, #tpu.memory_space<vmem>>, vector<96x288xf32>
    %cst_44 = arith.constant dense<0.000000e+00> : vector<1x288xf32>
    %86 = tpu.matmul %84, %85, %cst_44 {dimension_numbers = #tpu.dot_dimension_numbers<[1], [0], [0], [1], [0, 0, 1, 1], [], []>} : vector<1x96xf32>, vector<96x288xf32>, vector<1x288xf32> -> vector<1x288xf32>
    %87 = arith.addf %86, %11 : vector<1x288xf32>
    %c0_45 = arith.constant 0 : index
    %c0_46 = arith.constant 0 : index
    %88 = vector.load %arg9[%c0_45, %c0_46] : memref<96x288xf32, #tpu.memory_space<vmem>>, vector<96x288xf32>
    %cst_47 = arith.constant dense<0.000000e+00> : vector<1x288xf32>
    %89 = tpu.matmul %21, %88, %cst_47 {dimension_numbers = #tpu.dot_dimension_numbers<[1], [0], [0], [1], [0, 0, 1, 1], [], []>} : vector<1x96xf32>, vector<96x288xf32>, vector<1x288xf32> -> vector<1x288xf32>
    %90 = arith.addf %89, %14 : vector<1x288xf32>
    %91 = vector.extract_strided_slice %87 {offsets = [0, 0], sizes = [1, 96], strides = [1, 1]} : vector<1x288xf32> to vector<1x96xf32>
    %92 = vector.extract_strided_slice %90 {offsets = [0, 0], sizes = [1, 96], strides = [1, 1]} : vector<1x288xf32> to vector<1x96xf32>
    %93 = arith.addf %91, %92 : vector<1x96xf32>
    %94 = arith.negf %93 : vector<1x96xf32>
    %95 = math.exp %94 : vector<1x96xf32>
    %cst_48 = arith.constant 1.000000e+00 : f32
    %96 = vector.broadcast %cst_48 : f32 to vector<1x96xf32>
    %97 = arith.addf %96, %95 : vector<1x96xf32>
    %98 = arith.divf %96, %97 : vector<1x96xf32>
    %99 = vector.extract_strided_slice %87 {offsets = [0, 96], sizes = [1, 96], strides = [1, 1]} : vector<1x288xf32> to vector<1x96xf32>
    %100 = vector.extract_strided_slice %90 {offsets = [0, 96], sizes = [1, 96], strides = [1, 1]} : vector<1x288xf32> to vector<1x96xf32>
    %101 = arith.addf %99, %100 : vector<1x96xf32>
    %102 = arith.negf %101 : vector<1x96xf32>
    %103 = math.exp %102 : vector<1x96xf32>
    %cst_49 = arith.constant 1.000000e+00 : f32
    %104 = vector.broadcast %cst_49 : f32 to vector<1x96xf32>
    %105 = arith.addf %104, %103 : vector<1x96xf32>
    %106 = arith.divf %104, %105 : vector<1x96xf32>
    %107 = vector.extract_strided_slice %87 {offsets = [0, 192], sizes = [1, 96], strides = [1, 1]} : vector<1x288xf32> to vector<1x96xf32>
    %108 = vector.extract_strided_slice %90 {offsets = [0, 192], sizes = [1, 96], strides = [1, 1]} : vector<1x288xf32> to vector<1x96xf32>
    %109 = arith.mulf %98, %108 : vector<1x96xf32>
    %110 = arith.addf %107, %109 : vector<1x96xf32>
    %111 = math.tanh %110 : vector<1x96xf32>
    %cst_50 = arith.constant 1.000000e+00 : f32
    %112 = vector.broadcast %cst_50 : f32 to vector<1x96xf32>
    %113 = arith.subf %112, %106 : vector<1x96xf32>
    %114 = arith.mulf %113, %111 : vector<1x96xf32>
    %115 = arith.mulf %106, %21 : vector<1x96xf32>
    %116 = arith.addf %114, %115 : vector<1x96xf32>
    %117 = arith.index_cast %c0_i32 : i32 to index
    %c32 = arith.constant 32 : index
    %118 = vector.load %arg19[%117, %c32] : memref<4x128xf32, #tpu.memory_space<vmem>>, vector<1x96xf32>
    tpu.vector_store %arg19[%117, %c32], %116 {strides = array<i32>} : memref<4x128xf32, #tpu.memory_space<vmem>>, vector<1x96xf32>,
    %c1_i32 = arith.constant 1 : i32
    %c0_51 = arith.constant 0 : index
    %c0_52 = arith.constant 0 : index
    %119 = vector.load %arg7[%c0_51, %c0_52] : memref<96x288xf32, #tpu.memory_space<vmem>>, vector<96x288xf32>
    %cst_53 = arith.constant dense<0.000000e+00> : vector<1x288xf32>
    %120 = tpu.matmul %52, %119, %cst_53 {dimension_numbers = #tpu.dot_dimension_numbers<[1], [0], [0], [1], [0, 0, 1, 1], [], []>} : vector<1x96xf32>, vector<96x288xf32>, vector<1x288xf32> -> vector<1x288xf32>
    %121 = arith.addf %120, %12 : vector<1x288xf32>
    %122 = arith.index_cast %c1_i32 : i32 to index
    %c0_54 = arith.constant 0 : index
    %123 = vector.load %arg20[%122, %c0_54] : memref<4x288xf32, #tpu.memory_space<vmem>>, vector<1x288xf32>
    %124 = vector.extract_strided_slice %123 {offsets = [0, 0], sizes = [1, 96], strides = [1, 1]} : vector<1x288xf32> to vector<1x96xf32>
    %125 = vector.extract_strided_slice %121 {offsets = [0, 0], sizes = [1, 96], strides = [1, 1]} : vector<1x288xf32> to vector<1x96xf32>
    %126 = arith.addf %124, %125 : vector<1x96xf32>
    %127 = arith.negf %126 : vector<1x96xf32>
    %128 = math.exp %127 : vector<1x96xf32>
    %cst_55 = arith.constant 1.000000e+00 : f32
    %129 = vector.broadcast %cst_55 : f32 to vector<1x96xf32>
    %130 = arith.addf %129, %128 : vector<1x96xf32>
    %131 = arith.divf %129, %130 : vector<1x96xf32>
    %132 = vector.extract_strided_slice %123 {offsets = [0, 96], sizes = [1, 96], strides = [1, 1]} : vector<1x288xf32> to vector<1x96xf32>
    %133 = vector.extract_strided_slice %121 {offsets = [0, 96], sizes = [1, 96], strides = [1, 1]} : vector<1x288xf32> to vector<1x96xf32>
    %134 = arith.addf %132, %133 : vector<1x96xf32>
    %135 = arith.negf %134 : vector<1x96xf32>
    %136 = math.exp %135 : vector<1x96xf32>
    %cst_56 = arith.constant 1.000000e+00 : f32
    %137 = vector.broadcast %cst_56 : f32 to vector<1x96xf32>
    %138 = arith.addf %137, %136 : vector<1x96xf32>
    %139 = arith.divf %137, %138 : vector<1x96xf32>
    %140 = vector.extract_strided_slice %123 {offsets = [0, 192], sizes = [1, 96], strides = [1, 1]} : vector<1x288xf32> to vector<1x96xf32>
    %141 = vector.extract_strided_slice %121 {offsets = [0, 192], sizes = [1, 96], strides = [1, 1]} : vector<1x288xf32> to vector<1x96xf32>
    %142 = arith.mulf %131, %141 : vector<1x96xf32>
    %143 = arith.addf %140, %142 : vector<1x96xf32>
    %144 = math.tanh %143 : vector<1x96xf32>
    %cst_57 = arith.constant 1.000000e+00 : f32
    %145 = vector.broadcast %cst_57 : f32 to vector<1x96xf32>
    %146 = arith.subf %145, %139 : vector<1x96xf32>
    %147 = arith.mulf %146, %144 : vector<1x96xf32>
    %148 = arith.mulf %139, %52 : vector<1x96xf32>
    %149 = arith.addf %147, %148 : vector<1x96xf32>
    %c0_58 = arith.constant 0 : index
    %c0_59 = arith.constant 0 : index
    %150 = vector.load %arg5[%c0_58, %c0_59] : memref<96x288xf32, #tpu.memory_space<vmem>>, vector<96x288xf32>
    %cst_60 = arith.constant dense<0.000000e+00> : vector<1x288xf32>
    %151 = tpu.matmul %149, %150, %cst_60 {dimension_numbers = #tpu.dot_dimension_numbers<[1], [0], [0], [1], [0, 0, 1, 1], [], []>} : vector<1x96xf32>, vector<96x288xf32>, vector<1x288xf32> -> vector<1x288xf32>
    %152 = arith.addf %151, %10 : vector<1x288xf32>
    %c0_61 = arith.constant 0 : index
    %c0_62 = arith.constant 0 : index
    %153 = vector.load %arg8[%c0_61, %c0_62] : memref<96x288xf32, #tpu.memory_space<vmem>>, vector<96x288xf32>
    %cst_63 = arith.constant dense<0.000000e+00> : vector<1x288xf32>
    %154 = tpu.matmul %84, %153, %cst_63 {dimension_numbers = #tpu.dot_dimension_numbers<[1], [0], [0], [1], [0, 0, 1, 1], [], []>} : vector<1x96xf32>, vector<96x288xf32>, vector<1x288xf32> -> vector<1x288xf32>
    %155 = arith.addf %154, %13 : vector<1x288xf32>
    %156 = vector.extract_strided_slice %152 {offsets = [0, 0], sizes = [1, 96], strides = [1, 1]} : vector<1x288xf32> to vector<1x96xf32>
    %157 = vector.extract_strided_slice %155 {offsets = [0, 0], sizes = [1, 96], strides = [1, 1]} : vector<1x288xf32> to vector<1x96xf32>
    %158 = arith.addf %156, %157 : vector<1x96xf32>
    %159 = arith.negf %158 : vector<1x96xf32>
    %160 = math.exp %159 : vector<1x96xf32>
    %cst_64 = arith.constant 1.000000e+00 : f32
    %161 = vector.broadcast %cst_64 : f32 to vector<1x96xf32>
    %162 = arith.addf %161, %160 : vector<1x96xf32>
    %163 = arith.divf %161, %162 : vector<1x96xf32>
    %164 = vector.extract_strided_slice %152 {offsets = [0, 96], sizes = [1, 96], strides = [1, 1]} : vector<1x288xf32> to vector<1x96xf32>
    %165 = vector.extract_strided_slice %155 {offsets = [0, 96], sizes = [1, 96], strides = [1, 1]} : vector<1x288xf32> to vector<1x96xf32>
    %166 = arith.addf %164, %165 : vector<1x96xf32>
    %167 = arith.negf %166 : vector<1x96xf32>
    %168 = math.exp %167 : vector<1x96xf32>
    %cst_65 = arith.constant 1.000000e+00 : f32
    %169 = vector.broadcast %cst_65 : f32 to vector<1x96xf32>
    %170 = arith.addf %169, %168 : vector<1x96xf32>
    %171 = arith.divf %169, %170 : vector<1x96xf32>
    %172 = vector.extract_strided_slice %152 {offsets = [0, 192], sizes = [1, 96], strides = [1, 1]} : vector<1x288xf32> to vector<1x96xf32>
    %173 = vector.extract_strided_slice %155 {offsets = [0, 192], sizes = [1, 96], strides = [1, 1]} : vector<1x288xf32> to vector<1x96xf32>
    %174 = arith.mulf %163, %173 : vector<1x96xf32>
    %175 = arith.addf %172, %174 : vector<1x96xf32>
    %176 = math.tanh %175 : vector<1x96xf32>
    %cst_66 = arith.constant 1.000000e+00 : f32
    %177 = vector.broadcast %cst_66 : f32 to vector<1x96xf32>
    %178 = arith.subf %177, %171 : vector<1x96xf32>
    %179 = arith.mulf %178, %176 : vector<1x96xf32>
    %180 = arith.mulf %171, %84 : vector<1x96xf32>
    %181 = arith.addf %179, %180 : vector<1x96xf32>
    %c0_67 = arith.constant 0 : index
    %c0_68 = arith.constant 0 : index
    %182 = vector.load %arg6[%c0_67, %c0_68] : memref<96x288xf32, #tpu.memory_space<vmem>>, vector<96x288xf32>
    %cst_69 = arith.constant dense<0.000000e+00> : vector<1x288xf32>
    %183 = tpu.matmul %181, %182, %cst_69 {dimension_numbers = #tpu.dot_dimension_numbers<[1], [0], [0], [1], [0, 0, 1, 1], [], []>} : vector<1x96xf32>, vector<96x288xf32>, vector<1x288xf32> -> vector<1x288xf32>
    %184 = arith.addf %183, %11 : vector<1x288xf32>
    %c0_70 = arith.constant 0 : index
    %c0_71 = arith.constant 0 : index
    %185 = vector.load %arg9[%c0_70, %c0_71] : memref<96x288xf32, #tpu.memory_space<vmem>>, vector<96x288xf32>
    %cst_72 = arith.constant dense<0.000000e+00> : vector<1x288xf32>
    %186 = tpu.matmul %116, %185, %cst_72 {dimension_numbers = #tpu.dot_dimension_numbers<[1], [0], [0], [1], [0, 0, 1, 1], [], []>} : vector<1x96xf32>, vector<96x288xf32>, vector<1x288xf32> -> vector<1x288xf32>
    %187 = arith.addf %186, %14 : vector<1x288xf32>
    %188 = vector.extract_strided_slice %184 {offsets = [0, 0], sizes = [1, 96], strides = [1, 1]} : vector<1x288xf32> to vector<1x96xf32>
    %189 = vector.extract_strided_slice %187 {offsets = [0, 0], sizes = [1, 96], strides = [1, 1]} : vector<1x288xf32> to vector<1x96xf32>
    %190 = arith.addf %188, %189 : vector<1x96xf32>
    %191 = arith.negf %190 : vector<1x96xf32>
    %192 = math.exp %191 : vector<1x96xf32>
    %cst_73 = arith.constant 1.000000e+00 : f32
    %193 = vector.broadcast %cst_73 : f32 to vector<1x96xf32>
    %194 = arith.addf %193, %192 : vector<1x96xf32>
    %195 = arith.divf %193, %194 : vector<1x96xf32>
    %196 = vector.extract_strided_slice %184 {offsets = [0, 96], sizes = [1, 96], strides = [1, 1]} : vector<1x288xf32> to vector<1x96xf32>
    %197 = vector.extract_strided_slice %187 {offsets = [0, 96], sizes = [1, 96], strides = [1, 1]} : vector<1x288xf32> to vector<1x96xf32>
    %198 = arith.addf %196, %197 : vector<1x96xf32>
    %199 = arith.negf %198 : vector<1x96xf32>
    %200 = math.exp %199 : vector<1x96xf32>
    %cst_74 = arith.constant 1.000000e+00 : f32
    %201 = vector.broadcast %cst_74 : f32 to vector<1x96xf32>
    %202 = arith.addf %201, %200 : vector<1x96xf32>
    %203 = arith.divf %201, %202 : vector<1x96xf32>
    %204 = vector.extract_strided_slice %184 {offsets = [0, 192], sizes = [1, 96], strides = [1, 1]} : vector<1x288xf32> to vector<1x96xf32>
    %205 = vector.extract_strided_slice %187 {offsets = [0, 192], sizes = [1, 96], strides = [1, 1]} : vector<1x288xf32> to vector<1x96xf32>
    %206 = arith.mulf %195, %205 : vector<1x96xf32>
    %207 = arith.addf %204, %206 : vector<1x96xf32>
    %208 = math.tanh %207 : vector<1x96xf32>
    %cst_75 = arith.constant 1.000000e+00 : f32
    %209 = vector.broadcast %cst_75 : f32 to vector<1x96xf32>
    %210 = arith.subf %209, %203 : vector<1x96xf32>
    %211 = arith.mulf %210, %208 : vector<1x96xf32>
    %212 = arith.mulf %203, %116 : vector<1x96xf32>
    %213 = arith.addf %211, %212 : vector<1x96xf32>
    %214 = arith.index_cast %c1_i32 : i32 to index
    %c32_76 = arith.constant 32 : index
    %215 = vector.load %arg19[%214, %c32_76] : memref<4x128xf32, #tpu.memory_space<vmem>>, vector<1x96xf32>
    tpu.vector_store %arg19[%214, %c32_76], %213 {strides = array<i32>} : memref<4x128xf32, #tpu.memory_space<vmem>>, vector<1x96xf32>,
    %c2_i32 = arith.constant 2 : i32
    %c0_77 = arith.constant 0 : index
    %c0_78 = arith.constant 0 : index
    %216 = vector.load %arg7[%c0_77, %c0_78] : memref<96x288xf32, #tpu.memory_space<vmem>>, vector<96x288xf32>
    %cst_79 = arith.constant dense<0.000000e+00> : vector<1x288xf32>
    %217 = tpu.matmul %149, %216, %cst_79 {dimension_numbers = #tpu.dot_dimension_numbers<[1], [0], [0], [1], [0, 0, 1, 1], [], []>} : vector<1x96xf32>, vector<96x288xf32>, vector<1x288xf32> -> vector<1x288xf32>
    %218 = arith.addf %217, %12 : vector<1x288xf32>
    %219 = arith.index_cast %c2_i32 : i32 to index
    %c0_80 = arith.constant 0 : index
    %220 = vector.load %arg20[%219, %c0_80] : memref<4x288xf32, #tpu.memory_space<vmem>>, vector<1x288xf32>
    %221 = vector.extract_strided_slice %220 {offsets = [0, 0], sizes = [1, 96], strides = [1, 1]} : vector<1x288xf32> to vector<1x96xf32>
    %222 = vector.extract_strided_slice %218 {offsets = [0, 0], sizes = [1, 96], strides = [1, 1]} : vector<1x288xf32> to vector<1x96xf32>
    %223 = arith.addf %221, %222 : vector<1x96xf32>
    %224 = arith.negf %223 : vector<1x96xf32>
    %225 = math.exp %224 : vector<1x96xf32>
    %cst_81 = arith.constant 1.000000e+00 : f32
    %226 = vector.broadcast %cst_81 : f32 to vector<1x96xf32>
    %227 = arith.addf %226, %225 : vector<1x96xf32>
    %228 = arith.divf %226, %227 : vector<1x96xf32>
    %229 = vector.extract_strided_slice %220 {offsets = [0, 96], sizes = [1, 96], strides = [1, 1]} : vector<1x288xf32> to vector<1x96xf32>
    %230 = vector.extract_strided_slice %218 {offsets = [0, 96], sizes = [1, 96], strides = [1, 1]} : vector<1x288xf32> to vector<1x96xf32>
    %231 = arith.addf %229, %230 : vector<1x96xf32>
    %232 = arith.negf %231 : vector<1x96xf32>
    %233 = math.exp %232 : vector<1x96xf32>
    %cst_82 = arith.constant 1.000000e+00 : f32
    %234 = vector.broadcast %cst_82 : f32 to vector<1x96xf32>
    %235 = arith.addf %234, %233 : vector<1x96xf32>
    %236 = arith.divf %234, %235 : vector<1x96xf32>
    %237 = vector.extract_strided_slice %220 {offsets = [0, 192], sizes = [1, 96], strides = [1, 1]} : vector<1x288xf32> to vector<1x96xf32>
    %238 = vector.extract_strided_slice %218 {offsets = [0, 192], sizes = [1, 96], strides = [1, 1]} : vector<1x288xf32> to vector<1x96xf32>
    %239 = arith.mulf %228, %238 : vector<1x96xf32>
    %240 = arith.addf %237, %239 : vector<1x96xf32>
    %241 = math.tanh %240 : vector<1x96xf32>
    %cst_83 = arith.constant 1.000000e+00 : f32
    %242 = vector.broadcast %cst_83 : f32 to vector<1x96xf32>
    %243 = arith.subf %242, %236 : vector<1x96xf32>
    %244 = arith.mulf %243, %241 : vector<1x96xf32>
    %245 = arith.mulf %236, %149 : vector<1x96xf32>
    %246 = arith.addf %244, %245 : vector<1x96xf32>
    %c0_84 = arith.constant 0 : index
    %c0_85 = arith.constant 0 : index
    %247 = vector.load %arg5[%c0_84, %c0_85] : memref<96x288xf32, #tpu.memory_space<vmem>>, vector<96x288xf32>
    %cst_86 = arith.constant dense<0.000000e+00> : vector<1x288xf32>
    %248 = tpu.matmul %246, %247, %cst_86 {dimension_numbers = #tpu.dot_dimension_numbers<[1], [0], [0], [1], [0, 0, 1, 1], [], []>} : vector<1x96xf32>, vector<96x288xf32>, vector<1x288xf32> -> vector<1x288xf32>
    %249 = arith.addf %248, %10 : vector<1x288xf32>
    %c0_87 = arith.constant 0 : index
    %c0_88 = arith.constant 0 : index
    %250 = vector.load %arg8[%c0_87, %c0_88] : memref<96x288xf32, #tpu.memory_space<vmem>>, vector<96x288xf32>
    %cst_89 = arith.constant dense<0.000000e+00> : vector<1x288xf32>
    %251 = tpu.matmul %181, %250, %cst_89 {dimension_numbers = #tpu.dot_dimension_numbers<[1], [0], [0], [1], [0, 0, 1, 1], [], []>} : vector<1x96xf32>, vector<96x288xf32>, vector<1x288xf32> -> vector<1x288xf32>
    %252 = arith.addf %251, %13 : vector<1x288xf32>
    %253 = vector.extract_strided_slice %249 {offsets = [0, 0], sizes = [1, 96], strides = [1, 1]} : vector<1x288xf32> to vector<1x96xf32>
    %254 = vector.extract_strided_slice %252 {offsets = [0, 0], sizes = [1, 96], strides = [1, 1]} : vector<1x288xf32> to vector<1x96xf32>
    %255 = arith.addf %253, %254 : vector<1x96xf32>
    %256 = arith.negf %255 : vector<1x96xf32>
    %257 = math.exp %256 : vector<1x96xf32>
    %cst_90 = arith.constant 1.000000e+00 : f32
    %258 = vector.broadcast %cst_90 : f32 to vector<1x96xf32>
    %259 = arith.addf %258, %257 : vector<1x96xf32>
    %260 = arith.divf %258, %259 : vector<1x96xf32>
    %261 = vector.extract_strided_slice %249 {offsets = [0, 96], sizes = [1, 96], strides = [1, 1]} : vector<1x288xf32> to vector<1x96xf32>
    %262 = vector.extract_strided_slice %252 {offsets = [0, 96], sizes = [1, 96], strides = [1, 1]} : vector<1x288xf32> to vector<1x96xf32>
    %263 = arith.addf %261, %262 : vector<1x96xf32>
    %264 = arith.negf %263 : vector<1x96xf32>
    %265 = math.exp %264 : vector<1x96xf32>
    %cst_91 = arith.constant 1.000000e+00 : f32
    %266 = vector.broadcast %cst_91 : f32 to vector<1x96xf32>
    %267 = arith.addf %266, %265 : vector<1x96xf32>
    %268 = arith.divf %266, %267 : vector<1x96xf32>
    %269 = vector.extract_strided_slice %249 {offsets = [0, 192], sizes = [1, 96], strides = [1, 1]} : vector<1x288xf32> to vector<1x96xf32>
    %270 = vector.extract_strided_slice %252 {offsets = [0, 192], sizes = [1, 96], strides = [1, 1]} : vector<1x288xf32> to vector<1x96xf32>
    %271 = arith.mulf %260, %270 : vector<1x96xf32>
    %272 = arith.addf %269, %271 : vector<1x96xf32>
    %273 = math.tanh %272 : vector<1x96xf32>
    %cst_92 = arith.constant 1.000000e+00 : f32
    %274 = vector.broadcast %cst_92 : f32 to vector<1x96xf32>
    %275 = arith.subf %274, %268 : vector<1x96xf32>
    %276 = arith.mulf %275, %273 : vector<1x96xf32>
    %277 = arith.mulf %268, %181 : vector<1x96xf32>
    %278 = arith.addf %276, %277 : vector<1x96xf32>
    %c0_93 = arith.constant 0 : index
    %c0_94 = arith.constant 0 : index
    %279 = vector.load %arg6[%c0_93, %c0_94] : memref<96x288xf32, #tpu.memory_space<vmem>>, vector<96x288xf32>
    %cst_95 = arith.constant dense<0.000000e+00> : vector<1x288xf32>
    %280 = tpu.matmul %278, %279, %cst_95 {dimension_numbers = #tpu.dot_dimension_numbers<[1], [0], [0], [1], [0, 0, 1, 1], [], []>} : vector<1x96xf32>, vector<96x288xf32>, vector<1x288xf32> -> vector<1x288xf32>
    %281 = arith.addf %280, %11 : vector<1x288xf32>
    %c0_96 = arith.constant 0 : index
    %c0_97 = arith.constant 0 : index
    %282 = vector.load %arg9[%c0_96, %c0_97] : memref<96x288xf32, #tpu.memory_space<vmem>>, vector<96x288xf32>
    %cst_98 = arith.constant dense<0.000000e+00> : vector<1x288xf32>
    %283 = tpu.matmul %213, %282, %cst_98 {dimension_numbers = #tpu.dot_dimension_numbers<[1], [0], [0], [1], [0, 0, 1, 1], [], []>} : vector<1x96xf32>, vector<96x288xf32>, vector<1x288xf32> -> vector<1x288xf32>
    %284 = arith.addf %283, %14 : vector<1x288xf32>
    %285 = vector.extract_strided_slice %281 {offsets = [0, 0], sizes = [1, 96], strides = [1, 1]} : vector<1x288xf32> to vector<1x96xf32>
    %286 = vector.extract_strided_slice %284 {offsets = [0, 0], sizes = [1, 96], strides = [1, 1]} : vector<1x288xf32> to vector<1x96xf32>
    %287 = arith.addf %285, %286 : vector<1x96xf32>
    %288 = arith.negf %287 : vector<1x96xf32>
    %289 = math.exp %288 : vector<1x96xf32>
    %cst_99 = arith.constant 1.000000e+00 : f32
    %290 = vector.broadcast %cst_99 : f32 to vector<1x96xf32>
    %291 = arith.addf %290, %289 : vector<1x96xf32>
    %292 = arith.divf %290, %291 : vector<1x96xf32>
    %293 = vector.extract_strided_slice %281 {offsets = [0, 96], sizes = [1, 96], strides = [1, 1]} : vector<1x288xf32> to vector<1x96xf32>
    %294 = vector.extract_strided_slice %284 {offsets = [0, 96], sizes = [1, 96], strides = [1, 1]} : vector<1x288xf32> to vector<1x96xf32>
    %295 = arith.addf %293, %294 : vector<1x96xf32>
    %296 = arith.negf %295 : vector<1x96xf32>
    %297 = math.exp %296 : vector<1x96xf32>
    %cst_100 = arith.constant 1.000000e+00 : f32
    %298 = vector.broadcast %cst_100 : f32 to vector<1x96xf32>
    %299 = arith.addf %298, %297 : vector<1x96xf32>
    %300 = arith.divf %298, %299 : vector<1x96xf32>
    %301 = vector.extract_strided_slice %281 {offsets = [0, 192], sizes = [1, 96], strides = [1, 1]} : vector<1x288xf32> to vector<1x96xf32>
    %302 = vector.extract_strided_slice %284 {offsets = [0, 192], sizes = [1, 96], strides = [1, 1]} : vector<1x288xf32> to vector<1x96xf32>
    %303 = arith.mulf %292, %302 : vector<1x96xf32>
    %304 = arith.addf %301, %303 : vector<1x96xf32>
    %305 = math.tanh %304 : vector<1x96xf32>
    %cst_101 = arith.constant 1.000000e+00 : f32
    %306 = vector.broadcast %cst_101 : f32 to vector<1x96xf32>
    %307 = arith.subf %306, %300 : vector<1x96xf32>
    %308 = arith.mulf %307, %305 : vector<1x96xf32>
    %309 = arith.mulf %300, %213 : vector<1x96xf32>
    %310 = arith.addf %308, %309 : vector<1x96xf32>
    %311 = arith.index_cast %c2_i32 : i32 to index
    %c32_102 = arith.constant 32 : index
    %312 = vector.load %arg19[%311, %c32_102] : memref<4x128xf32, #tpu.memory_space<vmem>>, vector<1x96xf32>
    tpu.vector_store %arg19[%311, %c32_102], %310 {strides = array<i32>} : memref<4x128xf32, #tpu.memory_space<vmem>>, vector<1x96xf32>,
    %c3_i32 = arith.constant 3 : i32
    %c0_103 = arith.constant 0 : index
    %c0_104 = arith.constant 0 : index
    %313 = vector.load %arg7[%c0_103, %c0_104] : memref<96x288xf32, #tpu.memory_space<vmem>>, vector<96x288xf32>
    %cst_105 = arith.constant dense<0.000000e+00> : vector<1x288xf32>
    %314 = tpu.matmul %246, %313, %cst_105 {dimension_numbers = #tpu.dot_dimension_numbers<[1], [0], [0], [1], [0, 0, 1, 1], [], []>} : vector<1x96xf32>, vector<96x288xf32>, vector<1x288xf32> -> vector<1x288xf32>
    %315 = arith.addf %314, %12 : vector<1x288xf32>
    %316 = arith.index_cast %c3_i32 : i32 to index
    %c0_106 = arith.constant 0 : index
    %317 = vector.load %arg20[%316, %c0_106] : memref<4x288xf32, #tpu.memory_space<vmem>>, vector<1x288xf32>
    %318 = vector.extract_strided_slice %317 {offsets = [0, 0], sizes = [1, 96], strides = [1, 1]} : vector<1x288xf32> to vector<1x96xf32>
    %319 = vector.extract_strided_slice %315 {offsets = [0, 0], sizes = [1, 96], strides = [1, 1]} : vector<1x288xf32> to vector<1x96xf32>
    %320 = arith.addf %318, %319 : vector<1x96xf32>
    %321 = arith.negf %320 : vector<1x96xf32>
    %322 = math.exp %321 : vector<1x96xf32>
    %cst_107 = arith.constant 1.000000e+00 : f32
    %323 = vector.broadcast %cst_107 : f32 to vector<1x96xf32>
    %324 = arith.addf %323, %322 : vector<1x96xf32>
    %325 = arith.divf %323, %324 : vector<1x96xf32>
    %326 = vector.extract_strided_slice %317 {offsets = [0, 96], sizes = [1, 96], strides = [1, 1]} : vector<1x288xf32> to vector<1x96xf32>
    %327 = vector.extract_strided_slice %315 {offsets = [0, 96], sizes = [1, 96], strides = [1, 1]} : vector<1x288xf32> to vector<1x96xf32>
    %328 = arith.addf %326, %327 : vector<1x96xf32>
    %329 = arith.negf %328 : vector<1x96xf32>
    %330 = math.exp %329 : vector<1x96xf32>
    %cst_108 = arith.constant 1.000000e+00 : f32
    %331 = vector.broadcast %cst_108 : f32 to vector<1x96xf32>
    %332 = arith.addf %331, %330 : vector<1x96xf32>
    %333 = arith.divf %331, %332 : vector<1x96xf32>
    %334 = vector.extract_strided_slice %317 {offsets = [0, 192], sizes = [1, 96], strides = [1, 1]} : vector<1x288xf32> to vector<1x96xf32>
    %335 = vector.extract_strided_slice %315 {offsets = [0, 192], sizes = [1, 96], strides = [1, 1]} : vector<1x288xf32> to vector<1x96xf32>
    %336 = arith.mulf %325, %335 : vector<1x96xf32>
    %337 = arith.addf %334, %336 : vector<1x96xf32>
    %338 = math.tanh %337 : vector<1x96xf32>
    %cst_109 = arith.constant 1.000000e+00 : f32
    %339 = vector.broadcast %cst_109 : f32 to vector<1x96xf32>
    %340 = arith.subf %339, %333 : vector<1x96xf32>
    %341 = arith.mulf %340, %338 : vector<1x96xf32>
    %342 = arith.mulf %333, %246 : vector<1x96xf32>
    %343 = arith.addf %341, %342 : vector<1x96xf32>
    %c0_110 = arith.constant 0 : index
    %c0_111 = arith.constant 0 : index
    %344 = vector.load %arg5[%c0_110, %c0_111] : memref<96x288xf32, #tpu.memory_space<vmem>>, vector<96x288xf32>
    %cst_112 = arith.constant dense<0.000000e+00> : vector<1x288xf32>
    %345 = tpu.matmul %343, %344, %cst_112 {dimension_numbers = #tpu.dot_dimension_numbers<[1], [0], [0], [1], [0, 0, 1, 1], [], []>} : vector<1x96xf32>, vector<96x288xf32>, vector<1x288xf32> -> vector<1x288xf32>
    %346 = arith.addf %345, %10 : vector<1x288xf32>
    %c0_113 = arith.constant 0 : index
    %c0_114 = arith.constant 0 : index
    %347 = vector.load %arg8[%c0_113, %c0_114] : memref<96x288xf32, #tpu.memory_space<vmem>>, vector<96x288xf32>
    %cst_115 = arith.constant dense<0.000000e+00> : vector<1x288xf32>
    %348 = tpu.matmul %278, %347, %cst_115 {dimension_numbers = #tpu.dot_dimension_numbers<[1], [0], [0], [1], [0, 0, 1, 1], [], []>} : vector<1x96xf32>, vector<96x288xf32>, vector<1x288xf32> -> vector<1x288xf32>
    %349 = arith.addf %348, %13 : vector<1x288xf32>
    %350 = vector.extract_strided_slice %346 {offsets = [0, 0], sizes = [1, 96], strides = [1, 1]} : vector<1x288xf32> to vector<1x96xf32>
    %351 = vector.extract_strided_slice %349 {offsets = [0, 0], sizes = [1, 96], strides = [1, 1]} : vector<1x288xf32> to vector<1x96xf32>
    %352 = arith.addf %350, %351 : vector<1x96xf32>
    %353 = arith.negf %352 : vector<1x96xf32>
    %354 = math.exp %353 : vector<1x96xf32>
    %cst_116 = arith.constant 1.000000e+00 : f32
    %355 = vector.broadcast %cst_116 : f32 to vector<1x96xf32>
    %356 = arith.addf %355, %354 : vector<1x96xf32>
    %357 = arith.divf %355, %356 : vector<1x96xf32>
    %358 = vector.extract_strided_slice %346 {offsets = [0, 96], sizes = [1, 96], strides = [1, 1]} : vector<1x288xf32> to vector<1x96xf32>
    %359 = vector.extract_strided_slice %349 {offsets = [0, 96], sizes = [1, 96], strides = [1, 1]} : vector<1x288xf32> to vector<1x96xf32>
    %360 = arith.addf %358, %359 : vector<1x96xf32>
    %361 = arith.negf %360 : vector<1x96xf32>
    %362 = math.exp %361 : vector<1x96xf32>
    %cst_117 = arith.constant 1.000000e+00 : f32
    %363 = vector.broadcast %cst_117 : f32 to vector<1x96xf32>
    %364 = arith.addf %363, %362 : vector<1x96xf32>
    %365 = arith.divf %363, %364 : vector<1x96xf32>
    %366 = vector.extract_strided_slice %346 {offsets = [0, 192], sizes = [1, 96], strides = [1, 1]} : vector<1x288xf32> to vector<1x96xf32>
    %367 = vector.extract_strided_slice %349 {offsets = [0, 192], sizes = [1, 96], strides = [1, 1]} : vector<1x288xf32> to vector<1x96xf32>
    %368 = arith.mulf %357, %367 : vector<1x96xf32>
    %369 = arith.addf %366, %368 : vector<1x96xf32>
    %370 = math.tanh %369 : vector<1x96xf32>
    %cst_118 = arith.constant 1.000000e+00 : f32
    %371 = vector.broadcast %cst_118 : f32 to vector<1x96xf32>
    %372 = arith.subf %371, %365 : vector<1x96xf32>
    %373 = arith.mulf %372, %370 : vector<1x96xf32>
    %374 = arith.mulf %365, %278 : vector<1x96xf32>
    %375 = arith.addf %373, %374 : vector<1x96xf32>
    %c0_119 = arith.constant 0 : index
    %c0_120 = arith.constant 0 : index
    %376 = vector.load %arg6[%c0_119, %c0_120] : memref<96x288xf32, #tpu.memory_space<vmem>>, vector<96x288xf32>
    %cst_121 = arith.constant dense<0.000000e+00> : vector<1x288xf32>
    %377 = tpu.matmul %375, %376, %cst_121 {dimension_numbers = #tpu.dot_dimension_numbers<[1], [0], [0], [1], [0, 0, 1, 1], [], []>} : vector<1x96xf32>, vector<96x288xf32>, vector<1x288xf32> -> vector<1x288xf32>
    %378 = arith.addf %377, %11 : vector<1x288xf32>
    %c0_122 = arith.constant 0 : index
    %c0_123 = arith.constant 0 : index
    %379 = vector.load %arg9[%c0_122, %c0_123] : memref<96x288xf32, #tpu.memory_space<vmem>>, vector<96x288xf32>
    %cst_124 = arith.constant dense<0.000000e+00> : vector<1x288xf32>
    %380 = tpu.matmul %310, %379, %cst_124 {dimension_numbers = #tpu.dot_dimension_numbers<[1], [0], [0], [1], [0, 0, 1, 1], [], []>} : vector<1x96xf32>, vector<96x288xf32>, vector<1x288xf32> -> vector<1x288xf32>
    %381 = arith.addf %380, %14 : vector<1x288xf32>
    %382 = vector.extract_strided_slice %378 {offsets = [0, 0], sizes = [1, 96], strides = [1, 1]} : vector<1x288xf32> to vector<1x96xf32>
    %383 = vector.extract_strided_slice %381 {offsets = [0, 0], sizes = [1, 96], strides = [1, 1]} : vector<1x288xf32> to vector<1x96xf32>
    %384 = arith.addf %382, %383 : vector<1x96xf32>
    %385 = arith.negf %384 : vector<1x96xf32>
    %386 = math.exp %385 : vector<1x96xf32>
    %cst_125 = arith.constant 1.000000e+00 : f32
    %387 = vector.broadcast %cst_125 : f32 to vector<1x96xf32>
    %388 = arith.addf %387, %386 : vector<1x96xf32>
    %389 = arith.divf %387, %388 : vector<1x96xf32>
    %390 = vector.extract_strided_slice %378 {offsets = [0, 96], sizes = [1, 96], strides = [1, 1]} : vector<1x288xf32> to vector<1x96xf32>
    %391 = vector.extract_strided_slice %381 {offsets = [0, 96], sizes = [1, 96], strides = [1, 1]} : vector<1x288xf32> to vector<1x96xf32>
    %392 = arith.addf %390, %391 : vector<1x96xf32>
    %393 = arith.negf %392 : vector<1x96xf32>
    %394 = math.exp %393 : vector<1x96xf32>
    %cst_126 = arith.constant 1.000000e+00 : f32
    %395 = vector.broadcast %cst_126 : f32 to vector<1x96xf32>
    %396 = arith.addf %395, %394 : vector<1x96xf32>
    %397 = arith.divf %395, %396 : vector<1x96xf32>
    %398 = vector.extract_strided_slice %378 {offsets = [0, 192], sizes = [1, 96], strides = [1, 1]} : vector<1x288xf32> to vector<1x96xf32>
    %399 = vector.extract_strided_slice %381 {offsets = [0, 192], sizes = [1, 96], strides = [1, 1]} : vector<1x288xf32> to vector<1x96xf32>
    %400 = arith.mulf %389, %399 : vector<1x96xf32>
    %401 = arith.addf %398, %400 : vector<1x96xf32>
    %402 = math.tanh %401 : vector<1x96xf32>
    %cst_127 = arith.constant 1.000000e+00 : f32
    %403 = vector.broadcast %cst_127 : f32 to vector<1x96xf32>
    %404 = arith.subf %403, %397 : vector<1x96xf32>
    %405 = arith.mulf %404, %402 : vector<1x96xf32>
    %406 = arith.mulf %397, %310 : vector<1x96xf32>
    %407 = arith.addf %405, %406 : vector<1x96xf32>
    %408 = arith.index_cast %c3_i32 : i32 to index
    %c32_128 = arith.constant 32 : index
    %409 = vector.load %arg19[%408, %c32_128] : memref<4x128xf32, #tpu.memory_space<vmem>>, vector<1x96xf32>
    tpu.vector_store %arg19[%408, %c32_128], %407 {strides = array<i32>} : memref<4x128xf32, #tpu.memory_space<vmem>>, vector<1x96xf32>,
    %c4_i32 = arith.constant 4 : i32
    %c0_129 = arith.constant 0 : index
    %c0_130 = arith.constant 0 : index
    %410 = vector.load %arg19[%c0_129, %c0_130] : memref<4x128xf32, #tpu.memory_space<vmem>>, vector<4x128xf32>
    %c0_131 = arith.constant 0 : index
    %c0_132 = arith.constant 0 : index
    %411 = vector.load %arg12[%c0_131, %c0_132] : memref<128x32xf32, #tpu.memory_space<vmem>>, vector<128x32xf32>
    %cst_133 = arith.constant dense<0.000000e+00> : vector<4x32xf32>
    %412 = tpu.matmul %410, %411, %cst_133 {dimension_numbers = #tpu.dot_dimension_numbers<[1], [0], [0], [1], [0, 0, 1, 1], [], []>} : vector<4x128xf32>, vector<128x32xf32>, vector<4x32xf32> -> vector<4x32xf32>
    %c0_134 = arith.constant 0 : index
    %c0_135 = arith.constant 0 : index
    %413 = vector.load %arg13[%c0_134, %c0_135] : memref<1x32xf32, #tpu.memory_space<vmem>>, vector<1x32xf32>
    %414 = vector.broadcast %413 : vector<1x32xf32> to vector<4x32xf32>
    %415 = arith.addf %412, %414 : vector<4x32xf32>
    %cst_136 = arith.constant 0.000000e+00 : f32
    %416 = vector.broadcast %cst_136 : f32 to vector<4x32xf32>
    %417 = arith.maximumf %415, %416 : vector<4x32xf32>
    %c0_137 = arith.constant 0 : index
    %c0_138 = arith.constant 0 : index
    %418 = vector.load %arg14[%c0_137, %c0_138] : memref<32x32xf32, #tpu.memory_space<vmem>>, vector<32x32xf32>
    %cst_139 = arith.constant dense<0.000000e+00> : vector<4x32xf32>
    %419 = tpu.matmul %417, %418, %cst_139 {dimension_numbers = #tpu.dot_dimension_numbers<[1], [0], [0], [1], [0, 0, 1, 1], [], []>} : vector<4x32xf32>, vector<32x32xf32>, vector<4x32xf32> -> vector<4x32xf32>
    %c0_140 = arith.constant 0 : index
    %c0_141 = arith.constant 0 : index
    %420 = vector.load %arg15[%c0_140, %c0_141] : memref<1x32xf32, #tpu.memory_space<vmem>>, vector<1x32xf32>
    %421 = vector.broadcast %420 : vector<1x32xf32> to vector<4x32xf32>
    %422 = arith.addf %419, %421 : vector<4x32xf32>
    %cst_142 = arith.constant 0.000000e+00 : f32
    %423 = vector.broadcast %cst_142 : f32 to vector<4x32xf32>
    %424 = arith.maximumf %422, %423 : vector<4x32xf32>
    %c0_143 = arith.constant 0 : index
    %c0_144 = arith.constant 0 : index
    %425 = vector.load %arg16[%c0_143, %c0_144] : memref<32x5xf32, #tpu.memory_space<vmem>>, vector<32x5xf32>
    %cst_145 = arith.constant dense<0.000000e+00> : vector<4x5xf32>
    %426 = tpu.matmul %424, %425, %cst_145 {dimension_numbers = #tpu.dot_dimension_numbers<[1], [0], [0], [1], [0, 0, 1, 1], [], []>} : vector<4x32xf32>, vector<32x5xf32>, vector<4x5xf32> -> vector<4x5xf32>
    %c0_146 = arith.constant 0 : index
    %c0_147 = arith.constant 0 : index
    %427 = vector.load %arg17[%c0_146, %c0_147] : memref<1x5xf32, #tpu.memory_space<vmem>>, vector<1x5xf32>
    %428 = vector.broadcast %427 : vector<1x5xf32> to vector<4x5xf32>
    %429 = arith.addf %426, %428 : vector<4x5xf32>
    %c0_148 = arith.constant 0 : index
    %c0_149 = arith.constant 0 : index
    %430 = vector.load %arg18[%c0_148, %c0_149] : memref<4x5xf32, #tpu.memory_space<vmem>>, vector<4x5xf32>
    tpu.vector_store %arg18[%c0_148, %c0_149], %429 {strides = array<i32>} : memref<4x5xf32, #tpu.memory_space<vmem>>, vector<4x5xf32>,
    return
  }
}

</mosaic_0001>

<bundles_post_ra>
// kernel: ts_encoder_forward.1
= control target key start
LH: loop header
LB: loop body
LE: loop exit
PB: predicated region body
PF: predicated region fallthrough
CT: control target
= control target key end

     0   :  { %s4956_s0 = inlined_call_operand.vmem [shape: f32[4,6], index: 0, kind: input, shape index: {}]   ;;  %s4957_s1 = inlined_call_operand.vmem [shape: f32[4,48], index: 1, kind: input, shape index: {}]   ;;  %s4958_s2 = inlined_call_operand.vmem [shape: f32[6,32], index: 2, kind: input, shape index: {}]   ;;  %s4959_s3 = inlined_call_operand.hbm [shape: f32[1,32], index: 3, kind: input, shape index: {}]   ;;  %s4960_s4 = inlined_call_operand.vmem [shape: f32[48,288], index: 4, kind: input, shape index: {}]   ;;  %s4961_s5 = inlined_call_operand.hbm [shape: f32[96,288], index: 5, kind: input, shape index: {}]   ;;  %s4962_s6 = inlined_call_operand.hbm [shape: f32[96,288], index: 6, kind: input, shape index: {}]   ;;  %s4963_s7 = inlined_call_operand.hbm [shape: f32[96,288], index: 7, kind: input, shape index: {}]   ;;  %s4964_s8 = inlined_call_operand.hbm [shape: f32[96,288], index: 8, kind: input, shape index: {}]   ;;  %s4965_s9 = inlined_call_operand.hbm [shape: f32[96,288], index: 9, kind: input, shape index: {}]   ;;  %s4966_s10 = inlined_call_operand.vmem [shape: f32[3,288], index: 10, kind: input, shape index: {}]   ;;  %s4967_s11 = inlined_call_operand.vmem [shape: f32[3,288], index: 11, kind: input, shape index: {}]   ;;  %s4968_s12 = inlined_call_operand.vmem [shape: f32[128,32], index: 12, kind: input, shape index: {}]   ;;  %s4969_s13 = inlined_call_operand.hbm [shape: f32[1,32], index: 13, kind: input, shape index: {}]   ;;  %s4970_s14 = inlined_call_operand.vmem [shape: f32[32,32], index: 14, kind: input, shape index: {}]   ;;  %s4971_s15 = inlined_call_operand.hbm [shape: f32[1,32], index: 15, kind: input, shape index: {}]   ;;  %s4972_s16 = inlined_call_operand.vmem [shape: f32[32,5], index: 16, kind: input, shape index: {}]   ;;  %s4973_s17 = inlined_call_operand.hbm [shape: f32[1,5], index: 17, kind: input, shape index: {}]   ;;  %s4974_s18 = inlined_call_operand.hbm [shape: f32[4,5], index: 18, kind: output, shape index: {}]  }
   0x1   :  { %4975 = sst [smem:[#allocation26_spill]] %s4956_s0 }
   0x2   :  { %4976 = sst [smem:[#allocation27_spill]] %s4957_s1 }
   0x3   :  { %4977 = sst [smem:[#allocation28_spill]] %s4958_s2 }
   0x4   :  { %23 = vsyncpa [#allocation5], 0 }
   0x5   :  { %24 = vsyncpa [#allocation8], 0 }
   0x6   :  { %25 = vsyncpa [#allocation11], 0 }
   0x7   :  { %26 = vsyncpa [#allocation14], 0 }
   0x8   :  { %27 = vsyncpa [#allocation17], 0  ;;  %s52_s29 = sshll.u32 %s4961_s5, 4  ;;  %s53_s29 = int_to_ptr.hbm [resolvable:$true] %s52_s29 }
   0x9   :  { %28 = vsyncpa [#allocation6], 0  ;;  %s3946_s30 = smov [#allocation7]   ;;  %s78_s20 = sshll.u32 %s4963_s7, 4  ;;  %s79_s20 = int_to_ptr.hbm [resolvable:$true] %s78_s20 }
   0xa   :  { %s54_s0 = sshll.u32 %s3946_s30, 4  ;;  %s3947_s21 = smov 384   ;;  %s55_s0 = int_to_ptr.vmem [resolvable:$true] %s54_s0 }
   0xb   :  { %s3948_s22 = smov 24   ;;  %s3949_s2 = smov [#allocation10]  }
   0xc   :  { %60 = dma.hbm_to_vmem [thread:$0]  %s53_s29, 4608, %s55_s0, [#allocation8], %s3947_s21, %s3947_s21, %s3948_s22  }
   0xd   :  { %s80_s23 = sshll.u32 %s3949_s2, 4  ;;  %s104_s25 = sshll.u32 %s4965_s9, 4  ;;  %s81_s23 = int_to_ptr.vmem [resolvable:$true] %s80_s23  ;;  %s105_s25 = int_to_ptr.hbm [resolvable:$true] %s104_s25 }
   0xe   :  { %86 = dma.hbm_to_vmem [thread:$0]  %s79_s20, 4608, %s81_s23, [#allocation11], %s3947_s21, %s3947_s21, %s3948_s22  }
   0xf   :  { %s137_s27 = sshll.u32 %s4971_s15, 4  ;;  %s3950_s28 = smov [#allocation13]   ;;  %s138_s27 = int_to_ptr.hbm [resolvable:$true] %s137_s27 }
  0x10   :  { %s106_s30 = sshll.u32 %s3950_s28, 4  ;;  %s3951_s29 = smov [#allocation16]   ;;  %s107_s30 = int_to_ptr.vmem [resolvable:$true] %s106_s30 }
  0x11   :  { %112 = dma.hbm_to_vmem [thread:$0]  %s105_s25, 4608, %s107_s30, [#allocation14], %s3947_s21, %s3947_s21, %s3948_s22  }
  0x12   :  { %s139_s9 = sshll.u32 %s3951_s29, 4  ;;  %s40_s1 = sshll.u32 %s4959_s3, 4  ;;  %s140_s9 = int_to_ptr.vmem [resolvable:$true] %s139_s9  ;;  %s41_s1 = int_to_ptr.hbm [resolvable:$true] %s40_s1 }
  0x13   :  { %142 = dma.hbm_to_vmem [thread:$0]  %s138_s27, 16, %s140_s9, [#allocation17]  }
  0x14   :  { %s65_s15 = sshll.u32 %s4962_s6, 4  ;;  %s3952_s23 = smov [#allocation4]   ;;  %s66_s15 = int_to_ptr.hbm [resolvable:$true] %s65_s15 }
  0x15   :  { %s42_s24 = sshll.u32 %s3952_s23, 4  ;;  %s3953_s5 = smov [#allocation9]   ;;  %s43_s24 = int_to_ptr.vmem [resolvable:$true] %s42_s24 }
  0x16   :  { %45 = dma.hbm_to_vmem [thread:$0]  %s41_s1, 16, %s43_s24, [#allocation5]  }
  0x17   :  { %s67_s25 = sshll.u32 %s3953_s5, 4  ;;  %s91_s28 = sshll.u32 %s4964_s8, 4  ;;  %s68_s25 = int_to_ptr.vmem [resolvable:$true] %s67_s25  ;;  %s92_s28 = int_to_ptr.hbm [resolvable:$true] %s91_s28 }
  0x18   :  { %73 = dma.hbm_to_vmem [thread:$0]  %s66_s15, 4608, %s68_s25, [#allocation8], %s3947_s21, %s3947_s21, %s3948_s22  }
  0x19   :  { %s124_s6 = sshll.u32 %s4969_s13, 4  ;;  %s3954_s30 = smov [#allocation12]   ;;  %s125_s6 = int_to_ptr.hbm [resolvable:$true] %s124_s6 }
  0x1a   :  { %s93_s29 = sshll.u32 %s3954_s30, 4  ;;  %s3955_s9 = smov [#allocation15]   ;;  %s94_s29 = int_to_ptr.vmem [resolvable:$true] %s93_s29 }
  0x1b   :  { %99 = dma.hbm_to_vmem [thread:$0]  %s92_s28, 4608, %s94_s29, [#allocation11], %s3947_s21, %s3947_s21, %s3948_s22  }
  0x1c   :  { %s126_s8 = sshll.u32 %s3955_s9, 4  ;;  %s150_s1 = sshll.u32 %s4973_s17, 4  ;;  %s127_s8 = int_to_ptr.vmem [resolvable:$true] %s126_s8  ;;  %s151_s1 = int_to_ptr.hbm [resolvable:$true] %s150_s1 }
  0x1d   :  { %129 = dma.hbm_to_vmem [thread:$0]  %s125_s6, 16, %s127_s8, [#allocation14]  }
  0x1e   :  { %s3956_s20 = smov [#allocation18]  }
  0x1f   :  { %s152_s2 = sshll.u32 %s3956_s20, 4  ;;  %s153_s2 = int_to_ptr.vmem [resolvable:$true] %s152_s2 }
  0x20   :  { %155 = dma.hbm_to_vmem [thread:$0]  %s151_s1, 16, %s153_s2, [#allocation17]  }
  0x21   :  { %3934 = dma.done.wait [#allocation5], 16  }
  0x22   :  { %3935 = vsyncadd [#allocation5], 4294967280 }
  0x23   :  { %3936 = dma.done.wait [#allocation8], 9216  }
  0x24   :  { %3937 = vsyncadd [#allocation8], 4294958080 }
  0x25   :  { %3938 = dma.done.wait [#allocation11], 9216  }
  0x26   :  { %3939 = vsyncadd [#allocation11], 4294958080 }
  0x27   :  { %3940 = dma.done.wait [#allocation14], 4624  }
  0x28   :  { %3941 = vsyncadd [#allocation14], 4294962672 }
  0x29   :  { %3942 = dma.done.wait [#allocation17], 32  }
  0x2a   :  { %3943 = vsyncadd [#allocation17], 4294967264  ;;  %vm202_vm0 = vcmask 1045504   ;;  %v255_v0 = vld [vmem:[%s4960_s4 + $0x78] sm:$0xff]  ;;  %v256_v1 = vld [vmem:[%s4960_s4 + $0x80] sm:$0xff]  ;;  %s4978_s26 = sld [smem:[#allocation28_spill]] }
  0x2b   :  { %v252_v2 = vld [vmem:[%s4960_s4 + $0x60] sm:$0xff]  ;;  %279 = vmatpush.msra.mxu1 %v255_v0  ;;  %299 = vmatpush.msra.mxu2 %v256_v1  ;;  %v253_v3 = vld [vmem:[%s4960_s4 + $0x68] sm:$0xff]  ;;  %v250_v6 = vld [vmem:[%s4960_s4 + $0x50] sm:$0xff]  ;;  %s4979_s17 = sld [smem:[#allocation26_spill]]  ;;  %vm198_vm1 = vcmask 48128   ;;  %vm265_vm2 = vcmask 392192  }
  0x2c   :  { %v249_v5 = vld [vmem:[%s4960_s4 + $0x48] sm:$0xff]  ;;  %v254_v8 = vld [vmem:[%s4960_s4 + $0x70] sm:$0xff]  ;;  %v370_v9 = vld [vmem:[#allocation10 + $0x108] sm:$0xff]  ;;  %s4980_s29 = sld [smem:[#allocation27_spill]]  ;;  %v3957_v53 = vmov 0.0   ;;  %vm227_vm3 = vcmask 257024  }
  0x2d   :  { %v257_v7 = vld [vmem:[%s4960_s4 + $0x88] sm:$0xff]  ;;  %280 = vmatpush.msra.mxu1 %v252_v2  ;;  %300 = vmatpush.msra.mxu2 %v253_v3  ;;  %v246_v10 = vld [vmem:[%s4960_s4 + $0x30] sm:$0xff]  ;;  %v247_v11 = vld [vmem:[%s4960_s4 + $0x38] sm:$0xff]  ;;  %vm332_vm4 = vcmask 1043456   ;;  %vm468_vm5 = vcmask 1040384   ;;  %s3958_s13 = smov 64  }
  0x2e   :  { %388 = vmatpush.msra.mxu0 %v370_v9  ;;  %v367_v13 = vld [vmem:[#allocation10 + $0xf0] sm:$0xff]  ;;  %v243_v14 = vld [vmem:[%s4960_s4 + $0x18] sm:$0xff]  ;;  %v364_v16 = vld [vmem:[#allocation10 + $0xd8] sm:$0xff]  ;;  %vm497_vm9 = vcmask 523264   ;;  %vm380_vm15 = vcmask 785408   ;;  %s3960_s21 = smov 32  }
  0x2f   :  { %281 = vmatpush.msra.mxu1 %v249_v5  ;;  %301 = vmatpush.msra.mxu2 %v250_v6  ;;  %v244_v15 = vld [vmem:[%s4960_s4 + $0x20] sm:$0xff]  ;;  %v251_v17 = vld [vmem:[%s4960_s4 + $0x58] sm:$0xff]  ;;  %v241_v19 = vld [vmem:[%s4960_s4 + $0x8] sm:$0xff]  ;;  %s3961_s22 = smov [#allocation19]   ;;  %s3438_s5 = sshll.u32 %s4974_s18, 4  ;;  %s3439_s5 = int_to_ptr.hbm [resolvable:$true] %s3438_s5 }
  0x30   :  { %v193_v4 = vld [vmem:[%s4978_s26] sm:$0x3f]  ;;  %389 = vmatpush.msra.mxu0 %v367_v13  ;;  %v361_v20 = vld [vmem:[#allocation10 + $0xc0] sm:$0xff]  ;;  %v372_v23 = vld [vmem:[#allocation10 + $0x118] sm:$0xff]  ;;  %s3436_s15 = sshll.u32 %s3961_s22, 4  ;;  %s3437_s15 = int_to_ptr.vmem [resolvable:$true] %s3436_s15 }
  0x31   :  { %3452 = vmatpush.msk.msra.mxu3 %vm202_vm0, %v193_v4  ;;  %v192_v12 = vld [vmem:[%s4979_s17] sm:$0xf]  ;;  %282 = vmatpush.msra.mxu1 %v246_v10  ;;  %v245_v26 = vld [vmem:[%s4960_s4 + $0x28] sm:$0xff]  ;;  %v369_v28 = vld [vmem:[#allocation10 + $0x100] sm:$0xff]  ;;  %s3959_s17 = smov 96   ;;  %vm563_vm0 = vcmask 261120  }
  0x32   :  { %302 = vmatpush.msra.mxu2 %v247_v11  ;;  %3453 = vmatmul.msk.f32.vlgmr.msra.gmra.mxu3 %vm198_vm1, %v192_v12  ;;  %v240_v18 = vld [vmem:[%s4960_s4] sm:$0xff]  ;;  %v4162_v27 = vld [vmem:[#allocation10 + $0xf8] sm:$0xff]  ;;  %v4168_v31 = vld [vmem:[#allocation10 + $0xe0] sm:$0xff] }
  0x33   :  { %319 = vmatpush.msrb.mxu3 %v257_v7  ;;  %390 = vmatpush.msra.mxu0 %v364_v16  ;;  %v248_v21 = vld [vmem:[%s4960_s4 + $0x40] sm:$0xff]  ;;  %v242_v29 = vld [vmem:[%s4960_s4 + $0x10] sm:$0xff] }
  0x34   :  { %283 = vmatpush.msra.mxu1 %v243_v14  ;;  %303 = vmatpush.msra.mxu2 %v244_v15  ;;  %v4153_v22 = vld [vmem:[#allocation10 + $0x110] sm:$0xff]  ;;  %v358_v24 = vld [vmem:[#allocation10 + $0xa8] sm:$0xff]  ;;  %v352_v33 = vld [vmem:[#allocation10 + $0x78] sm:$0xff] }
  0x35   :  { %320 = vmatpush.msrb.mxu3 %v254_v8  ;;  %391 = vmatpush.msra.mxu0 %v361_v20  ;;  %v239_v25 = vld [vmem:[%s4980_s29] sm:$0xf]  ;;  %v349_v36 = vld [vmem:[#allocation10 + $0x60] sm:$0xff]  ;;  %v360_v38 = vld [vmem:[#allocation10 + $0xb8] sm:$0xff] }
  0x36   :  { %284 = vmatpush.msra.mxu1 %v240_v18  ;;  %304 = vmatpush.msra.mxu2 %v241_v19  ;;  %v355_v30 = vld [vmem:[#allocation10 + $0x90] sm:$0xff]  ;;  %v366_v32 = vld [vmem:[#allocation10 + $0xe8] sm:$0xff]  ;;  %v4177_v39 = vld [vmem:[#allocation10 + $0x98] sm:$0xff] }
  0x37   :  { %321 = vmatpush.msrb.mxu3 %v251_v17  ;;  %392 = vmatpush.msra.mxu0 %v358_v24  ;;  %v4171_v34 = vld [vmem:[#allocation10 + $0xc8] sm:$0xff]  ;;  %v363_v35 = vld [vmem:[#allocation10 + $0xd0] sm:$0xff]  ;;  %v357_v41 = vld [vmem:[#allocation10 + $0xa0] sm:$0xff] }
  0x38   :  { %408 = vmatpush.msrb.mxu1 %v4153_v22  ;;  %428 = vmatpush.msrb.mxu2 %v372_v23  ;;  %v4175_v37 = vld [vmem:[#allocation10 + $0xb0] sm:$0xff]  ;;  %v346_v40 = vld [vmem:[#allocation10 + $0x48] sm:$0xff]  ;;  %v4182_v43 = vld [vmem:[#allocation10 + $0x80] sm:$0xff] }
  0x39   :  { %322 = vmatpush.msrb.mxu3 %v248_v21  ;;  %3459 = vmatmul.msk.f32.vlgmr.msra.gmra.mxu2 %vm265_vm2, %v239_v25  ;;  %v343_v42 = vld [vmem:[#allocation10 + $0x30] sm:$0xff]  ;;  %v354_v44 = vld [vmem:[#allocation10 + $0x88] sm:$0xff]  ;;  %v340_v45 = vld [vmem:[#allocation10 + $0x18] sm:$0xff] }
  0x3a   :  { %409 = vmatpush.msrb.mxu1 %v4162_v27  ;;  %429 = vmatpush.msrb.mxu2 %v369_v28  ;;  %v4185_v46 = vld [vmem:[#allocation10 + $0x68] sm:$0xff]  ;;  %v351_v47 = vld [vmem:[#allocation10 + $0x70] sm:$0xff]  ;;  %v337_v48 = vld [vmem:[#allocation10] sm:$0xff] }
  0x3b   :  { %323 = vmatpush.msrb.mxu3 %v245_v26  ;;  %393 = vmatpush.msra.mxu0 %v355_v30  ;;  %v4188_v49 = vld [vmem:[#allocation10 + $0x50] sm:$0xff]  ;;  %v348_v50 = vld [vmem:[#allocation10 + $0x58] sm:$0xff]  ;;  %v345_v52 = vld [vmem:[#allocation10 + $0x40] sm:$0xff] }
  0x3c   :  { %410 = vmatpush.msrb.mxu1 %v4168_v31  ;;  %430 = vmatpush.msrb.mxu2 %v366_v32  ;;  %v4191_v51 = vld [vmem:[#allocation10 + $0x38] sm:$0xff]  ;;  %v4195_v54 = vld [vmem:[#allocation10 + $0x20] sm:$0xff]  ;;  %v342_v55 = vld [vmem:[#allocation10 + $0x28] sm:$0xff] }
  0x3d   :  { %324 = vmatpush.msrb.mxu3 %v242_v29  ;;  %394 = vmatpush.msra.mxu0 %v352_v33  ;;  %v4198_v56 = vld [vmem:[#allocation10 + $0x8] sm:$0xff]  ;;  %v339_v57 = vld [vmem:[#allocation10 + $0x10] sm:$0xff]  ;;  %v3554_v58 = vld [vmem:[#allocation4] ss:$0 sm:$0xff] }
  0x3e   :  { %3460 = vmatmul.msk.f32.vlgmr.msrb.gmra.mxu3 %vm265_vm2, %v239_v25  ;;  %411 = vmatpush.msrb.mxu1 %v4171_v34  ;;  %v229_v60 = vld [vmem:[%s4966_s10] ss:$4 sm:$0x7] }
  0x3f   :  { %431 = vmatpush.msrb.mxu2 %v363_v35  ;;  %3458 = vmatmul.msk.f32.vlgmr.msra.gmra.mxu1 %vm265_vm2, %v239_v25  ;;  %v260_v63 = vperm.slane %v229_v60, 1  ;;  %v259_v0 = vperm.slane %v229_v60, 0  ;;  %v261_v5 = vperm.slane %v229_v60, 2  ;;  %v234_v10 = vld [vmem:[%s4967_s11] ss:$4 sm:$0x7] }
  0x40   :  { %395 = vmatpush.msra.mxu0 %v349_v36  ;;  %412 = vmatpush.msrb.mxu1 %v4175_v37  ;;  %v4210_v11 = vperm.slane %v234_v10, 1  ;;  %v4212_v12 = vperm.slane %v234_v10, 0  ;;  %v4216_v18 = vperm.slane %v234_v10, 2  ;;  %v545_v10 = vld [vmem:[#allocation7 + $0xc8] sm:$0xff] }
  0x41   :  { %432 = vmatpush.msrb.mxu2 %v360_v38 }
  0x42   :  { %396 = vmatpush.msra.mxu0 %v346_v40  ;;  %413 = vmatpush.msrb.mxu1 %v4177_v39 }
  0x43   :  { %433 = vmatpush.msrb.mxu2 %v357_v41 }
  0x44   :  { %397 = vmatpush.msra.mxu0 %v343_v42  ;;  %414 = vmatpush.msrb.mxu1 %v4182_v43 }
  0x45   :  { %434 = vmatpush.msrb.mxu2 %v354_v44 }
  0x46   :  { %398 = vmatpush.msra.mxu0 %v340_v45  ;;  %415 = vmatpush.msrb.mxu1 %v4185_v46 }
  0x47   :  { %435 = vmatpush.msrb.mxu2 %v351_v47 }
  0x48   :  { %399 = vmatpush.msra.mxu0 %v337_v48  ;;  %416 = vmatpush.msrb.mxu1 %v4188_v49 }
  0x49   :  { %436 = vmatpush.msrb.mxu2 %v348_v50  ;;  %400 = vmatmul.f32.vlgmr.msra.gmra.mxu0 %v3957_v53 }
  0x4a   :  { %417 = vmatpush.msrb.mxu1 %v4191_v51 }
  0x4b   :  { %437 = vmatpush.msrb.mxu2 %v345_v52 }
  0x4c   :  { %418 = vmatpush.msrb.mxu1 %v4195_v54 }
  0x4d   :  { %438 = vmatpush.msrb.mxu2 %v342_v55 }
  0x4e   :  { %419 = vmatpush.msrb.mxu1 %v4198_v56 }
  0x4f   :  { %439 = vmatpush.msrb.mxu2 %v339_v57  ;;  %420 = vmatmul.f32.vlgmr.msrb.gmra.mxu1 %v3957_v53 }
  0x50   :  { %440 = vmatmul.f32.vlgmr.msrb.gmra.mxu2 %v3957_v53 }
  0xb5   :  { %v223_v59 = vpop.f32.mrf.mxu3 }
  0xb6   :  { %v224_v61 = vadd.f32 %v3554_v58, %v223_v59 }
  0xb8   :  { %v226_v62 = vmax.f32 %v224_v61, 0.0 }
  0xba   :  { %228 = vst.msk [vmem:[#allocation2] sm:$0xf] %vm227_vm3, %v226_v62 }
  0xbc   :  { %v306_v1 = vpop.f32.mrf.mxu2  ;;  %v286_v2 = vpop.f32.mrf.mxu1 }
  0xbd   :  { %v307_v3 = vadd.f32 %v306_v1, %v260_v63  ;;  %v287_v4 = vadd.f32 %v286_v2, %v259_v0 }
  0xbf   :  { %v331_v6 = vrot.slane %v307_v3, 4  ;;  %v554_v3 = vld [vmem:[#allocation7 + $0x110] sm:$0xff] }
  0xc0   :  { %598 = vmatpush.msrb.mxu0 %v554_v3  ;;  %v663_v3 = vld [vmem:[#allocation12 + $0xe8] sm:$0xff] }
  0xc1   :  { %v326_v7 = vpop.f32.mrf.mxu3  ;;  %v333_v8 = vsel %vm332_vm4, %v287_v4, %v331_v6  ;;  %v551_v4 = vld [vmem:[#allocation7 + $0xf8] sm:$0xff] }
  0xc2   :  { %v327_v9 = vadd.f32 %v326_v7, %v261_v5  ;;  %335 = vst [vmem:[#allocation3] sm:$0xff] %v333_v8  ;;  %v553_v5 = vld [vmem:[#allocation7 + $0x108] sm:$0xff]  ;;  %v548_v7 = vld [vmem:[#allocation7 + $0xe0] sm:$0xff]  ;;  %v550_v8 = vld [vmem:[#allocation7 + $0xf0] sm:$0xff]  ;;  %599 = vmatpush.msrb.mxu0 %v551_v4 }
  0xc3   :  { %578 = vmatpush.msra.mxu3 %v553_v5  ;;  %v523_v4 = vld [vmem:[#allocation7 + $0x18] sm:$0xff]  ;;  %v546_v5 = vld [vmem:[#allocation7 + $0xd0] sm:$0xff] }
  0xc4   :  { %336 = vst.msk [vmem:[#allocation3 + $0x8] sm:$0xf] %vm227_vm3, %v327_v9  ;;  %v547_v9 = vld [vmem:[#allocation7 + $0xd8] sm:$0xff]  ;;  %600 = vmatpush.msrb.mxu0 %v548_v7  ;;  %v660_v7 = vld [vmem:[#allocation12 + $0xd0] sm:$0xff] }
  0xc5   :  { %579 = vmatpush.msra.mxu3 %v550_v8  ;;  %v520_v8 = vld [vmem:[#allocation7] sm:$0xff] }
  0xc6   :  { %v401_v13 = vpop.f32.mrf.mxu0  ;;  %601 = vmatpush.msrb.mxu0 %v545_v10  ;;  %v4244_v10 = vld [vmem:[#allocation12 + $0xa8] sm:$0xff] }
  0xc7   :  { %v402_v16 = vadd.f32 %v401_v13, %v4212_v12  ;;  %v544_v13 = vld [vmem:[#allocation7 + $0xc0] sm:$0xff]  ;;  %580 = vmatpush.msra.mxu3 %v547_v9  ;;  %v543_v9 = vld [vmem:[#allocation7 + $0xb8] sm:$0xff] }
  0xc9   :  { %581 = vmatpush.msra.mxu3 %v544_v13  ;;  %v668_v13 = vld [vmem:[#allocation12 + $0x110] sm:$0xff] }
  0xcb   :  { %v444_v19 = vld [vmem:[#allocation3] ss:$4 sm:$0x7] }
  0xcc   :  { %v421_v14 = vpop.f32.mrf.mxu1  ;;  %v445_v28 = vadd.f32 %v444_v19, %v402_v16 }
  0xcd   :  { %v422_v15 = vadd.f32 %v421_v14, %v4210_v11 }
  0xce   :  { %v3461_v29 = vmul.f32 -1.442695, %v445_v28 }
  0xcf   :  { %v467_v17 = vrot.slane %v422_v15, 7 }
  0xd0   :  { %3558 = vpow2.f32 %v3461_v29 }
  0xd1   :  { %v469_v20 = vsel %vm468_vm5, %v402_v16, %v467_v17  ;;  %v541_v16 = vld [vmem:[#allocation7 + $0xa8] sm:$0xff]  ;;  %v539_v17 = vld [vmem:[#allocation7 + $0x98] sm:$0xff] }
  0xd2   :  { %v471_v23 = vadd.f32 %v469_v20, %v444_v19  ;;  %582 = vmatpush.msra.mxu3 %v541_v16  ;;  %v4247_v16 = vld [vmem:[#allocation12 + $0x90] sm:$0xff] }
  0xd3   :  { %v441_v21 = vpop.f32.mrf.mxu2 }
  0xd4   :  { %v442_v24 = vadd.f32 %v441_v21, %v4216_v18  ;;  %v3462_v63 = vmul.f32 -1.442695, %v471_v23  ;;  %v536_v21 = vld [vmem:[#allocation7 + $0x80] sm:$0xff]  ;;  %v535_v23 = vld [vmem:[#allocation7 + $0x78] sm:$0xff] }
  0xd6   :  { %v492_v25 = vrot.slane %v442_v24, 7  ;;  %v3559_v30 = vpop.eup %3558  ;;  %v533_v24 = vld [vmem:[#allocation7 + $0x68] sm:$0xff] }
  0xd7   :  { %v449_v32 = vadd.f32 1.0, %v3559_v30  ;;  %v527_v30 = vld [vmem:[#allocation7 + $0x38] sm:$0xff] }
  0xd8   :  { %v493_v26 = vsel %vm468_vm5, %v422_v15, %v492_v25  ;;  %v542_v15 = vld [vmem:[#allocation7 + $0xb0] sm:$0xff] }
  0xd9   :  { %494 = vrot.lane.b32.xlu0 %v493_v26, %s3958_s13  ;;  %3560 = vrcp.f32 %v449_v32  ;;  %vm455_vm6 = vweird.f32 %v449_v32  ;;  %v461_v41 = vand.u32 2147483648, %v449_v32  ;;  %v459_v44 = vand.u32 2147483647, %v449_v32  ;;  %602 = vmatpush.msrb.mxu0 %v542_v15  ;;  %v530_v26 = vld [vmem:[#allocation7 + $0x50] sm:$0xff]  ;;  %v540_v15 = vld [vmem:[#allocation7 + $0xa0] sm:$0xff] }
  0xdb   :  { %v462_v47 = vor.u32 1.1754944e-38, %v461_v41  ;;  %vm460_vm10 = vcmp.eq.f32.partialorder %v459_v44, 8.507059e+37  ;;  %603 = vmatpush.msrb.mxu0 %v539_v17  ;;  %v665_v17 = vld [vmem:[#allocation12 + $0xf8] sm:$0xff] }
  0xdd   :  { %604 = vmatpush.msrb.mxu0 %v536_v21  ;;  %v4250_v21 = vld [vmem:[#allocation12 + $0x78] sm:$0xff] }
  0xdf   :  { %v3561_v33 = vpop.eup %3560  ;;  %605 = vmatpush.msrb.mxu0 %v533_v24  ;;  %v651_v24 = vld [vmem:[#allocation12 + $0x88] sm:$0xff] }
  0xe0   :  { %v451_v35 = vmul.f32 %v3561_v33, %v449_v32  ;;  %vm456_vm7 = vweird.f32 %v3561_v33 }
  0xe1   :  { %502 = vrot.lane.b32.xlu0 %v444_v19, %s3958_s13  ;;  %vm457_vm8 = vmor %vm455_vm6, %vm456_vm7  ;;  %v538_v19 = vld [vmem:[#allocation7 + $0x90] sm:$0xff]  ;;  %606 = vmatpush.msrb.mxu0 %v530_v26  ;;  %v4253_v26 = vld [vmem:[#allocation12 + $0x60] sm:$0xff] }
  0xe2   :  { %v452_v36 = vsub.f32 1.0, %v451_v35  ;;  %583 = vmatpush.msra.mxu3 %v538_v19  ;;  %v654_v19 = vld [vmem:[#allocation12 + $0xa0] sm:$0xff] }
  0xe3   :  { %607 = vmatpush.msrb.mxu0 %v527_v30  ;;  %v531_v30 = vld [vmem:[#allocation7 + $0x58] sm:$0xff] }
  0xe4   :  { %v453_v38 = vmul.f32 %v3561_v33, %v452_v36  ;;  %584 = vmatpush.msra.mxu3 %v535_v23  ;;  %v662_v23 = vld [vmem:[#allocation12 + $0xe0] sm:$0xff] }
  0xe6   :  { %v454_v42 = vadd.f32 %v3561_v33, %v453_v38 }
  0xe8   :  { %v458_v48 = vsel %vm457_vm8, %v3561_v33, %v454_v42  ;;  %v524_v33 = vld [vmem:[#allocation7 + $0x20] sm:$0xff] }
  0xe9   :  { %v463_v55 = vsel %vm460_vm10, %v462_v47, %v458_v48  ;;  %608 = vmatpush.msrb.mxu0 %v524_v33  ;;  %v656_v33 = vld [vmem:[#allocation12 + $0xb0] sm:$0xff] }
 0x14b   :  { %v495_v40 = vpop.permute.xlu0 %494 }
 0x14c   :  { %v496_v45 = vrot.slane %v495_v40, 1 }
 0x14e   :  { %v498_v50 = vsel %vm497_vm9, %v495_v40, %v496_v45 }
 0x14f   :  { %v500_v59 = vmul.f32 %v498_v50, %v463_v55  ;;  %v521_v55 = vld [vmem:[#allocation7 + $0x8] sm:$0xff] }
 0x150   :  { %609 = vmatpush.msrb.mxu0 %v521_v55  ;;  %v647_v55 = vld [vmem:[#allocation12 + $0x68] sm:$0xff] }
 0x153   :  { %v503_v52 = vpop.permute.xlu0 %502 }
 0x154   :  { %v504_v57 = vrot.slane %v503_v52, 1  ;;  %v505_v58 = vrot.slane %v503_v52, 2  ;;  %v532_v52 = vld [vmem:[#allocation7 + $0x60] sm:$0xff] }
 0x155   :  { %585 = vmatpush.msra.mxu3 %v532_v52  ;;  %v4266_v52 = vld [vmem:[#allocation12] sm:$0xff] }
 0x156   :  { %v506_v60 = vsel %vm497_vm9, %v504_v57, %v505_v58  ;;  %v555_v57 = vld [vmem:[#allocation7 + $0x118] sm:$0xff]  ;;  %v4233_v58 = vld [vmem:[#allocation12 + $0x108] sm:$0xff] }
 0x157   :  { %v508_v61 = vadd.f32 %v506_v60, %v500_v59  ;;  %v669_v59 = vld [vmem:[#allocation12 + $0x118] sm:$0xff]  ;;  %v529_v60 = vld [vmem:[#allocation7 + $0x48] sm:$0xff]  ;;  %618 = vmatpush.msra.mxu1 %v555_v57  ;;  %681 = vmatpush.msra.mxu2 %v4233_v58  ;;  %v636_v57 = vld [vmem:[#allocation12 + $0x10] sm:$0xff] }
 0x158   :  { %721 = vmatpush.msra.mxu0 %v669_v59  ;;  %586 = vmatpush.msra.mxu3 %v529_v60  ;;  %v644_v59 = vld [vmem:[#allocation12 + $0x50] sm:$0xff]  ;;  %v641_v60 = vld [vmem:[#allocation12 + $0x38] sm:$0xff] }
 0x159   :  { %3562 = vtanh.f32 %v508_v61  ;;  %v552_v61 = vld [vmem:[#allocation7 + $0x100] sm:$0xff] }
 0x15a   :  { %3564 = vpow2.f32 %v3462_v63  ;;  %v666_v63 = vld [vmem:[#allocation12 + $0x100] sm:$0xff]  ;;  %619 = vmatpush.msra.mxu1 %v552_v61 }
 0x15b   :  { %722 = vmatpush.msra.mxu0 %v666_v63  ;;  %v638_v61 = vld [vmem:[#allocation12 + $0x20] sm:$0xff]  ;;  %v635_v63 = vld [vmem:[#allocation12 + $0x8] sm:$0xff] }
 0x15d   :  { %723 = vmatpush.msra.mxu0 %v663_v3  ;;  %v956_v3 = vld [vmem:[#allocation13 + $0x108] sm:$0xff] }
 0x15f   :  { %v3563_v62 = vpop.eup %3562  ;;  %724 = vmatpush.msra.mxu0 %v660_v7  ;;  %v950_v7 = vld [vmem:[#allocation13 + $0xd8] sm:$0xff] }
 0x160   :  { %512 = vrot.lane.b32.xlu1 %v3563_v62, %s3959_s17  ;;  %v3565_v0 = vpop.eup %3564  ;;  %v4236_v62 = vld [vmem:[#allocation12 + $0xf0] sm:$0xff] }
 0x161   :  { %v475_v1 = vadd.f32 1.0, %v3565_v0  ;;  %v526_v0 = vld [vmem:[#allocation7 + $0x30] sm:$0xff]  ;;  %682 = vmatpush.msra.mxu2 %v4236_v62 }
 0x162   :  { %587 = vmatpush.msra.mxu3 %v526_v0 }
 0x163   :  { %3566 = vrcp.f32 %v475_v1  ;;  %vm481_vm11 = vweird.f32 %v475_v1  ;;  %v487_v28 = vand.u32 2147483648, %v475_v1  ;;  %v485_v29 = vand.u32 2147483647, %v475_v1 }
 0x164   :  { %588 = vmatpush.msra.mxu3 %v523_v4 }
 0x165   :  { %v488_v35 = vor.u32 1.1754944e-38, %v487_v28  ;;  %vm486_vm14 = vcmp.eq.f32.partialorder %v485_v29, 8.507059e+37  ;;  %v659_v28 = vld [vmem:[#allocation12 + $0xc8] sm:$0xff]  ;;  %v648_v29 = vld [vmem:[#allocation12 + $0x70] sm:$0xff] }
 0x166   :  { %589 = vmatpush.msra.mxu3 %v520_v8  ;;  %v947_v8 = vld [vmem:[#allocation13 + $0xc0] sm:$0xff] }
 0x168   :  { %701 = vmatpush.msrb.mxu3 %v668_v13  ;;  %v941_v13 = vld [vmem:[#allocation13 + $0x90] sm:$0xff] }
 0x169   :  { %v3567_v2 = vpop.eup %3566 }
 0x16a   :  { %v477_v6 = vmul.f32 %v3567_v2, %v475_v1  ;;  %vm482_vm12 = vweird.f32 %v3567_v2  ;;  %v549_v1 = vld [vmem:[#allocation7 + $0xe8] sm:$0xff]  ;;  %702 = vmatpush.msrb.mxu3 %v665_v17 }
 0x16b   :  { %vm483_vm13 = vmor %vm481_vm11, %vm482_vm12  ;;  %620 = vmatpush.msra.mxu1 %v549_v1  ;;  %v932_v17 = vld [vmem:[#allocation13 + $0x48] sm:$0xff] }
 0x16c   :  { %v478_v14 = vsub.f32 1.0, %v477_v6  ;;  %v4241_v6 = vld [vmem:[#allocation12 + $0xc0] sm:$0xff]  ;;  %703 = vmatpush.msrb.mxu3 %v662_v23 }
 0x16d   :  { %621 = vmatpush.msra.mxu1 %v546_v5  ;;  %v953_v5 = vld [vmem:[#allocation13 + $0xf0] sm:$0xff]  ;;  %v923_v23 = vld [vmem:[#allocation13] sm:$0xff] }
 0x16e   :  { %v479_v20 = vmul.f32 %v3567_v2, %v478_v14  ;;  %v657_v14 = vld [vmem:[#allocation12 + $0xb8] sm:$0xff]  ;;  %704 = vmatpush.msrb.mxu3 %v659_v28 }
 0x16f   :  { %622 = vmatpush.msra.mxu1 %v543_v9  ;;  %725 = vmatpush.msra.mxu0 %v657_v14  ;;  %v944_v9 = vld [vmem:[#allocation13 + $0xa8] sm:$0xff]  ;;  %v938_v14 = vld [vmem:[#allocation13 + $0x78] sm:$0xff] }
 0x170   :  { %v480_v25 = vadd.f32 %v3567_v2, %v479_v20  ;;  %v537_v20 = vld [vmem:[#allocation7 + $0x88] sm:$0xff]  ;;  %705 = vmatpush.msrb.mxu3 %v656_v33 }
 0x171   :  { %623 = vmatpush.msra.mxu1 %v540_v15  ;;  %726 = vmatpush.msra.mxu0 %v654_v19  ;;  %v935_v15 = vld [vmem:[#allocation13 + $0x60] sm:$0xff]  ;;  %v929_v19 = vld [vmem:[#allocation13 + $0x30] sm:$0xff] }
 0x172   :  { %v484_v32 = vsel %vm483_vm13, %v3567_v2, %v480_v25  ;;  %v4238_v2 = vld [vmem:[#allocation12 + $0xd8] sm:$0xff]  ;;  %v534_v25 = vld [vmem:[#allocation7 + $0x70] sm:$0xff] }
 0x173   :  { %v489_v36 = vsel %vm486_vm14, %v488_v35, %v484_v32  ;;  %683 = vmatpush.msra.mxu2 %v4238_v2  ;;  %624 = vmatpush.msra.mxu1 %v537_v20  ;;  %v4256_v32 = vld [vmem:[#allocation12 + $0x48] sm:$0xff]  ;;  %v645_v35 = vld [vmem:[#allocation12 + $0x58] sm:$0xff] }
 0x174   :  { %v510_v41 = vsub.f32 1.0, %v489_v36  ;;  %v518_v44 = vmul.f32 0.0, %v489_v36  ;;  %727 = vmatpush.msra.mxu0 %v651_v24  ;;  %v528_v36 = vld [vmem:[#allocation7 + $0x40] sm:$0xff]  ;;  %v926_v20 = vld [vmem:[#allocation13 + $0x18] sm:$0xff] }
 0x175   :  { %684 = vmatpush.msra.mxu2 %v4241_v6  ;;  %625 = vmatpush.msra.mxu1 %v534_v25 }
 0x176   :  { %728 = vmatpush.msra.mxu0 %v648_v29 }
 0x177   :  { %685 = vmatpush.msra.mxu2 %v4244_v10  ;;  %626 = vmatpush.msra.mxu1 %v531_v30 }
 0x178   :  { %729 = vmatpush.msra.mxu0 %v645_v35 }
 0x179   :  { %686 = vmatpush.msra.mxu2 %v4247_v16  ;;  %627 = vmatpush.msra.mxu1 %v528_v36 }
 0x17b   :  { %687 = vmatpush.msra.mxu2 %v4250_v21 }
 0x17d   :  { %688 = vmatpush.msra.mxu2 %v4253_v26 }
 0x17f   :  { %689 = vmatpush.msra.mxu2 %v4256_v32 }
 0x1d2   :  { %v513_v38 = vpop.permute.xlu1 %512 }
 0x1d3   :  { %v514_v40 = vrot.slane %v513_v38, 7 }
 0x1d5   :  { %v515_v42 = vsel %vm380_vm15, %v514_v40, %v513_v38  ;;  %v4259_v38 = vld [vmem:[#allocation12 + $0x30] sm:$0xff]  ;;  %v653_v40 = vld [vmem:[#allocation12 + $0x98] sm:$0xff] }
 0x1d6   :  { %v517_v45 = vmul.f32 %v515_v42, %v510_v41  ;;  %v642_v41 = vld [vmem:[#allocation12 + $0x40] sm:$0xff]  ;;  %v525_v42 = vld [vmem:[#allocation7 + $0x28] sm:$0xff]  ;;  %690 = vmatpush.msra.mxu2 %v4259_v38  ;;  %706 = vmatpush.msrb.mxu3 %v653_v40 }
 0x1d7   :  { %730 = vmatpush.msra.mxu0 %v642_v41  ;;  %628 = vmatpush.msra.mxu1 %v525_v42 }
 0x1d8   :  { %v4227_v47 = vadd.f32 %v518_v44, %v517_v45  ;;  %v4262_v44 = vld [vmem:[#allocation12 + $0x18] sm:$0xff]  ;;  %v650_v45 = vld [vmem:[#allocation12 + $0x80] sm:$0xff] }
 0x1d9   :  { %691 = vmatpush.msra.mxu2 %v4262_v44  ;;  %707 = vmatpush.msrb.mxu3 %v650_v45 }
 0x1da   :  { %v558_v48 = vperm.slane %v4227_v47, 1  ;;  %v557_v50 = vperm.slane %v4227_v47, 0 }
 0x1db   :  { %692 = vmatpush.msra.mxu2 %v4266_v52  ;;  %708 = vmatpush.msrb.mxu3 %v647_v55 }
 0x1dc   :  { %561 = vrot.lane.b32.xlu2 %v558_v48, %s3960_s21  ;;  %559 = vrot.lane.b32.xlu1 %v557_v50, %s3960_s21  ;;  %v639_v48 = vld [vmem:[#allocation12 + $0x28] sm:$0xff]  ;;  %v522_v50 = vld [vmem:[#allocation7 + $0x10] sm:$0xff] }
 0x1dd   :  { %731 = vmatpush.msra.mxu0 %v639_v48  ;;  %629 = vmatpush.msra.mxu1 %v522_v50 }
 0x1de   :  { %693 = vmatmul.f32.vlgmr.msra.gmra.mxu2 %v3957_v53  ;;  %709 = vmatpush.msrb.mxu3 %v644_v59 }
 0x1df   :  { %732 = vmatpush.msra.mxu0 %v636_v57 }
 0x1e0   :  { %710 = vmatpush.msrb.mxu3 %v641_v60 }
 0x1e2   :  { %711 = vmatpush.msrb.mxu3 %v638_v61 }
 0x1e4   :  { %712 = vmatpush.msrb.mxu3 %v635_v63 }
 0x236   :  { %v562_v0 = vpop.permute.xlu2 %561 }
 0x24e   :  { %v560_v1 = vpop.permute.xlu1 %559 }
 0x24f   :  { %v4271_v4 = vsel %vm563_vm0, %v560_v1, %v562_v0 }
 0x250   :  { %3463 = vmatmul.msk.f32.vlgmr.msra.gmra.mxu3 %vm380_vm15, %v4271_v4  ;;  %3464 = vmatmul.msk.f32.vlgmr.msrb.gmra.mxu0 %vm380_vm15, %v4271_v4 }
 0x251   :  { %3465 = vmatmul.msk.f32.vlgmr.msra.gmra.mxu1 %vm380_vm15, %v4271_v4  ;;  %970 = vmatpush.msrb.mxu0 %v956_v3 }
 0x253   :  { %971 = vmatpush.msrb.mxu0 %v953_v5 }
 0x255   :  { %972 = vmatpush.msrb.mxu0 %v950_v7 }
 0x257   :  { %973 = vmatpush.msrb.mxu0 %v947_v8 }
 0x258   :  { %713 = vmatmul.f32.vlgmr.msrb.gmra.mxu3 %v3957_v53  ;;  %733 = vmatmul.f32.vlgmr.msra.gmra.mxu0 %v3957_v53 }
 0x259   :  { %974 = vmatpush.msrb.mxu0 %v944_v9 }
 0x25b   :  { %975 = vmatpush.msrb.mxu0 %v941_v13 }
 0x25d   :  { %976 = vmatpush.msrb.mxu0 %v938_v14 }
 0x25f   :  { %977 = vmatpush.msrb.mxu0 %v935_v15 }
 0x261   :  { %978 = vmatpush.msrb.mxu0 %v932_v17  ;;  %v694_v24 = vpop.f32.mrf.mxu2 }
 0x263   :  { %979 = vmatpush.msrb.mxu0 %v929_v19 }
 0x265   :  { %980 = vmatpush.msrb.mxu0 %v926_v20 }
 0x267   :  { %981 = vmatpush.msrb.mxu0 %v923_v23 }
 0x268   :  { %982 = vmatmul.f32.vlgmr.msrb.gmra.mxu0 %v3957_v53 }
 0x269   :  { %1170 = vmatpush.msra.mxu0 %v4153_v22 }
 0x26b   :  { %1171 = vmatpush.msra.mxu0 %v4162_v27  ;;  %v3456_v27 = vld [vmem:[%s4967_s11 + $0x1] ss:$4 sm:$0x7] }
 0x26d   :  { %1172 = vmatpush.msra.mxu0 %v4168_v31  ;;  %v4299_v31 = vperm.slane %v3456_v27, 2 }
 0x26f   :  { %1173 = vmatpush.msra.mxu0 %v4171_v34 }
 0x271   :  { %1174 = vmatpush.msra.mxu0 %v4175_v37 }
 0x273   :  { %1175 = vmatpush.msra.mxu0 %v4177_v39 }
 0x275   :  { %1176 = vmatpush.msra.mxu0 %v4182_v43  ;;  %v4303_v43 = vperm.slane %v3456_v27, 1 }
 0x277   :  { %1177 = vmatpush.msra.mxu0 %v4185_v46 }
 0x279   :  { %1178 = vmatpush.msra.mxu0 %v4188_v49 }
 0x27b   :  { %1179 = vmatpush.msra.mxu0 %v4191_v51  ;;  %v3454_v51 = vld [vmem:[%s4966_s10 + $0x1] ss:$4 sm:$0x7] }
 0x27c   :  { %v4318_v1 = vperm.slane %v3454_v51, 1  ;;  %v4320_v3 = vperm.slane %v3454_v51, 2 }
 0x27d   :  { %1180 = vmatpush.msra.mxu0 %v4195_v54  ;;  %v4310_v54 = vperm.slane %v3454_v51, 0  ;;  %v846_v51 = vld [vmem:[#allocation9 + $0x118] sm:$0xff] }
 0x27e   :  { %907 = vmatpush.msra.mxu3 %v846_v51  ;;  %v1116_v51 = vld [vmem:[#allocation10 + $0x30] sm:$0xff] }
 0x27f   :  { %1181 = vmatpush.msra.mxu0 %v4198_v56  ;;  %v4312_v56 = vperm.slane %v3456_v27, 0 }
 0x280   :  { %3474 = vmatmul.msk.f32.vlgmr.msra.gmra.mxu0 %vm380_vm15, %v4271_v4 }
 0x281   :  { %v695_v28 = vadd.f32 %v694_v24, %v4312_v56 }
 0x2cd   :  { %v611_v22 = vpop.f32.mrf.mxu0 }
 0x2ce   :  { %v631_v5 = vpop.f32.mrf.mxu1  ;;  %v612_v7 = vadd.f32 %v611_v22, %v4318_v1 }
 0x2cf   :  { %v632_v8 = vadd.f32 %v631_v5, %v4320_v3  ;;  %v833_v5 = vld [vmem:[#allocation9 + $0xb0] sm:$0xff] }
 0x2d3   :  { %v591_v34 = vpop.f32.mrf.mxu3 }
 0x2d4   :  { %v592_v25 = vadd.f32 %v591_v34, %v4310_v54  ;;  %v844_v34 = vld [vmem:[#allocation9 + $0x108] sm:$0xff] }
 0x2d5   :  { %v734_v37 = vpop.f32.mrf.mxu0  ;;  %867 = vmatpush.msrb.mxu1 %v844_v34  ;;  %v814_v34 = vld [vmem:[#allocation9 + $0x18] sm:$0xff] }
 0x2d6   :  { %v735_v39 = vadd.f32 %v734_v37, %v4299_v31  ;;  %v737_v29 = vadd.f32 %v695_v28, %v592_v25  ;;  %v841_v37 = vld [vmem:[#allocation9 + $0xf0] sm:$0xff]  ;;  %v843_v28 = vld [vmem:[#allocation9 + $0x100] sm:$0xff] }
 0x2d7   :  { %868 = vmatpush.msrb.mxu1 %v841_v37  ;;  %908 = vmatpush.msra.mxu3 %v843_v28  ;;  %v824_v37 = vld [vmem:[#allocation9 + $0x68] sm:$0xff]  ;;  %v821_v28 = vld [vmem:[#allocation9 + $0x50] sm:$0xff] }
 0x2d8   :  { %781 = vrot.lane.b32.xlu0 %v735_v39, %s3958_s13  ;;  %v3466_v30 = vmul.f32 -1.442695, %v737_v29  ;;  %v840_v29 = vld [vmem:[#allocation9 + $0xe8] sm:$0xff] }
 0x2d9   :  { %909 = vmatpush.msra.mxu3 %v840_v29 }
 0x2da   :  { %3568 = vpow2.f32 %v3466_v30 }
 0x2db   :  { %v714_v46 = vpop.f32.mrf.mxu3 }
 0x2dc   :  { %v715_v49 = vadd.f32 %v714_v46, %v4303_v43 }
 0x2de   :  { %779 = vrot.lane.b32.xlu2 %v715_v49, %s3958_s13  ;;  %v757_v19 = vadd.f32 %v715_v49, %v612_v7  ;;  %v838_v49 = vld [vmem:[#allocation9 + $0xd8] sm:$0xff] }
 0x2df   :  { %869 = vmatpush.msrb.mxu1 %v838_v49  ;;  %v811_v49 = vld [vmem:[#allocation9] sm:$0xff] }
 0x2e0   :  { %v3569_v33 = vpop.eup %3568  ;;  %v3467_v20 = vmul.f32 -1.442695, %v757_v19  ;;  %v827_v19 = vld [vmem:[#allocation9 + $0x80] sm:$0xff] }
 0x2e1   :  { %v741_v35 = vadd.f32 1.0, %v3569_v33 }
 0x2e3   :  { %3570 = vrcp.f32 %v741_v35  ;;  %v753_v48 = vand.u32 2147483648, %v741_v35  ;;  %vm747_vm2 = vweird.f32 %v741_v35  ;;  %v751_v50 = vand.u32 2147483647, %v741_v35 }
 0x2e5   :  { %v754_v59 = vor.u32 1.1754944e-38, %v753_v48  ;;  %vm752_vm4 = vcmp.eq.f32.partialorder %v751_v50, 8.507059e+37  ;;  %v829_v50 = vld [vmem:[#allocation9 + $0x90] sm:$0xff] }
 0x2e9   :  { %v3571_v36 = vpop.eup %3570 }
 0x2ea   :  { %v743_v40 = vmul.f32 %v3571_v36, %v741_v35  ;;  %vm748_vm1 = vweird.f32 %v3571_v36  ;;  %v835_v35 = vld [vmem:[#allocation9 + $0xc0] sm:$0xff] }
 0x2eb   :  { %vm749_vm3 = vmor %vm747_vm2, %vm748_vm1  ;;  %870 = vmatpush.msrb.mxu1 %v835_v35  ;;  %v1143_v35 = vld [vmem:[#allocation10 + $0x108] sm:$0xff] }
 0x2ec   :  { %v744_v41 = vsub.f32 1.0, %v743_v40  ;;  %v832_v40 = vld [vmem:[#allocation9 + $0xa8] sm:$0xff] }
 0x2ed   :  { %871 = vmatpush.msrb.mxu1 %v832_v40 }
 0x2ee   :  { %v745_v42 = vmul.f32 %v3571_v36, %v744_v41  ;;  %v845_v41 = vld [vmem:[#allocation9 + $0x110] sm:$0xff] }
 0x2ef   :  { %887 = vmatpush.msrb.mxu2 %v845_v41  ;;  %872 = vmatpush.msrb.mxu1 %v829_v50  ;;  %v954_v41 = vld [vmem:[#allocation13 + $0xf8] sm:$0xff] }
 0x2f0   :  { %v746_v45 = vadd.f32 %v3571_v36, %v745_v42  ;;  %v834_v42 = vld [vmem:[#allocation9 + $0xb8] sm:$0xff] }
 0x2f2   :  { %v750_v57 = vsel %vm749_vm3, %v3571_v36, %v746_v45  ;;  %v837_v36 = vld [vmem:[#allocation9 + $0xd0] sm:$0xff]  ;;  %v842_v45 = vld [vmem:[#allocation9 + $0xf8] sm:$0xff] }
 0x2f3   :  { %v755_v61 = vsel %vm752_vm4, %v754_v59, %v750_v57  ;;  %910 = vmatpush.msra.mxu3 %v837_v36  ;;  %v831_v57 = vld [vmem:[#allocation9 + $0xa0] sm:$0xff]  ;;  %888 = vmatpush.msrb.mxu2 %v842_v45  ;;  %v826_v59 = vld [vmem:[#allocation9 + $0x78] sm:$0xff] }
 0x2f4   :  { %v794_v22 = vsub.f32 1.0, %v755_v61  ;;  %v807_v24 = vmul.f32 0.0, %v755_v61  ;;  %873 = vmatpush.msrb.mxu1 %v826_v59  ;;  %v818_v36 = vld [vmem:[#allocation9 + $0x38] sm:$0xff]  ;;  %v951_v45 = vld [vmem:[#allocation13 + $0xe0] sm:$0xff]  ;;  %v948_v59 = vld [vmem:[#allocation13 + $0xc8] sm:$0xff] }
 0x2f5   :  { %911 = vmatpush.msra.mxu3 %v834_v42  ;;  %v1140_v42 = vld [vmem:[#allocation10 + $0xf0] sm:$0xff] }
 0x2f7   :  { %912 = vmatpush.msra.mxu3 %v831_v57 }
 0x338   :  { %v780_v55 = vpop.permute.xlu2 %779 }
 0x34a   :  { %v782_v60 = vpop.permute.xlu0 %781 }
 0x34b   :  { %v783_v63 = vsel %vm497_vm9, %v780_v55, %v782_v60  ;;  %v839_v55 = vld [vmem:[#allocation9 + $0xe0] sm:$0xff]  ;;  %v836_v60 = vld [vmem:[#allocation9 + $0xc8] sm:$0xff] }
 0x34c   :  { %v785_v0 = vmul.f32 %v783_v63, %v755_v61  ;;  %v828_v61 = vld [vmem:[#allocation9 + $0x88] sm:$0xff]  ;;  %889 = vmatpush.msrb.mxu2 %v839_v55  ;;  %v1137_v55 = vld [vmem:[#allocation10 + $0xd8] sm:$0xff] }
 0x34d   :  { %913 = vmatpush.msra.mxu3 %v828_v61 }
 0x34e   :  { %787 = vrot.lane.b32.xlu1 %v785_v0, %s3958_s13  ;;  %v823_v0 = vld [vmem:[#allocation9 + $0x60] sm:$0xff]  ;;  %890 = vmatpush.msrb.mxu2 %v836_v60 }
 0x34f   :  { %874 = vmatpush.msrb.mxu1 %v823_v0  ;;  %v945_v0 = vld [vmem:[#allocation13 + $0xb0] sm:$0xff] }
 0x350   :  { %891 = vmatpush.msrb.mxu2 %v833_v5 }
 0x3c0   :  { %v788_v9 = vpop.permute.xlu1 %787 }
 0x3c1   :  { %v790_v13 = vadd.f32 %v788_v9, %v612_v7  ;;  %v791_v14 = vadd.f32 %v788_v9, %v632_v8  ;;  %v4341_v7 = vld [vmem:[#allocation3 + $0x1] ss:$4 sm:$0x7]  ;;  %v820_v9 = vld [vmem:[#allocation9 + $0x48] sm:$0xff] }
 0x3c2   :  { %v825_v8 = vld [vmem:[#allocation9 + $0x70] sm:$0xff]  ;;  %875 = vmatpush.msrb.mxu1 %v820_v9  ;;  %v942_v9 = vld [vmem:[#allocation13 + $0x98] sm:$0xff] }
 0x3c3   :  { %3572 = vtanh.f32 %v790_v13  ;;  %v830_v13 = vld [vmem:[#allocation9 + $0x98] sm:$0xff]  ;;  %914 = vmatpush.msra.mxu3 %v825_v8  ;;  %v1131_v8 = vld [vmem:[#allocation10 + $0xa8] sm:$0xff] }
 0x3c4   :  { %3574 = vtanh.f32 %v791_v14  ;;  %v822_v14 = vld [vmem:[#allocation9 + $0x58] sm:$0xff]  ;;  %892 = vmatpush.msrb.mxu2 %v830_v13  ;;  %v939_v13 = vld [vmem:[#allocation13 + $0x80] sm:$0xff] }
 0x3c5   :  { %3576 = vpow2.f32 %v3467_v20  ;;  %915 = vmatpush.msra.mxu3 %v822_v14  ;;  %v1125_v14 = vld [vmem:[#allocation10 + $0x78] sm:$0xff] }
 0x3c6   :  { %893 = vmatpush.msrb.mxu2 %v827_v19  ;;  %v930_v19 = vld [vmem:[#allocation13 + $0x38] sm:$0xff] }
 0x3c8   :  { %894 = vmatpush.msrb.mxu2 %v824_v37  ;;  %v1119_v37 = vld [vmem:[#allocation10 + $0x48] sm:$0xff] }
 0x3c9   :  { %v3573_v15 = vpop.eup %3572 }
 0x3ca   :  { %v3575_v17 = vpop.eup %3574  ;;  %798 = vrot.lane.b32.xlu2 %v3573_v15, %s3960_s21  ;;  %895 = vmatpush.msrb.mxu2 %v821_v28 }
 0x3cb   :  { %800 = vrot.lane.b32.xlu0 %v3575_v17, %s3960_s21  ;;  %v3577_v23 = vpop.eup %3576  ;;  %v817_v17 = vld [vmem:[#allocation9 + $0x30] sm:$0xff] }
 0x3cc   :  { %v4326_v27 = vadd.f32 1.0, %v3577_v23  ;;  %v819_v23 = vld [vmem:[#allocation9 + $0x40] sm:$0xff]  ;;  %876 = vmatpush.msrb.mxu1 %v817_v17  ;;  %896 = vmatpush.msrb.mxu2 %v818_v36  ;;  %v933_v17 = vld [vmem:[#allocation13 + $0x50] sm:$0xff] }
 0x3cd   :  { %916 = vmatpush.msra.mxu3 %v819_v23  ;;  %v812_v23 = vld [vmem:[#allocation9 + $0x8] sm:$0xff]  ;;  %v1136_v36 = vld [vmem:[#allocation10 + $0xd0] sm:$0xff] }
 0x3ce   :  { %3578 = vrcp.f32 %v4326_v27  ;;  %v773_v20 = vand.u32 2147483648, %v4326_v27  ;;  %vm767_vm7 = vweird.f32 %v4326_v27  ;;  %877 = vmatpush.msrb.mxu1 %v814_v34  ;;  %v1122_v34 = vld [vmem:[#allocation10 + $0x60] sm:$0xff] }
 0x3d0   :  { %v774_v29 = vor.u32 1.1754944e-38, %v773_v20  ;;  %878 = vmatpush.msrb.mxu1 %v811_v49  ;;  %v927_v20 = vld [vmem:[#allocation13 + $0x20] sm:$0xff] }
 0x3d4   :  { %v4329_v39 = vpop.eup %3578 }
 0x3d5   :  { %v763_v33 = vmul.f32 %v4329_v39, %v4326_v27  ;;  %vm768_vm6 = vweird.f32 %v4329_v39 }
 0x3d6   :  { %vm4350_vm8 = vmor %vm767_vm7, %vm768_vm6 }
 0x3d7   :  { %v764_v48 = vsub.f32 1.0, %v763_v33  ;;  %v813_v33 = vld [vmem:[#allocation9 + $0x10] sm:$0xff] }
 0x3d9   :  { %v765_v63 = vmul.f32 %v4329_v39, %v764_v48 }
 0x3db   :  { %v766_v15 = vadd.f32 %v4329_v39, %v765_v63  ;;  %v1134_v63 = vld [vmem:[#allocation10 + $0xc0] sm:$0xff] }
 0x424   :  { %v4331_v46 = vpop.permute.xlu2 %798 }
 0x425   :  { %v805_v25 = vmul.f32 %v4331_v46, %v794_v22  ;;  %v771_v22 = vand.u32 2147483647, %v4326_v27  ;;  %v957_v27 = vld [vmem:[#allocation13 + $0x110] sm:$0xff] }
 0x426   :  { %990 = vmatpush.msra.mxu1 %v957_v27 }
 0x427   :  { %v4334_v30 = vadd.f32 %v807_v24, %v805_v25  ;;  %v816_v24 = vld [vmem:[#allocation9 + $0x28] sm:$0xff]  ;;  %v770_v25 = vsel %vm4350_vm8, %v4329_v39, %v766_v15  ;;  %vm772_vm10 = vcmp.eq.f32.partialorder %v771_v22, 8.507059e+37  ;;  %v815_v39 = vld [vmem:[#allocation9 + $0x20] sm:$0xff] }
 0x428   :  { %917 = vmatpush.msra.mxu3 %v816_v24  ;;  %v775_v40 = vsel %vm772_vm10, %v774_v29, %v770_v25  ;;  %991 = vmatpush.msra.mxu1 %v954_v41  ;;  %v936_v15 = vld [vmem:[#allocation13 + $0x68] sm:$0xff]  ;;  %v1113_v24 = vld [vmem:[#allocation10 + $0x18] sm:$0xff]  ;;  %v1110_v25 = vld [vmem:[#allocation10] sm:$0xff] }
 0x429   :  { %849 = vrot.lane.b32.xlu1 %v4334_v30, %s3960_s21  ;;  %v795_v48 = vsub.f32 1.0, %v775_v40  ;;  %897 = vmatpush.msrb.mxu2 %v815_v39  ;;  %v808_v61 = vmul.f32 0.0, %v775_v40  ;;  %v924_v22 = vld [vmem:[#allocation13 + $0x8] sm:$0xff]  ;;  %v1145_v29 = vld [vmem:[#allocation10 + $0x118] sm:$0xff]  ;;  %v1130_v41 = vld [vmem:[#allocation10 + $0xa0] sm:$0xff] }
 0x42a   :  { %918 = vmatpush.msra.mxu3 %v813_v33  ;;  %992 = vmatpush.msra.mxu1 %v951_v45  ;;  %v1142_v33 = vld [vmem:[#allocation10 + $0x100] sm:$0xff]  ;;  %v1133_v40 = vld [vmem:[#allocation10 + $0xb8] sm:$0xff]  ;;  %v1124_v39 = vld [vmem:[#allocation10 + $0x70] sm:$0xff] }
 0x42b   :  { %898 = vmatpush.msrb.mxu2 %v812_v23  ;;  %v1121_v45 = vld [vmem:[#allocation10 + $0x58] sm:$0xff] }
 0x42c   :  { %1150 = vmatpush.msrb.mxu3 %v1143_v35  ;;  %993 = vmatpush.msra.mxu1 %v948_v59  ;;  %v1139_v35 = vld [vmem:[#allocation10 + $0xe8] sm:$0xff] }
 0x42e   :  { %1151 = vmatpush.msrb.mxu3 %v1140_v42  ;;  %994 = vmatpush.msra.mxu1 %v945_v0  ;;  %v1127_v42 = vld [vmem:[#allocation10 + $0x88] sm:$0xff] }
 0x430   :  { %1152 = vmatpush.msrb.mxu3 %v1137_v55  ;;  %995 = vmatpush.msra.mxu1 %v942_v9  ;;  %v1112_v55 = vld [vmem:[#allocation10 + $0x10] sm:$0xff] }
 0x431   :  { %1263 = vrot.lane.b32.xlu1 %v4341_v7, %s3958_s13 }
 0x432   :  { %1153 = vmatpush.msrb.mxu3 %v1134_v63  ;;  %996 = vmatpush.msra.mxu1 %v939_v13 }
 0x434   :  { %1154 = vmatpush.msrb.mxu3 %v1131_v8  ;;  %997 = vmatpush.msra.mxu1 %v936_v15 }
 0x436   :  { %998 = vmatpush.msra.mxu1 %v933_v17 }
 0x438   :  { %999 = vmatpush.msra.mxu1 %v930_v19 }
 0x43a   :  { %1000 = vmatpush.msra.mxu1 %v927_v20 }
 0x43c   :  { %1001 = vmatpush.msra.mxu1 %v924_v22 }
 0x43d   :  { %v801_v50 = vpop.permute.xlu0 %800 }
 0x43e   :  { %v802_v57 = vsel %vm563_vm0, %v4331_v46, %v801_v50  ;;  %v1128_v46 = vld [vmem:[#allocation10 + $0x90] sm:$0xff]  ;;  %v1115_v50 = vld [vmem:[#allocation10 + $0x28] sm:$0xff] }
 0x43f   :  { %v806_v60 = vmul.f32 %v802_v57, %v795_v48  ;;  %1155 = vmatpush.msrb.mxu3 %v1128_v46  ;;  %v1118_v48 = vld [vmem:[#allocation10 + $0x40] sm:$0xff] }
 0x441   :  { %v4359_v5 = vadd.f32 %v808_v61, %v806_v60  ;;  %1156 = vmatpush.msrb.mxu3 %v1125_v14 }
 0x443   :  { %851 = vrot.lane.b32.xlu2 %v4359_v5, %s3960_s21  ;;  %1157 = vmatpush.msrb.mxu3 %v1122_v34 }
 0x445   :  { %1158 = vmatpush.msrb.mxu3 %v1119_v37 }
 0x447   :  { %1159 = vmatpush.msrb.mxu3 %v1116_v51 }
 0x449   :  { %1160 = vmatpush.msrb.mxu3 %v1113_v24 }
 0x44b   :  { %1161 = vmatpush.msrb.mxu3 %v1110_v25 }
 0x49b   :  { %v850_v49 = vpop.permute.xlu1 %849 }
 0x49d   :  { %v852_v28 = vpop.permute.xlu2 %851 }
 0x49e   :  { %v4364_v27 = vsel %vm563_vm0, %v850_v49, %v852_v28 }
 0x49f   :  { %3468 = vmatmul.msk.f32.vlgmr.msrb.gmra.mxu1 %vm380_vm15, %v4364_v27  ;;  %3469 = vmatmul.msk.f32.vlgmr.msrb.gmra.mxu2 %vm380_vm15, %v4364_v27 }
 0x4a0   :  { %3470 = vmatmul.msk.f32.vlgmr.msra.gmra.mxu3 %vm380_vm15, %v4364_v27  ;;  %1190 = vmatpush.msrb.mxu1 %v1145_v29 }
 0x4a2   :  { %1191 = vmatpush.msrb.mxu1 %v1142_v33 }
 0x4a3   :  { %v1264_v22 = vpop.permute.xlu1 %1263 }
 0x4a4   :  { %1192 = vmatpush.msrb.mxu1 %v1139_v35  ;;  %v1265_v24 = vrot.slane %v1264_v22, 1  ;;  %v1266_v25 = vrot.slane %v1264_v22, 2 }
 0x4a6   :  { %1193 = vmatpush.msrb.mxu1 %v1136_v36  ;;  %v1267_v36 = vsel %vm497_vm9, %v1265_v24, %v1266_v25  ;;  %v1307_v25 = vld [vmem:[#allocation7 + $0xd0] sm:$0xff] }
 0x4a7   :  { %1002 = vmatmul.f32.vlgmr.msra.gmra.mxu1 %v3957_v53 }
 0x4a8   :  { %3473 = vmatmul.msk.f32.vlgmr.msrb.gmra.mxu3 %vm380_vm15, %v4271_v4  ;;  %1194 = vmatpush.msrb.mxu1 %v1133_v40 }
 0x4aa   :  { %1195 = vmatpush.msrb.mxu1 %v1130_v41 }
 0x4ac   :  { %1196 = vmatpush.msrb.mxu1 %v1127_v42 }
 0x4ae   :  { %1197 = vmatpush.msrb.mxu1 %v1124_v39 }
 0x4b0   :  { %1198 = vmatpush.msrb.mxu1 %v1121_v45 }
 0x4b2   :  { %1199 = vmatpush.msrb.mxu1 %v1118_v48 }
 0x4b4   :  { %1200 = vmatpush.msrb.mxu1 %v1115_v50 }
 0x4b6   :  { %1201 = vmatpush.msrb.mxu1 %v1112_v55 }
 0x4b7   :  { %3475 = vmatmul.msk.f32.vlgmr.msrb.gmra.mxu1 %vm380_vm15, %v4271_v4 }
 0x4b8   :  { %1427 = vmatpush.msra.mxu1 %v4233_v58  ;;  %v4394_v58 = vld [vmem:[%s4967_s11 + $0x2] ss:$4 sm:$0x7] }
 0x4ba   :  { %1428 = vmatpush.msra.mxu1 %v4236_v62  ;;  %v4399_v62 = vld [vmem:[%s4966_s10 + $0x2] ss:$4 sm:$0x7] }
 0x4bc   :  { %1429 = vmatpush.msra.mxu1 %v4238_v2  ;;  %v4402_v2 = vperm.slane %v4394_v58, 0 }
 0x4be   :  { %1430 = vmatpush.msra.mxu1 %v4241_v6  ;;  %v4405_v6 = vperm.slane %v4399_v62, 0 }
 0x4c0   :  { %1431 = vmatpush.msra.mxu1 %v4244_v10  ;;  %v983_v10 = vpop.f32.mrf.mxu0 }
 0x4c2   :  { %1432 = vmatpush.msra.mxu1 %v4247_v16  ;;  %v984_v16 = vadd.f32 %v983_v10, %v4402_v2 }
 0x4c4   :  { %1433 = vmatpush.msra.mxu1 %v4250_v21 }
 0x4c6   :  { %1434 = vmatpush.msra.mxu1 %v4253_v26 }
 0x4c8   :  { %1435 = vmatpush.msra.mxu1 %v4256_v32 }
 0x4ca   :  { %1436 = vmatpush.msra.mxu1 %v4259_v38 }
 0x4cc   :  { %1437 = vmatpush.msra.mxu1 %v4262_v44  ;;  %v1183_v44 = vpop.f32.mrf.mxu0 }
 0x4cd   :  { %v1184_v57 = vadd.f32 %v1183_v44, %v4210_v11  ;;  %v4428_v44 = vld [vmem:[#allocation13 + $0x100] sm:$0xff] }
 0x4ce   :  { %1438 = vmatpush.msra.mxu1 %v4266_v52 }
 0x4cf   :  { %3481 = vmatmul.msk.f32.vlgmr.msra.gmra.mxu1 %vm380_vm15, %v4364_v27  ;;  %v1230_v42 = vrot.slane %v1184_v57, 7 }
 0x51c   :  { %v880_v21 = vpop.f32.mrf.mxu1 }
 0x51d   :  { %v881_v26 = vadd.f32 %v880_v21, %v4405_v6 }
 0x51f   :  { %v4409_v32 = vadd.f32 %v984_v16, %v881_v26  ;;  %v4426_v26 = vld [vmem:[#allocation13 + $0x118] sm:$0xff] }
 0x520   :  { %1010 = vmatpush.msra.mxu2 %v4426_v26 }
 0x522   :  { %1011 = vmatpush.msra.mxu2 %v4428_v44 }
 0x523   :  { %v4417_v61 = vpop.f32.mrf.mxu3 }
 0x524   :  { %v4411_v38 = vpop.f32.mrf.mxu1 }
 0x52b   :  { %v1163_v63 = vpop.f32.mrf.mxu3 }
 0x52c   :  { %v1164_v0 = vadd.f32 %v1163_v63, %v4212_v12  ;;  %v4437_v63 = vld [vmem:[#allocation13 + $0xb8] sm:$0xff] }
 0x52e   :  { %v1208_v8 = vadd.f32 %v4341_v7, %v1164_v0  ;;  %v1231_v39 = vsel %vm468_vm5, %v1164_v0, %v1230_v42  ;;  %v1309_v0 = vld [vmem:[#allocation7 + $0xe0] sm:$0xff] }
 0x52f   :  { %v1233_v45 = vadd.f32 %v1231_v39, %v4341_v7  ;;  %v4434_v7 = vld [vmem:[#allocation13 + $0xd0] sm:$0xff]  ;;  %v1301_v39 = vld [vmem:[#allocation7 + $0xa0] sm:$0xff] }
 0x530   :  { %v3476_v9 = vmul.f32 -1.442695, %v1208_v8 }
 0x531   :  { %v3477_v48 = vmul.f32 -1.442695, %v1233_v45 }
 0x532   :  { %3580 = vpow2.f32 %v3476_v9 }
 0x534   :  { %v1203_v52 = vpop.f32.mrf.mxu1 }
 0x535   :  { %v1204_v4 = vadd.f32 %v1203_v52, %v4216_v18 }
 0x537   :  { %v1254_v59 = vrot.slane %v1204_v4, 7  ;;  %v4431_v4 = vld [vmem:[#allocation13 + $0xe8] sm:$0xff] }
 0x538   :  { %v3581_v46 = vpop.eup %3580  ;;  %1012 = vmatpush.msra.mxu2 %v4431_v4 }
 0x539   :  { %v1255_v60 = vsel %vm468_vm5, %v1184_v57, %v1254_v59  ;;  %v1212_v13 = vadd.f32 1.0, %v3581_v46  ;;  %v1315_v57 = vld [vmem:[#allocation7 + $0x110] sm:$0xff]  ;;  %v1312_v59 = vld [vmem:[#allocation7 + $0xf8] sm:$0xff]  ;;  %v4440_v46 = vld [vmem:[#allocation13 + $0xa0] sm:$0xff] }
 0x53a   :  { %1256 = vrot.lane.b32.xlu0 %v1255_v60, %s3958_s13  ;;  %1351 = vmatpush.msra.mxu3 %v1315_v57 }
 0x53b   :  { %3582 = vrcp.f32 %v1212_v13  ;;  %v1224_v23 = vand.u32 2147483648, %v1212_v13  ;;  %vm1218_vm12 = vweird.f32 %v1212_v13  ;;  %v1222_v34 = vand.u32 2147483647, %v1212_v13  ;;  %1013 = vmatpush.msra.mxu2 %v4434_v7 }
 0x53c   :  { %1352 = vmatpush.msra.mxu3 %v1312_v59  ;;  %v1314_v59 = vld [vmem:[#allocation7 + $0x108] sm:$0xff] }
 0x53d   :  { %v1225_v49 = vor.u32 1.1754944e-38, %v1224_v23  ;;  %vm1223_vm14 = vcmp.eq.f32.partialorder %v1222_v34, 8.507059e+37  ;;  %1014 = vmatpush.msra.mxu2 %v4437_v63  ;;  %v1313_v23 = vld [vmem:[#allocation7 + $0x100] sm:$0xff]  ;;  %v1310_v34 = vld [vmem:[#allocation7 + $0xe8] sm:$0xff] }
 0x53e   :  { %1353 = vmatpush.msra.mxu3 %v1309_v0  ;;  %v1295_v0 = vld [vmem:[#allocation7 + $0x70] sm:$0xff] }
 0x53f   :  { %1015 = vmatpush.msra.mxu2 %v4440_v46 }
 0x541   :  { %v3583_v14 = vpop.eup %3582 }
 0x542   :  { %v1214_v15 = vmul.f32 %v3583_v14, %v1212_v13  ;;  %vm1219_vm11 = vweird.f32 %v3583_v14  ;;  %v1306_v13 = vld [vmem:[#allocation7 + $0xc8] sm:$0xff] }
 0x543   :  { %vm1220_vm13 = vmor %vm1218_vm12, %vm1219_vm11  ;;  %1354 = vmatpush.msra.mxu3 %v1306_v13  ;;  %v1422_v13 = vld [vmem:[#allocation12 + $0x118] sm:$0xff] }
 0x544   :  { %v1215_v17 = vsub.f32 1.0, %v1214_v15  ;;  %v1316_v15 = vld [vmem:[#allocation7 + $0x118] sm:$0xff] }
 0x545   :  { %1371 = vmatpush.msrb.mxu0 %v1316_v15  ;;  %v4477_v15 = vperm.slane %v4394_v58, 1 }
 0x546   :  { %v1216_v19 = vmul.f32 %v3583_v14, %v1215_v17 }
 0x547   :  { %1372 = vmatpush.msrb.mxu0 %v1313_v23  ;;  %v1289_v23 = vld [vmem:[#allocation7 + $0x40] sm:$0xff] }
 0x548   :  { %v1217_v20 = vadd.f32 %v3583_v14, %v1216_v19  ;;  %v4449_v19 = vld [vmem:[#allocation13 + $0x88] sm:$0xff] }
 0x549   :  { %1016 = vmatpush.msra.mxu2 %v4449_v19  ;;  %1373 = vmatpush.msrb.mxu0 %v1310_v34  ;;  %v1416_v34 = vld [vmem:[#allocation12 + $0xe8] sm:$0xff] }
 0x54a   :  { %v1221_v37 = vsel %vm1220_vm13, %v3583_v14, %v1217_v20  ;;  %v1303_v20 = vld [vmem:[#allocation7 + $0xb0] sm:$0xff]  ;;  %v1292_v14 = vld [vmem:[#allocation7 + $0x58] sm:$0xff] }
 0x54b   :  { %v1226_v29 = vsel %vm1223_vm14, %v1225_v49, %v1221_v37  ;;  %v4452_v37 = vld [vmem:[#allocation13 + $0x70] sm:$0xff]  ;;  %1355 = vmatpush.msra.mxu3 %v1303_v20  ;;  %1374 = vmatpush.msrb.mxu0 %v1307_v25  ;;  %v1419_v20 = vld [vmem:[#allocation12 + $0x100] sm:$0xff]  ;;  %v1286_v25 = vld [vmem:[#allocation7 + $0x28] sm:$0xff] }
 0x54c   :  { %1017 = vmatpush.msra.mxu2 %v4452_v37 }
 0x5ac   :  { %v1257_v51 = vpop.permute.xlu0 %1256 }
 0x5ad   :  { %v1258_v28 = vrot.slane %v1257_v51, 1 }
 0x5af   :  { %v1259_v33 = vsel %vm497_vm9, %v1257_v51, %v1258_v28  ;;  %v1300_v51 = vld [vmem:[#allocation7 + $0x98] sm:$0xff] }
 0x5b0   :  { %v1261_v35 = vmul.f32 %v1259_v33, %v1226_v29  ;;  %v4455_v28 = vld [vmem:[#allocation13 + $0x58] sm:$0xff]  ;;  %v1297_v29 = vld [vmem:[#allocation7 + $0x80] sm:$0xff]  ;;  %1356 = vmatpush.msra.mxu3 %v1300_v51  ;;  %v4482_v51 = vadd.f32 %v4411_v38, %v4477_v15 }
 0x5b1   :  { %1018 = vmatpush.msra.mxu2 %v4455_v28  ;;  %v1293_v38 = vld [vmem:[#allocation7 + $0x60] sm:$0xff] }
 0x5b2   :  { %v1269_v40 = vadd.f32 %v1267_v36, %v1261_v35  ;;  %v1304_v35 = vld [vmem:[#allocation7 + $0xb8] sm:$0xff]  ;;  %1357 = vmatpush.msra.mxu3 %v1297_v29 }
 0x5b3   :  { %1375 = vmatpush.msrb.mxu0 %v1304_v35  ;;  %v1410_v29 = vld [vmem:[#allocation12 + $0xb8] sm:$0xff]  ;;  %v1407_v35 = vld [vmem:[#allocation12 + $0xa0] sm:$0xff] }
 0x5b4   :  { %3584 = vtanh.f32 %v1269_v40  ;;  %v4458_v40 = vld [vmem:[#allocation13 + $0x40] sm:$0xff] }
 0x5b5   :  { %3586 = vpow2.f32 %v3477_v48  ;;  %1019 = vmatpush.msra.mxu2 %v4458_v40  ;;  %1376 = vmatpush.msrb.mxu0 %v1301_v39  ;;  %v1284_v39 = vld [vmem:[#allocation7 + $0x18] sm:$0xff] }
 0x5ba   :  { %v3585_v41 = vpop.eup %3584 }
 0x5bb   :  { %1273 = vrot.lane.b32.xlu2 %v3585_v41, %s3959_s17  ;;  %v3587_v50 = vpop.eup %3586  ;;  %v1294_v41 = vld [vmem:[#allocation7 + $0x68] sm:$0xff] }
 0x5bc   :  { %v1237_v55 = vadd.f32 1.0, %v3587_v50  ;;  %v4463_v50 = vld [vmem:[#allocation13 + $0x28] sm:$0xff]  ;;  %1358 = vmatpush.msra.mxu3 %v1294_v41 }
 0x5bd   :  { %1020 = vmatpush.msra.mxu2 %v4463_v50  ;;  %v1290_v41 = vld [vmem:[#allocation7 + $0x48] sm:$0xff] }
 0x5be   :  { %3588 = vrcp.f32 %v1237_v55  ;;  %v1249_v8 = vand.u32 2147483648, %v1237_v55  ;;  %vm1243_vm2 = vweird.f32 %v1237_v55  ;;  %v1247_v9 = vand.u32 2147483647, %v1237_v55 }
 0x5c0   :  { %v1250_v22 = vor.u32 1.1754944e-38, %v1249_v8  ;;  %vm1248_vm4 = vcmp.eq.f32.partialorder %v1247_v9, 8.507059e+37  ;;  %v1311_v8 = vld [vmem:[#allocation7 + $0xf0] sm:$0xff]  ;;  %v1282_v9 = vld [vmem:[#allocation7 + $0x8] sm:$0xff] }
 0x5c4   :  { %v3589_v10 = vpop.eup %3588 }
 0x5c5   :  { %v1239_v16 = vmul.f32 %v3589_v10, %v1237_v55  ;;  %vm1244_vm1 = vweird.f32 %v3589_v10  ;;  %v1291_v55 = vld [vmem:[#allocation7 + $0x50] sm:$0xff] }
 0x5c6   :  { %vm4442_vm3 = vmor %vm1243_vm2, %vm1244_vm1  ;;  %1359 = vmatpush.msra.mxu3 %v1291_v55  ;;  %v1418_v55 = vld [vmem:[#allocation12 + $0xf8] sm:$0xff] }
 0x5c7   :  { %v1240_v21 = vsub.f32 1.0, %v1239_v16 }
 0x5c9   :  { %v1241_v52 = vmul.f32 %v3589_v10, %v1240_v21  ;;  %v4468_v21 = vld [vmem:[#allocation13 + $0x10] sm:$0xff] }
 0x5ca   :  { %1021 = vmatpush.msra.mxu2 %v4468_v21 }
 0x5cb   :  { %v1242_v60 = vadd.f32 %v3589_v10, %v1241_v52  ;;  %v1288_v52 = vld [vmem:[#allocation7 + $0x38] sm:$0xff]  ;;  %1022 = vmatmul.f32.vlgmr.msra.gmra.mxu2 %v3957_v53  ;;  %v1413_v53 = vld [vmem:[#allocation12 + $0xd0] sm:$0xff] }
 0x5cc   :  { %1360 = vmatpush.msra.mxu3 %v1288_v52  ;;  %1331 = vmatpush.msrb.mxu2 %v1314_v59  ;;  %v1412_v52 = vld [vmem:[#allocation12 + $0xc8] sm:$0xff]  ;;  %v1403_v59 = vld [vmem:[#allocation12 + $0x80] sm:$0xff] }
 0x5cd   :  { %v1246_v17 = vsel %vm4442_vm3, %v3589_v10, %v1242_v60  ;;  %v1298_v10 = vld [vmem:[#allocation7 + $0x88] sm:$0xff]  ;;  %v1285_v60 = vld [vmem:[#allocation7 + $0x20] sm:$0xff] }
 0x5ce   :  { %v1251_v24 = vsel %vm1248_vm4, %v1250_v22, %v1246_v17  ;;  %1377 = vmatpush.msrb.mxu0 %v1298_v10  ;;  %1361 = vmatpush.msra.mxu3 %v1285_v60  ;;  %v1308_v17 = vld [vmem:[#allocation7 + $0xd8] sm:$0xff]  ;;  %v1305_v22 = vld [vmem:[#allocation7 + $0xc0] sm:$0xff]  ;;  %v1283_v60 = vld [vmem:[#allocation7 + $0x10] sm:$0xff] }
 0x5cf   :  { %v1271_v36 = vsub.f32 1.0, %v1251_v24  ;;  %v1279_v45 = vmul.f32 %v1251_v24, %v4227_v47  ;;  %1332 = vmatpush.msrb.mxu2 %v1311_v8  ;;  %v1302_v24 = vld [vmem:[#allocation7 + $0xa8] sm:$0xff]  ;;  %v1415_v10 = vld [vmem:[#allocation12 + $0xe0] sm:$0xff]  ;;  %v1401_v8 = vld [vmem:[#allocation12 + $0x70] sm:$0xff] }
 0x5d0   :  { %1378 = vmatpush.msrb.mxu0 %v1295_v0  ;;  %1362 = vmatpush.msra.mxu3 %v1282_v9  ;;  %v1400_v0 = vld [vmem:[#allocation12 + $0x68] sm:$0xff]  ;;  %v1397_v9 = vld [vmem:[#allocation12 + $0x50] sm:$0xff] }
 0x5d1   :  { %1333 = vmatpush.msrb.mxu2 %v1308_v17  ;;  %v1395_v17 = vld [vmem:[#allocation12 + $0x40] sm:$0xff] }
 0x5d2   :  { %1467 = vmatpush.msrb.mxu3 %v1422_v13  ;;  %1379 = vmatpush.msrb.mxu0 %v1292_v14  ;;  %v1398_v13 = vld [vmem:[#allocation12 + $0x58] sm:$0xff] }
 0x5d3   :  { %1334 = vmatpush.msrb.mxu2 %v1305_v22  ;;  %v1394_v14 = vld [vmem:[#allocation12 + $0x38] sm:$0xff]  ;;  %v1388_v22 = vld [vmem:[#allocation12 + $0x8] sm:$0xff] }
 0x5d4   :  { %1468 = vmatpush.msrb.mxu3 %v1419_v20  ;;  %1380 = vmatpush.msrb.mxu0 %v1289_v23  ;;  %v1391_v20 = vld [vmem:[#allocation12 + $0x20] sm:$0xff]  ;;  %v1392_v23 = vld [vmem:[#allocation12 + $0x28] sm:$0xff] }
 0x5d5   :  { %1335 = vmatpush.msrb.mxu2 %v1302_v24 }
 0x5d6   :  { %1469 = vmatpush.msrb.mxu3 %v1416_v34  ;;  %1381 = vmatpush.msrb.mxu0 %v1286_v25  ;;  %v1389_v34 = vld [vmem:[#allocation12 + $0x10] sm:$0xff] }
 0x5d8   :  { %1470 = vmatpush.msrb.mxu3 %v1413_v53  ;;  %1382 = vmatpush.msrb.mxu0 %v1283_v60 }
 0x5da   :  { %1471 = vmatpush.msrb.mxu3 %v1410_v29 }
 0x5dc   :  { %1472 = vmatpush.msrb.mxu3 %v1407_v35 }
 0x615   :  { %v1274_v49 = vpop.permute.xlu2 %1273 }
 0x616   :  { %v1275_v33 = vrot.slane %v1274_v49, 7 }
 0x618   :  { %v1276_v42 = vsel %vm380_vm15, %v1275_v33, %v1274_v49  ;;  %v1299_v49 = vld [vmem:[#allocation7 + $0x90] sm:$0xff]  ;;  %v1296_v33 = vld [vmem:[#allocation7 + $0x78] sm:$0xff] }
 0x619   :  { %v1278_v48 = vmul.f32 %v1276_v42, %v1271_v36  ;;  %1336 = vmatpush.msrb.mxu2 %v1299_v49  ;;  %v1404_v36 = vld [vmem:[#allocation12 + $0x88] sm:$0xff]  ;;  %v1287_v42 = vld [vmem:[#allocation7 + $0x30] sm:$0xff]  ;;  %v4499_v49 = vpop.f32.mrf.mxu2 }
 0x61a   :  { %1473 = vmatpush.msrb.mxu3 %v1404_v36 }
 0x61b   :  { %v4466_v16 = vadd.f32 %v1279_v45, %v1278_v48  ;;  %1337 = vmatpush.msrb.mxu2 %v1296_v33  ;;  %v1281_v45 = vld [vmem:[#allocation7] sm:$0xff]  ;;  %v1421_v48 = vld [vmem:[#allocation12 + $0x110] sm:$0xff] }
 0x61c   :  { %1474 = vmatpush.msrb.mxu3 %v1401_v8 }
 0x61d   :  { %v1319_v47 = vperm.slane %v4466_v16, 1  ;;  %v1318_v57 = vperm.slane %v4466_v16, 0  ;;  %1338 = vmatpush.msrb.mxu2 %v1293_v38 }
 0x61e   :  { %1475 = vmatpush.msrb.mxu3 %v1398_v13 }
 0x61f   :  { %1322 = vrot.lane.b32.xlu1 %v1319_v47, %s3960_s21  ;;  %1320 = vrot.lane.b32.xlu0 %v1318_v57, %s3960_s21  ;;  %v1409_v47 = vld [vmem:[#allocation12 + $0xb0] sm:$0xff]  ;;  %v1406_v57 = vld [vmem:[#allocation12 + $0x98] sm:$0xff] }
 0x620   :  { %1339 = vmatpush.msrb.mxu2 %v1290_v41  ;;  %1476 = vmatpush.msrb.mxu3 %v1395_v17 }
 0x622   :  { %1340 = vmatpush.msrb.mxu2 %v1287_v42  ;;  %1477 = vmatpush.msrb.mxu3 %v1392_v23 }
 0x624   :  { %1341 = vmatpush.msrb.mxu2 %v1284_v39  ;;  %1478 = vmatpush.msrb.mxu3 %v1389_v34 }
 0x626   :  { %1342 = vmatpush.msrb.mxu2 %v1281_v45  ;;  %v3471_v45 = vmul.f32 -1.442695, %v4409_v32 }
 0x627   :  { %1068 = vrot.lane.b32.xlu1 %v4482_v51, %s3958_s13 }
 0x628   :  { %1447 = vmatpush.msra.mxu2 %v1421_v48  ;;  %3590 = vpow2.f32 %v3471_v45  ;;  %v1440_v48 = vpop.f32.mrf.mxu1 }
 0x62a   :  { %1448 = vmatpush.msra.mxu2 %v1418_v55 }
 0x62c   :  { %1449 = vmatpush.msra.mxu2 %v1415_v10 }
 0x62e   :  { %1450 = vmatpush.msra.mxu2 %v1412_v52  ;;  %v3591_v10 = vpop.eup %3590  ;;  %v1441_v52 = vadd.f32 %v1440_v48, %v4312_v56 }
 0x630   :  { %1451 = vmatpush.msra.mxu2 %v1409_v47 }
 0x632   :  { %1452 = vmatpush.msra.mxu2 %v1406_v57  ;;  %v1030_v57 = vadd.f32 1.0, %v3591_v10 }
 0x634   :  { %1453 = vmatpush.msra.mxu2 %v1403_v59  ;;  %3592 = vrcp.f32 %v1030_v57  ;;  %vm1036_vm7 = vweird.f32 %v1030_v57  ;;  %v1040_v23 = vand.u32 2147483647, %v1030_v57 }
 0x636   :  { %1454 = vmatpush.msra.mxu2 %v1400_v0  ;;  %vm1041_vm10 = vcmp.eq.f32.partialorder %v1040_v23, 8.507059e+37  ;;  %v4535_v23 = vperm.slane %v4399_v62, 2 }
 0x638   :  { %1455 = vmatpush.msra.mxu2 %v1397_v9 }
 0x63a   :  { %1456 = vmatpush.msra.mxu2 %v1394_v14 }
 0x63c   :  { %1457 = vmatpush.msra.mxu2 %v1391_v20  ;;  %v1042_v20 = vand.u32 2147483648, %v1030_v57 }
 0x63e   :  { %1458 = vmatpush.msra.mxu2 %v1388_v22 }
 0x64e   :  { %v1023_v29 = vpop.f32.mrf.mxu2 }
 0x691   :  { %v1323_v24 = vpop.permute.xlu1 %1322  ;;  %v1321_v25 = vpop.permute.xlu0 %1320 }
 0x692   :  { %v4487_v53 = vsel %vm563_vm0, %v1321_v25, %v1323_v24  ;;  %v1043_v24 = vor.u32 1.1754944e-38, %v1042_v20 }
 0x693   :  { %3478 = vmatmul.msk.f32.vlgmr.msrb.gmra.mxu2 %vm380_vm15, %v4487_v53  ;;  %3479 = vmatmul.msk.f32.vlgmr.msra.gmra.mxu3 %vm380_vm15, %v4487_v53 }
 0x694   :  { %3480 = vmatmul.msk.f32.vlgmr.msrb.gmra.mxu0 %vm380_vm15, %v4487_v53 }
 0x699   :  { %v1069_v25 = vpop.permute.xlu1 %1068 }
 0x69b   :  { %3482 = vmatmul.msk.f32.vlgmr.msra.gmra.mxu2 %vm380_vm15, %v4364_v27  ;;  %3483 = vmatmul.msk.f32.vlgmr.msrb.gmra.mxu3 %vm380_vm15, %v4364_v27  ;;  %v4511_v27 = vperm.slane %v4394_v58, 2  ;;  %v3593_v58 = vpop.eup %3592 }
 0x69c   :  { %v1032_v0 = vmul.f32 %v3593_v58, %v1030_v57  ;;  %vm1037_vm6 = vweird.f32 %v3593_v58 }
 0x69d   :  { %v1024_v39 = vadd.f32 %v1023_v29, %v4511_v27  ;;  %vm1038_vm8 = vmor %vm1036_vm7, %vm1037_vm6 }
 0x69e   :  { %v1033_v9 = vsub.f32 1.0, %v1032_v0 }
 0x6a0   :  { %v1034_v13 = vmul.f32 %v3593_v58, %v1033_v9 }
 0x6a2   :  { %v1035_v14 = vadd.f32 %v3593_v58, %v1034_v13 }
 0x6a4   :  { %v1039_v22 = vsel %vm1038_vm8, %v3593_v58, %v1035_v14 }
 0x711   :  { %v1384_v14 = vpop.f32.mrf.mxu0 }
 0x716   :  { %v1344_v33 = vpop.f32.mrf.mxu2  ;;  %v4501_v35 = vpop.f32.mrf.mxu3 }
 0x717   :  { %v1345_v55 = vadd.f32 %v1344_v33, %v4310_v54  ;;  %v4518_v33 = vsel %vm1041_vm10, %v1043_v24, %v1039_v22 }
 0x719   :  { %v1483_v47 = vadd.f32 %v1441_v52, %v1345_v55 }
 0x71b   :  { %v3484_v59 = vmul.f32 -1.442695, %v1483_v47 }
 0x71d   :  { %3594 = vpow2.f32 %v3484_v59 }
 0x71e   :  { %v1460_v38 = vpop.f32.mrf.mxu2  ;;  %v1480_v36 = vpop.f32.mrf.mxu3 }
 0x71f   :  { %v4504_v41 = vadd.f32 %v1460_v38, %v4303_v43  ;;  %v1481_v42 = vadd.f32 %v1480_v36, %v4299_v31 }
 0x721   :  { %1527 = vrot.lane.b32.xlu0 %v1481_v42, %s3958_s13  ;;  %1525 = vrot.lane.b32.xlu2 %v4504_v41, %s3958_s13 }
 0x723   :  { %v3595_v60 = vpop.eup %3594 }
 0x724   :  { %v1487_v8 = vadd.f32 1.0, %v3595_v60  ;;  %v4526_v60 = vperm.slane %v4399_v62, 1 }
 0x726   :  { %3596 = vrcp.f32 %v1487_v8  ;;  %v1499_v48 = vand.u32 2147483648, %v1487_v8  ;;  %vm1493_vm12 = vweird.f32 %v1487_v8  ;;  %v1497_v55 = vand.u32 2147483647, %v1487_v8 }
 0x727   :  { %v901_v0 = vadd.f32 %v4499_v49, %v4526_v60  ;;  %v921_v49 = vadd.f32 %v4417_v61, %v4535_v23 }
 0x728   :  { %v1500_v52 = vor.u32 1.1754944e-38, %v1499_v48  ;;  %vm1498_vm14 = vcmp.eq.f32.partialorder %v1497_v55, 8.507059e+37 }
 0x729   :  { %1070 = vrot.lane.b32.xlu2 %v1024_v39, %s3958_s13  ;;  %v1046_v62 = vadd.f32 %v4482_v51, %v901_v0 }
 0x72c   :  { %v3597_v17 = vpop.eup %3596 }
 0x72d   :  { %v1489_v34 = vmul.f32 %v3597_v17, %v1487_v8  ;;  %vm1494_vm11 = vweird.f32 %v3597_v17 }
 0x72e   :  { %vm1495_vm13 = vmor %vm1493_vm12, %vm1494_vm11 }
 0x72f   :  { %v1490_v42 = vsub.f32 1.0, %v1489_v34 }
 0x731   :  { %v1491_v39 = vmul.f32 %v3597_v17, %v1490_v42 }
 0x733   :  { %v1492_v45 = vadd.f32 %v3597_v17, %v1491_v39 }
 0x735   :  { %v1496_v10 = vsel %vm1495_vm13, %v3597_v17, %v1492_v45  ;;  %v1385_v17 = vadd.f32 %v1384_v14, %v4320_v3  ;;  %v1590_v14 = vld [vmem:[#allocation9 + $0x108] sm:$0xff] }
 0x736   :  { %v1501_v57 = vsel %vm1498_vm14, %v1500_v52, %v1496_v10  ;;  %1606 = vmatpush.msra.mxu0 %v1590_v14 }
 0x737   :  { %v1540_v51 = vsub.f32 1.0, %v1501_v57 }
 0x77b   :  { %v1526_v32 = vpop.permute.xlu2 %1525 }
 0x783   :  { %v1071_v29 = vpop.permute.xlu2 %1070 }
 0x784   :  { %v1072_v38 = vsel %vm497_vm9, %v1069_v25, %v1071_v29 }
 0x785   :  { %v1074_v36 = vmul.f32 %v1072_v38, %v4518_v33  ;;  %v3472_v38 = vmul.f32 -1.442695, %v1046_v62 }
 0x787   :  { %1076 = vrot.lane.b32.xlu1 %v1074_v36, %s3958_s13 }
 0x793   :  { %v1528_v47 = vpop.permute.xlu0 %1527 }
 0x794   :  { %v1529_v59 = vsel %vm497_vm9, %v1526_v32, %v1528_v47  ;;  %v1365_v32 = vadd.f32 %v4501_v35, %v4318_v1 }
 0x795   :  { %v1531_v58 = vmul.f32 %v1529_v59, %v1501_v57 }
 0x796   :  { %v1503_v39 = vadd.f32 %v4504_v41, %v1365_v32 }
 0x797   :  { %1533 = vrot.lane.b32.xlu0 %v1531_v58, %s3958_s13 }
 0x798   :  { %v3485_v61 = vmul.f32 -1.442695, %v1503_v39 }
 0x7f9   :  { %v1077_v9 = vpop.permute.xlu1 %1076 }
 0x7fa   :  { %v1079_v13 = vadd.f32 %v1077_v9, %v901_v0  ;;  %v1080_v24 = vadd.f32 %v1077_v9, %v921_v49  ;;  %v1695_v0 = vld [vmem:[#allocation13 + $0x108] sm:$0xff]  ;;  %v1692_v9 = vld [vmem:[#allocation13 + $0xf0] sm:$0xff] }
 0x7fb   :  { %1709 = vmatpush.msra.mxu3 %v1695_v0 }
 0x7fc   :  { %3598 = vtanh.f32 %v1079_v13 }
 0x7fd   :  { %1710 = vmatpush.msra.mxu3 %v1692_v9 }
 0x802   :  { %v3599_v8 = vpop.eup %3598 }
 0x803   :  { %1087 = vrot.lane.b32.xlu1 %v3599_v8, %s3960_s21 }
 0x809   :  { %v1534_v20 = vpop.permute.xlu0 %1533 }
 0x80a   :  { %v1536_v22 = vadd.f32 %v1534_v20, %v1365_v32  ;;  %v1537_v34 = vadd.f32 %v1534_v20, %v1385_v17  ;;  %v1553_v17 = vmul.f32 %v1501_v57, %v4334_v30  ;;  %v1689_v20 = vld [vmem:[#allocation13 + $0xd8] sm:$0xff]  ;;  %v1683_v57 = vld [vmem:[#allocation13 + $0xa8] sm:$0xff] }
 0x80b   :  { %1711 = vmatpush.msra.mxu3 %v1689_v20 }
 0x80c   :  { %3600 = vtanh.f32 %v1536_v22  ;;  %v1587_v22 = vld [vmem:[#allocation9 + $0xf0] sm:$0xff] }
 0x80d   :  { %3602 = vtanh.f32 %v1537_v34  ;;  %1607 = vmatpush.msra.mxu0 %v1587_v22 }
 0x80e   :  { %3604 = vtanh.f32 %v1080_v24 }
 0x80f   :  { %3606 = vpow2.f32 %v3472_v38  ;;  %v1680_v38 = vld [vmem:[#allocation13 + $0x90] sm:$0xff] }
 0x812   :  { %v3601_v25 = vpop.eup %3600 }
 0x813   :  { %v3603_v29 = vpop.eup %3602  ;;  %1544 = vrot.lane.b32.xlu2 %v3601_v25, %s3960_s21 }
 0x814   :  { %1546 = vrot.lane.b32.xlu0 %v3603_v29, %s3960_s21  ;;  %v3605_v35 = vpop.eup %3604  ;;  %v1686_v29 = vld [vmem:[#allocation13 + $0xc0] sm:$0xff] }
 0x815   :  { %v3607_v36 = vpop.eup %3606  ;;  %1712 = vmatpush.msra.mxu3 %v1686_v29  ;;  %v1581_v29 = vld [vmem:[#allocation9 + $0xc0] sm:$0xff] }
 0x816   :  { %v1050_v42 = vadd.f32 1.0, %v3607_v36 }
 0x817   :  { %1713 = vmatpush.msra.mxu3 %v1683_v57  ;;  %v1591_v57 = vld [vmem:[#allocation9 + $0x110] sm:$0xff] }
 0x818   :  { %3608 = vrcp.f32 %v1050_v42  ;;  %v1062_v58 = vand.u32 2147483648, %v1050_v42  ;;  %vm1056_vm2 = vweird.f32 %v1050_v42  ;;  %v1060_v8 = vand.u32 2147483647, %v1050_v42  ;;  %1626 = vmatpush.msrb.mxu1 %v1591_v57  ;;  %v1570_v57 = vld [vmem:[#allocation9 + $0x68] sm:$0xff] }
 0x819   :  { %3610 = vpow2.f32 %v3485_v61  ;;  %v1096_v61 = vmul.f32 0.0, %v4518_v33  ;;  %1714 = vmatpush.msra.mxu3 %v1680_v38  ;;  %v1671_v38 = vld [vmem:[#allocation13 + $0x48] sm:$0xff] }
 0x81a   :  { %v1063_v24 = vor.u32 1.1754944e-38, %v1062_v58  ;;  %vm1061_vm4 = vcmp.eq.f32.partialorder %v1060_v8, 8.507059e+37  ;;  %v4567_v8 = vld [vmem:[#allocation3 + $0x2] ss:$4 sm:$0x7] }
 0x81b   :  { %1089 = vrot.lane.b32.xlu2 %v3605_v35, %s3960_s21  ;;  %v1083_v35 = vsub.f32 1.0, %v4518_v33 }
 0x81e   :  { %v3609_v45 = vpop.eup %3608 }
 0x81f   :  { %v1052_v48 = vmul.f32 %v3609_v45, %v1050_v42  ;;  %v3611_v55 = vpop.eup %3610  ;;  %vm1057_vm1 = vweird.f32 %v3609_v45 }
 0x820   :  { %v4544_v10 = vadd.f32 1.0, %v3611_v55  ;;  %vm1058_vm3 = vmor %vm1056_vm2, %vm1057_vm1 }
 0x821   :  { %v1053_v52 = vsub.f32 1.0, %v1052_v48 }
 0x822   :  { %3612 = vrcp.f32 %v4544_v10  ;;  %v1519_v33 = vand.u32 2147483648, %v4544_v10  ;;  %vm1513_vm7 = vweird.f32 %v4544_v10  ;;  %v1517_v0 = vand.u32 2147483647, %v4544_v10 }
 0x823   :  { %v1054_v47 = vmul.f32 %v3609_v45, %v1053_v52 }
 0x824   :  { %v1520_v14 = vor.u32 1.1754944e-38, %v1519_v33  ;;  %vm1518_vm10 = vcmp.eq.f32.partialorder %v1517_v0, 8.507059e+37  ;;  %v1882_v33 = vld [vmem:[#allocation10 + $0x110] sm:$0xff]  ;;  %v1566_v0 = vld [vmem:[#allocation9 + $0x48] sm:$0xff] }
 0x825   :  { %v1055_v59 = vadd.f32 %v3609_v45, %v1054_v47 }
 0x827   :  { %v1059_v34 = vsel %vm1058_vm3, %v3609_v45, %v1055_v59 }
 0x828   :  { %v3613_v13 = vpop.eup %3612  ;;  %v1064_v30 = vsel %vm1061_vm4, %v1063_v24, %v1059_v34 }
 0x829   :  { %v1509_v25 = vmul.f32 %v3613_v13, %v4544_v10  ;;  %v1084_v42 = vsub.f32 1.0, %v1064_v30  ;;  %v1097_v52 = vmul.f32 0.0, %v1064_v30  ;;  %vm1514_vm6 = vweird.f32 %v3613_v13  ;;  %v1584_v10 = vld [vmem:[#allocation9 + $0xd8] sm:$0xff]  ;;  %v1674_v30 = vld [vmem:[#allocation13 + $0x60] sm:$0xff] }
 0x82a   :  { %vm1515_vm8 = vmor %vm1513_vm7, %vm1514_vm6  ;;  %1608 = vmatpush.msra.mxu0 %v1584_v10  ;;  %v1573_v10 = vld [vmem:[#allocation9 + $0x80] sm:$0xff] }
 0x82b   :  { %v1510_v62 = vsub.f32 1.0, %v1509_v25 }
 0x82c   :  { %1609 = vmatpush.msra.mxu0 %v1581_v29  ;;  %v1873_v29 = vld [vmem:[#allocation10 + $0xc8] sm:$0xff] }
 0x82d   :  { %v1511_v59 = vmul.f32 %v3613_v13, %v1510_v62  ;;  %v1592_v62 = vld [vmem:[#allocation9 + $0x118] sm:$0xff] }
 0x82e   :  { %1646 = vmatpush.msrb.mxu2 %v1592_v62  ;;  %v1696_v62 = vld [vmem:[#allocation13 + $0x110] sm:$0xff] }
 0x82f   :  { %v1512_v58 = vadd.f32 %v3613_v13, %v1511_v59  ;;  %v1583_v59 = vld [vmem:[#allocation9 + $0xd0] sm:$0xff] }
 0x831   :  { %v1516_v9 = vsel %vm1515_vm8, %v3613_v13, %v1512_v58  ;;  %v1677_v13 = vld [vmem:[#allocation13 + $0x78] sm:$0xff]  ;;  %v1662_v58 = vld [vmem:[#allocation13] sm:$0xff] }
 0x832   :  { %1715 = vmatpush.msra.mxu3 %v1677_v13  ;;  %v1574_v13 = vld [vmem:[#allocation9 + $0x88] sm:$0xff] }
 0x834   :  { %1716 = vmatpush.msra.mxu3 %v1674_v30  ;;  %v1557_v30 = vld [vmem:[#allocation9] sm:$0xff] }
 0x836   :  { %1717 = vmatpush.msra.mxu3 %v1671_v38  ;;  %v1870_v38 = vld [vmem:[#allocation10 + $0xb0] sm:$0xff] }
 0x86d   :  { %v1545_v41 = vpop.permute.xlu2 %1544 }
 0x86e   :  { %v1551_v32 = vmul.f32 %v1545_v41, %v1540_v51 }
 0x870   :  { %v4548_v49 = vadd.f32 %v1553_v17, %v1551_v32  ;;  %v1521_v17 = vsel %vm1518_vm10, %v1520_v14, %v1516_v9  ;;  %v1579_v9 = vld [vmem:[#allocation9 + $0xb0] sm:$0xff]  ;;  %v1580_v14 = vld [vmem:[#allocation9 + $0xb8] sm:$0xff] }
 0x871   :  { %v1541_v32 = vsub.f32 1.0, %v1521_v17  ;;  %v1554_v24 = vmul.f32 %v1521_v17, %v4359_v5  ;;  %v1589_v5 = vld [vmem:[#allocation9 + $0x100] sm:$0xff]  ;;  %v1879_v17 = vld [vmem:[#allocation10 + $0xf8] sm:$0xff] }
 0x872   :  { %1595 = vrot.lane.b32.xlu0 %v4548_v49, %s3960_s21  ;;  %1647 = vmatpush.msrb.mxu2 %v1589_v5  ;;  %v1568_v5 = vld [vmem:[#allocation9 + $0x58] sm:$0xff] }
 0x875   :  { %v1090_v36 = vpop.permute.xlu2 %1089  ;;  %v1088_v39 = vpop.permute.xlu1 %1087 }
 0x876   :  { %v1091_v45 = vsel %vm563_vm0, %v1088_v39, %v1090_v36  ;;  %v1094_v48 = vmul.f32 %v1088_v39, %v1083_v35  ;;  %v1578_v35 = vld [vmem:[#allocation9 + $0xa8] sm:$0xff]  ;;  %v1575_v36 = vld [vmem:[#allocation9 + $0x90] sm:$0xff]  ;;  %v1572_v39 = vld [vmem:[#allocation9 + $0x78] sm:$0xff] }
 0x877   :  { %v1095_v55 = vmul.f32 %v1091_v45, %v1084_v42  ;;  %v1668_v42 = vld [vmem:[#allocation13 + $0x30] sm:$0xff]  ;;  %1610 = vmatpush.msra.mxu0 %v1578_v35  ;;  %v1586_v45 = vld [vmem:[#allocation9 + $0xe8] sm:$0xff] }
 0x878   :  { %v4556_v47 = vadd.f32 %v1096_v61, %v1094_v48  ;;  %1718 = vmatpush.msra.mxu3 %v1668_v42  ;;  %v1585_v61 = vld [vmem:[#allocation9 + $0xe0] sm:$0xff]  ;;  %v1665_v48 = vld [vmem:[#allocation13 + $0x18] sm:$0xff]  ;;  %1648 = vmatpush.msrb.mxu2 %v1586_v45  ;;  %v1571_v35 = vld [vmem:[#allocation9 + $0x70] sm:$0xff] }
 0x879   :  { %v4558_v51 = vadd.f32 %v1097_v52, %v1095_v55  ;;  %1611 = vmatpush.msra.mxu0 %v1575_v36  ;;  %v1569_v55 = vld [vmem:[#allocation9 + $0x60] sm:$0xff]  ;;  %v1582_v52 = vld [vmem:[#allocation9 + $0xc8] sm:$0xff]  ;;  %v1693_v36 = vld [vmem:[#allocation13 + $0xf8] sm:$0xff] }
 0x87a   :  { %1698 = vrot.lane.b32.xlu2 %v4556_v47, %s3960_s21  ;;  %1719 = vmatpush.msra.mxu3 %v1665_v48  ;;  %v1867_v42 = vld [vmem:[#allocation10 + $0x98] sm:$0xff]  ;;  %v1690_v45 = vld [vmem:[#allocation13 + $0xe0] sm:$0xff] }
 0x87b   :  { %1700 = vrot.lane.b32.xlu0 %v4558_v51, %s3960_s21  ;;  %1612 = vmatpush.msra.mxu0 %v1572_v39  ;;  %v1564_v39 = vld [vmem:[#allocation9 + $0x38] sm:$0xff]  ;;  %v1864_v48 = vld [vmem:[#allocation10 + $0x80] sm:$0xff] }
 0x87c   :  { %1649 = vmatpush.msrb.mxu2 %v1583_v59  ;;  %1720 = vmatpush.msra.mxu3 %v1662_v58  ;;  %v1687_v59 = vld [vmem:[#allocation13 + $0xc8] sm:$0xff] }
 0x87d   :  { %1613 = vmatpush.msra.mxu0 %v1569_v55  ;;  %v1561_v55 = vld [vmem:[#allocation9 + $0x20] sm:$0xff]  ;;  %v1861_v58 = vld [vmem:[#allocation10 + $0x68] sm:$0xff] }
 0x87e   :  { %1908 = vmatpush.msrb.mxu3 %v1882_v33  ;;  %1650 = vmatpush.msrb.mxu2 %v1580_v14  ;;  %v1558_v33 = vld [vmem:[#allocation9 + $0x8] sm:$0xff] }
 0x87f   :  { %1614 = vmatpush.msra.mxu0 %v1566_v0  ;;  %v1559_v0 = vld [vmem:[#allocation9 + $0x10] sm:$0xff]  ;;  %v1881_v14 = vld [vmem:[#allocation10 + $0x108] sm:$0xff] }
 0x880   :  { %1909 = vmatpush.msrb.mxu3 %v1879_v17  ;;  %v1858_v17 = vld [vmem:[#allocation10 + $0x50] sm:$0xff] }
 0x882   :  { %2001 = vrot.lane.b32.xlu2 %v4567_v8, %s3958_s13 }
 0x886   :  { %v1547_v20 = vpop.permute.xlu0 %1546 }
 0x887   :  { %v1548_v22 = vsel %vm563_vm0, %v1545_v41, %v1547_v20  ;;  %v1588_v41 = vld [vmem:[#allocation9 + $0xf8] sm:$0xff] }
 0x888   :  { %v1552_v34 = vmul.f32 %v1548_v22, %v1541_v32  ;;  %1627 = vmatpush.msrb.mxu1 %v1588_v41  ;;  %v1563_v32 = vld [vmem:[#allocation9 + $0x30] sm:$0xff]  ;;  %v1576_v20 = vld [vmem:[#allocation9 + $0x98] sm:$0xff]  ;;  %v1577_v22 = vld [vmem:[#allocation9 + $0xa0] sm:$0xff] }
 0x889   :  { %1615 = vmatpush.msra.mxu0 %v1563_v32  ;;  %1651 = vmatpush.msrb.mxu2 %v1577_v22  ;;  %v1567_v41 = vld [vmem:[#allocation9 + $0x50] sm:$0xff]  ;;  %v1681_v32 = vld [vmem:[#allocation13 + $0x98] sm:$0xff] }
 0x88a   :  { %v4573_v25 = vadd.f32 %v1554_v24, %v1552_v34  ;;  %1628 = vmatpush.msrb.mxu1 %v1585_v61  ;;  %v1876_v34 = vld [vmem:[#allocation10 + $0xe0] sm:$0xff]  ;;  %v1560_v24 = vld [vmem:[#allocation9 + $0x18] sm:$0xff] }
 0x88b   :  { %1910 = vmatpush.msrb.mxu3 %v1876_v34  ;;  %1616 = vmatpush.msra.mxu0 %v1560_v24  ;;  %v1565_v61 = vld [vmem:[#allocation9 + $0x40] sm:$0xff]  ;;  %v1855_v22 = vld [vmem:[#allocation10 + $0x38] sm:$0xff] }
 0x88c   :  { %1597 = vrot.lane.b32.xlu1 %v4573_v25, %s3960_s21  ;;  %1629 = vmatpush.msrb.mxu1 %v1582_v52  ;;  %v1562_v52 = vld [vmem:[#allocation9 + $0x28] sm:$0xff]  ;;  %v1678_v34 = vld [vmem:[#allocation13 + $0x80] sm:$0xff]  ;;  %v1875_v24 = vld [vmem:[#allocation10 + $0xd8] sm:$0xff] }
 0x88d   :  { %1652 = vmatpush.msrb.mxu2 %v1574_v13  ;;  %1911 = vmatpush.msrb.mxu3 %v1873_v29  ;;  %v1675_v13 = vld [vmem:[#allocation13 + $0x68] sm:$0xff]  ;;  %v1872_v29 = vld [vmem:[#allocation10 + $0xc0] sm:$0xff] }
 0x88e   :  { %1630 = vmatpush.msrb.mxu1 %v1579_v9  ;;  %1617 = vmatpush.msra.mxu0 %v1557_v30  ;;  %v1684_v9 = vld [vmem:[#allocation13 + $0xb0] sm:$0xff]  ;;  %v1849_v30 = vld [vmem:[#allocation10 + $0x8] sm:$0xff] }
 0x88f   :  { %1653 = vmatpush.msrb.mxu2 %v1571_v35  ;;  %1912 = vmatpush.msrb.mxu3 %v1870_v38  ;;  %v1866_v35 = vld [vmem:[#allocation10 + $0x90] sm:$0xff]  ;;  %v1860_v38 = vld [vmem:[#allocation10 + $0x60] sm:$0xff] }
 0x890   :  { %1631 = vmatpush.msrb.mxu1 %v1576_v20  ;;  %1729 = vmatpush.msrb.mxu0 %v1696_v62  ;;  %v1878_v20 = vld [vmem:[#allocation10 + $0xf0] sm:$0xff]  ;;  %v1666_v62 = vld [vmem:[#allocation13 + $0x20] sm:$0xff] }
 0x891   :  { %1654 = vmatpush.msrb.mxu2 %v1568_v5  ;;  %1913 = vmatpush.msrb.mxu3 %v1867_v42 }
 0x892   :  { %1632 = vmatpush.msrb.mxu1 %v1573_v10  ;;  %1730 = vmatpush.msrb.mxu0 %v1693_v36  ;;  %v1852_v10 = vld [vmem:[#allocation10 + $0x20] sm:$0xff] }
 0x893   :  { %1655 = vmatpush.msrb.mxu2 %v1565_v61  ;;  %1914 = vmatpush.msrb.mxu3 %v1864_v48  ;;  %v1874_v61 = vld [vmem:[#allocation10 + $0xd0] sm:$0xff]  ;;  %v1868_v48 = vld [vmem:[#allocation10 + $0xa0] sm:$0xff] }
 0x894   :  { %1633 = vmatpush.msrb.mxu1 %v1570_v57  ;;  %1731 = vmatpush.msrb.mxu0 %v1690_v45  ;;  %v1869_v57 = vld [vmem:[#allocation10 + $0xa8] sm:$0xff]  ;;  %v1871_v45 = vld [vmem:[#allocation10 + $0xb8] sm:$0xff] }
 0x895   :  { %1656 = vmatpush.msrb.mxu2 %v1562_v52  ;;  %1915 = vmatpush.msrb.mxu3 %v1861_v58  ;;  %v1862_v52 = vld [vmem:[#allocation10 + $0x70] sm:$0xff]  ;;  %v1856_v58 = vld [vmem:[#allocation10 + $0x40] sm:$0xff] }
 0x896   :  { %1634 = vmatpush.msrb.mxu1 %v1567_v41  ;;  %1732 = vmatpush.msrb.mxu0 %v1687_v59  ;;  %v1857_v41 = vld [vmem:[#allocation10 + $0x48] sm:$0xff]  ;;  %v1859_v59 = vld [vmem:[#allocation10 + $0x58] sm:$0xff] }
 0x897   :  { %1657 = vmatpush.msrb.mxu2 %v1559_v0  ;;  %1916 = vmatpush.msrb.mxu3 %v1858_v17  ;;  %v1850_v0 = vld [vmem:[#allocation10 + $0x10] sm:$0xff]  ;;  %v2152_v17 = vld [vmem:[#allocation12 + $0xd8] sm:$0xff] }
 0x898   :  { %1635 = vmatpush.msrb.mxu1 %v1564_v39  ;;  %1733 = vmatpush.msrb.mxu0 %v1684_v9  ;;  %v2158_v9 = vld [vmem:[#allocation12 + $0x108] sm:$0xff] }
 0x899   :  { %1888 = vmatpush.msra.mxu2 %v1881_v14  ;;  %1917 = vmatpush.msrb.mxu3 %v1855_v22  ;;  %v2155_v14 = vld [vmem:[#allocation12 + $0xf0] sm:$0xff] }
 0x89a   :  { %1636 = vmatpush.msrb.mxu1 %v1561_v55  ;;  %1734 = vmatpush.msrb.mxu0 %v1681_v32  ;;  %v1865_v55 = vld [vmem:[#allocation10 + $0x88] sm:$0xff]  ;;  %v2149_v32 = vld [vmem:[#allocation12 + $0xc0] sm:$0xff]  ;;  %v2143_v22 = vld [vmem:[#allocation12 + $0x90] sm:$0xff] }
 0x89b   :  { %1889 = vmatpush.msra.mxu2 %v1878_v20  ;;  %1918 = vmatpush.msrb.mxu3 %v1852_v10  ;;  %v2146_v20 = vld [vmem:[#allocation12 + $0xa8] sm:$0xff] }
 0x89c   :  { %1637 = vmatpush.msrb.mxu1 %v1558_v33  ;;  %1735 = vmatpush.msrb.mxu0 %v1678_v34  ;;  %v1853_v33 = vld [vmem:[#allocation10 + $0x28] sm:$0xff]  ;;  %v2140_v34 = vld [vmem:[#allocation12 + $0x78] sm:$0xff] }
 0x89d   :  { %1890 = vmatpush.msra.mxu2 %v1875_v24  ;;  %1919 = vmatpush.msrb.mxu3 %v1849_v30  ;;  %v2137_v24 = vld [vmem:[#allocation12 + $0x60] sm:$0xff]  ;;  %v2134_v10 = vld [vmem:[#allocation12 + $0x48] sm:$0xff] }
 0x89e   :  { %1749 = vmatpush.msra.mxu1 %v4426_v26  ;;  %v1672_v26 = vld [vmem:[#allocation13 + $0x50] sm:$0xff]  ;;  %1736 = vmatpush.msrb.mxu0 %v1675_v13 }
 0x89f   :  { %1891 = vmatpush.msra.mxu2 %v1872_v29  ;;  %v2131_v13 = vld [vmem:[#allocation12 + $0x30] sm:$0xff]  ;;  %v2128_v29 = vld [vmem:[#allocation12 + $0x18] sm:$0xff] }
 0x8a0   :  { %1750 = vmatpush.msra.mxu1 %v4428_v44  ;;  %v1669_v44 = vld [vmem:[#allocation13 + $0x38] sm:$0xff]  ;;  %1737 = vmatpush.msrb.mxu0 %v1672_v26 }
 0x8a1   :  { %1892 = vmatpush.msra.mxu2 %v1869_v57 }
 0x8a2   :  { %1751 = vmatpush.msra.mxu1 %v4431_v4  ;;  %1738 = vmatpush.msrb.mxu0 %v1669_v44  ;;  %v1863_v4 = vld [vmem:[#allocation10 + $0x78] sm:$0xff] }
 0x8a3   :  { %1893 = vmatpush.msra.mxu2 %v1866_v35 }
 0x8a4   :  { %1752 = vmatpush.msra.mxu1 %v4434_v7  ;;  %1739 = vmatpush.msrb.mxu0 %v1666_v62  ;;  %v1663_v7 = vld [vmem:[#allocation13 + $0x8] sm:$0xff] }
 0x8a5   :  { %1894 = vmatpush.msra.mxu2 %v1863_v4 }
 0x8a6   :  { %1753 = vmatpush.msra.mxu1 %v4437_v63  ;;  %1740 = vmatpush.msrb.mxu0 %v1663_v7  ;;  %v1854_v63 = vld [vmem:[#allocation10 + $0x30] sm:$0xff] }
 0x8a7   :  { %1895 = vmatpush.msra.mxu2 %v1860_v38 }
 0x8a8   :  { %1754 = vmatpush.msra.mxu1 %v4440_v46  ;;  %v1851_v46 = vld [vmem:[#allocation10 + $0x18] sm:$0xff] }
 0x8a9   :  { %1896 = vmatpush.msra.mxu2 %v1857_v41 }
 0x8aa   :  { %1755 = vmatpush.msra.mxu1 %v4449_v19  ;;  %v1848_v19 = vld [vmem:[#allocation10] sm:$0xff] }
 0x8ab   :  { %1897 = vmatpush.msra.mxu2 %v1854_v63 }
 0x8ac   :  { %1756 = vmatpush.msra.mxu1 %v4452_v37 }
 0x8ad   :  { %1898 = vmatpush.msra.mxu2 %v1851_v46 }
 0x8ae   :  { %1757 = vmatpush.msra.mxu1 %v4455_v28 }
 0x8af   :  { %1899 = vmatpush.msra.mxu2 %v1848_v19 }
 0x8b0   :  { %1758 = vmatpush.msra.mxu1 %v4458_v40  ;;  %v1883_v40 = vld [vmem:[#allocation10 + $0x118] sm:$0xff] }
 0x8b2   :  { %1759 = vmatpush.msra.mxu1 %v4463_v50  ;;  %v1880_v50 = vld [vmem:[#allocation10 + $0x100] sm:$0xff] }
 0x8b4   :  { %1760 = vmatpush.msra.mxu1 %v4468_v21  ;;  %v1877_v21 = vld [vmem:[#allocation10 + $0xe8] sm:$0xff] }
 0x8d4   :  { %v1699_v36 = vpop.permute.xlu2 %1698 }
 0x8e4   :  { %v1596_v5 = vpop.permute.xlu0 %1595 }
 0x8ed   :  { %v1701_v37 = vpop.permute.xlu0 %1700 }
 0x8ee   :  { %v1702_v42 = vsel %vm563_vm0, %v1699_v36, %v1701_v37 }
 0x8ef   :  { %3489 = vmatmul.msk.f32.vlgmr.msra.gmra.mxu3 %vm380_vm15, %v1702_v42 }
 0x8f7   :  { %3495 = vmatmul.msk.f32.vlgmr.msrb.gmra.mxu3 %vm380_vm15, %v4487_v53 }
 0x8fe   :  { %v1598_v28 = vpop.permute.xlu1 %1597 }
 0x8ff   :  { %v4594_v39 = vsel %vm563_vm0, %v1596_v5, %v1598_v28 }
 0x900   :  { %3486 = vmatmul.msk.f32.vlgmr.msra.gmra.mxu0 %vm380_vm15, %v4594_v39  ;;  %3487 = vmatmul.msk.f32.vlgmr.msrb.gmra.mxu1 %vm380_vm15, %v4594_v39 }
 0x901   :  { %3488 = vmatmul.msk.f32.vlgmr.msrb.gmra.mxu2 %vm380_vm15, %v4594_v39  ;;  %1928 = vmatpush.msra.mxu0 %v1883_v40 }
 0x903   :  { %1929 = vmatpush.msra.mxu0 %v1880_v50 }
 0x905   :  { %1930 = vmatpush.msra.mxu0 %v1877_v21 }
 0x907   :  { %1931 = vmatpush.msra.mxu0 %v1874_v61 }
 0x908   :  { %3490 = vmatmul.msk.f32.vlgmr.msrb.gmra.mxu0 %vm380_vm15, %v1702_v42  ;;  %3491 = vmatmul.msk.f32.vlgmr.msra.gmra.mxu1 %vm380_vm15, %v1702_v42 }
 0x909   :  { %3494 = vmatmul.msk.f32.vlgmr.msra.gmra.mxu2 %vm380_vm15, %v4487_v53  ;;  %1932 = vmatpush.msra.mxu0 %v1871_v45 }
 0x90b   :  { %1933 = vmatpush.msra.mxu0 %v1868_v48 }
 0x90d   :  { %1934 = vmatpush.msra.mxu0 %v1865_v55 }
 0x90f   :  { %1935 = vmatpush.msra.mxu0 %v1862_v52 }
 0x911   :  { %1936 = vmatpush.msra.mxu0 %v1859_v59 }
 0x913   :  { %1937 = vmatpush.msra.mxu0 %v1856_v58  ;;  %v2002_v58 = vpop.permute.xlu2 %2001 }
 0x915   :  { %1938 = vmatpush.msra.mxu0 %v1853_v33 }
 0x917   :  { %1939 = vmatpush.msra.mxu0 %v1850_v0 }
 0x918   :  { %3496 = vmatmul.msk.f32.vlgmr.msra.gmra.mxu0 %vm380_vm15, %v4487_v53  ;;  %v2125_v53 = vld [vmem:[#allocation12] sm:$0xff] }
 0x919   :  { %2165 = vmatpush.msrb.mxu0 %v2158_v9 }
 0x91b   :  { %2166 = vmatpush.msrb.mxu0 %v2155_v14  ;;  %v2003_v14 = vrot.slane %v2002_v58, 1 }
 0x91d   :  { %2167 = vmatpush.msrb.mxu0 %v2152_v17  ;;  %v2004_v17 = vrot.slane %v2002_v58, 2 }
 0x91f   :  { %2168 = vmatpush.msrb.mxu0 %v2149_v32 }
 0x921   :  { %2169 = vmatpush.msrb.mxu0 %v2146_v20 }
 0x923   :  { %2170 = vmatpush.msrb.mxu0 %v2143_v22 }
 0x925   :  { %2171 = vmatpush.msrb.mxu0 %v2140_v34 }
 0x927   :  { %2172 = vmatpush.msrb.mxu0 %v2137_v24 }
 0x929   :  { %2173 = vmatpush.msrb.mxu0 %v2134_v10  ;;  %v2005_v10 = vsel %vm497_vm9, %v2003_v14, %v2004_v17 }
 0x92b   :  { %2174 = vmatpush.msrb.mxu0 %v2131_v13 }
 0x92d   :  { %2175 = vmatpush.msrb.mxu0 %v2128_v29 }
 0x92f   :  { %2176 = vmatpush.msrb.mxu0 %v2125_v53 }
 0x930   :  { %3502 = vmatmul.msk.f32.vlgmr.msrb.gmra.mxu0 %vm380_vm15, %v4594_v39 }
 0x972   :  { %v1722_v30 = vpop.f32.mrf.mxu3 }
 0x973   :  { %v1723_v57 = vadd.f32 %v1722_v30, %v4402_v2 }
 0x97a   :  { %v1921_v4 = vpop.f32.mrf.mxu3 }
 0x97b   :  { %v1922_v7 = vadd.f32 %v1921_v4, %v4210_v11 }
 0x97d   :  { %v1619_v26 = vpop.f32.mrf.mxu0  ;;  %v1968_v41 = vrot.slane %v1922_v7, 7 }
 0x97e   :  { %v1620_v44 = vadd.f32 %v1619_v26, %v4405_v6 }
 0x980   :  { %v4612_v35 = vadd.f32 %v1723_v57, %v1620_v44 }
 0x984   :  { %v4614_v62 = vpop.f32.mrf.mxu2 }
 0x985   :  { %v4617_v63 = vpop.f32.mrf.mxu0 }
 0x98c   :  { %v1901_v38 = vpop.f32.mrf.mxu2 }
 0x98d   :  { %v1902_v5 = vadd.f32 %v1901_v38, %v4212_v12  ;;  %v2052_v38 = vld [vmem:[#allocation7 + $0x108] sm:$0xff] }
 0x98e   :  { %2069 = vmatpush.msrb.mxu1 %v2052_v38  ;;  %v2045_v38 = vld [vmem:[#allocation7 + $0xd0] sm:$0xff] }
 0x98f   :  { %v1969_v46 = vsel %vm468_vm5, %v1902_v5, %v1968_v41  ;;  %v1946_v28 = vadd.f32 %v4567_v8, %v1902_v5  ;;  %v2053_v41 = vld [vmem:[#allocation7 + $0x110] sm:$0xff] }
 0x990   :  { %v1971_v53 = vadd.f32 %v1969_v46, %v4567_v8  ;;  %v2049_v5 = vld [vmem:[#allocation7 + $0xf0] sm:$0xff]  ;;  %2089 = vmatpush.msrb.mxu2 %v2053_v41  ;;  %v2043_v8 = vld [vmem:[#allocation7 + $0xc0] sm:$0xff]  ;;  %v2044_v46 = vld [vmem:[#allocation7 + $0xc8] sm:$0xff] }
 0x991   :  { %v3497_v40 = vmul.f32 -1.442695, %v1946_v28  ;;  %2070 = vmatpush.msrb.mxu1 %v2049_v5  ;;  %v2019_v41 = vld [vmem:[#allocation7] sm:$0xff]  ;;  %v2020_v5 = vld [vmem:[#allocation7 + $0x8] sm:$0xff] }
 0x992   :  { %v3498_v30 = vmul.f32 -1.442695, %v1971_v53  ;;  %v2028_v53 = vld [vmem:[#allocation7 + $0x48] sm:$0xff] }
 0x993   :  { %3614 = vpow2.f32 %v3497_v40  ;;  %v2040_v40 = vld [vmem:[#allocation7 + $0xa8] sm:$0xff] }
 0x995   :  { %v1941_v19 = vpop.f32.mrf.mxu0 }
 0x996   :  { %v1942_v36 = vadd.f32 %v1941_v19, %v4216_v18  ;;  %v2050_v19 = vld [vmem:[#allocation7 + $0xf8] sm:$0xff] }
 0x997   :  { %2090 = vmatpush.msrb.mxu2 %v2050_v19  ;;  %v2042_v19 = vld [vmem:[#allocation7 + $0xb8] sm:$0xff] }
 0x998   :  { %v1992_v37 = vrot.slane %v1942_v36, 7 }
 0x999   :  { %v3615_v50 = vpop.eup %3614 }
 0x99a   :  { %v1993_v42 = vsel %vm468_vm5, %v1922_v7, %v1992_v37  ;;  %v1950_v21 = vadd.f32 1.0, %v3615_v50  ;;  %v2046_v37 = vld [vmem:[#allocation7 + $0xd8] sm:$0xff]  ;;  %v2041_v50 = vld [vmem:[#allocation7 + $0xb0] sm:$0xff] }
 0x99b   :  { %1994 = vrot.lane.b32.xlu1 %v1993_v42, %s3958_s13  ;;  %v2047_v42 = vld [vmem:[#allocation7 + $0xe0] sm:$0xff]  ;;  %2071 = vmatpush.msrb.mxu1 %v2046_v37  ;;  %v2160_v37 = vld [vmem:[#allocation12 + $0x118] sm:$0xff] }
 0x99c   :  { %3616 = vrcp.f32 %v1950_v21  ;;  %v1962_v59 = vand.u32 2147483648, %v1950_v21  ;;  %vm1956_vm12 = vweird.f32 %v1950_v21  ;;  %v1960_v33 = vand.u32 2147483647, %v1950_v21  ;;  %2091 = vmatpush.msrb.mxu2 %v2047_v42  ;;  %v2039_v42 = vld [vmem:[#allocation7 + $0xa0] sm:$0xff] }
 0x99d   :  { %2072 = vmatpush.msrb.mxu1 %v2043_v8  ;;  %v2156_v8 = vld [vmem:[#allocation12 + $0xf8] sm:$0xff] }
 0x99e   :  { %v1963_v32 = vor.u32 1.1754944e-38, %v1962_v59  ;;  %vm1961_vm14 = vcmp.eq.f32.partialorder %v1960_v33, 8.507059e+37  ;;  %2092 = vmatpush.msrb.mxu2 %v2044_v46  ;;  %v2035_v59 = vld [vmem:[#allocation7 + $0x80] sm:$0xff] }
 0x99f   :  { %2073 = vmatpush.msrb.mxu1 %v2040_v40  ;;  %v2157_v46 = vld [vmem:[#allocation12 + $0x100] sm:$0xff]  ;;  %v2036_v40 = vld [vmem:[#allocation7 + $0x88] sm:$0xff] }
 0x9a0   :  { %2093 = vmatpush.msrb.mxu2 %v2041_v50  ;;  %v2154_v50 = vld [vmem:[#allocation12 + $0xe8] sm:$0xff] }
 0x9a2   :  { %v3617_v61 = vpop.eup %3616 }
 0x9a3   :  { %v1952_v45 = vmul.f32 %v3617_v61, %v1950_v21  ;;  %vm1957_vm11 = vweird.f32 %v3617_v61 }
 0x9a4   :  { %vm1958_vm13 = vmor %vm1956_vm12, %vm1957_vm11 }
 0x9a5   :  { %v1953_v48 = vsub.f32 1.0, %v1952_v45  ;;  %v2037_v45 = vld [vmem:[#allocation7 + $0x90] sm:$0xff] }
 0x9a6   :  { %2074 = vmatpush.msrb.mxu1 %v2037_v45  ;;  %v2151_v45 = vld [vmem:[#allocation12 + $0xd0] sm:$0xff] }
 0x9a7   :  { %v1954_v55 = vmul.f32 %v3617_v61, %v1953_v48  ;;  %v2038_v48 = vld [vmem:[#allocation7 + $0x98] sm:$0xff] }
 0x9a8   :  { %2094 = vmatpush.msrb.mxu2 %v2038_v48  ;;  %v2147_v48 = vld [vmem:[#allocation12 + $0xb0] sm:$0xff] }
 0x9a9   :  { %v1955_v52 = vadd.f32 %v3617_v61, %v1954_v55 }
 0x9aa   :  { %2095 = vmatpush.msrb.mxu2 %v2035_v59  ;;  %v2144_v59 = vld [vmem:[#allocation12 + $0x98] sm:$0xff] }
 0x9ab   :  { %v1959_v0 = vsel %vm1958_vm13, %v3617_v61, %v1955_v52  ;;  %v2034_v52 = vld [vmem:[#allocation7 + $0x78] sm:$0xff] }
 0x9ac   :  { %v1964_v22 = vsel %vm1961_vm14, %v1963_v32, %v1959_v0  ;;  %2075 = vmatpush.msrb.mxu1 %v2034_v52  ;;  %v2148_v52 = vld [vmem:[#allocation12 + $0xb8] sm:$0xff] }
 0xa0d   :  { %v1995_v9 = vpop.permute.xlu1 %1994 }
 0xa0e   :  { %v1996_v20 = vrot.slane %v1995_v9, 1 }
 0xa10   :  { %v1997_v34 = vsel %vm497_vm9, %v1995_v9, %v1996_v20 }
 0xa11   :  { %v1999_v24 = vmul.f32 %v1997_v34, %v1964_v22 }
 0xa13   :  { %v2007_v13 = vadd.f32 %v2005_v10, %v1999_v24  ;;  %v4639_v10 = vadd.f32 %v4617_v63, %v4477_v15  ;;  %v2022_v63 = vld [vmem:[#allocation7 + $0x18] sm:$0xff] }
 0xa15   :  { %3618 = vtanh.f32 %v2007_v13  ;;  %v2031_v13 = vld [vmem:[#allocation7 + $0x60] sm:$0xff] }
 0xa16   :  { %3620 = vpow2.f32 %v3498_v30  ;;  %2076 = vmatpush.msrb.mxu1 %v2031_v13  ;;  %v2029_v30 = vld [vmem:[#allocation7 + $0x50] sm:$0xff]  ;;  %v2132_v13 = vld [vmem:[#allocation12 + $0x38] sm:$0xff] }
 0xa18   :  { %2077 = vmatpush.msrb.mxu1 %v2028_v53  ;;  %v2130_v53 = vld [vmem:[#allocation12 + $0x28] sm:$0xff] }
 0xa1b   :  { %v3619_v29 = vpop.eup %3618 }
 0xa1c   :  { %2011 = vrot.lane.b32.xlu0 %v3619_v29, %s3959_s17  ;;  %v3621_v26 = vpop.eup %3620  ;;  %v2054_v29 = vld [vmem:[#allocation7 + $0x118] sm:$0xff] }
 0xa1d   :  { %v1975_v57 = vadd.f32 1.0, %v3621_v26  ;;  %v2051_v26 = vld [vmem:[#allocation7 + $0x100] sm:$0xff]  ;;  %2109 = vmatpush.msra.mxu3 %v2054_v29 }
 0xa1e   :  { %v2129_v29 = vld [vmem:[#allocation12 + $0x20] sm:$0xff] }
 0xa1f   :  { %3622 = vrcp.f32 %v1975_v57  ;;  %v1987_v21 = vand.u32 2147483648, %v1975_v57  ;;  %vm1981_vm2 = vweird.f32 %v1975_v57  ;;  %v1985_v61 = vand.u32 2147483647, %v1975_v57  ;;  %2110 = vmatpush.msra.mxu3 %v2051_v26  ;;  %v2127_v26 = vld [vmem:[#allocation12 + $0x10] sm:$0xff] }
 0xa21   :  { %v1988_v58 = vor.u32 1.1754944e-38, %v1987_v21  ;;  %vm1986_vm4 = vcmp.eq.f32.partialorder %v1985_v61, 8.507059e+37  ;;  %v2150_v21 = vld [vmem:[#allocation12 + $0xc8] sm:$0xff]  ;;  %v2033_v61 = vld [vmem:[#allocation7 + $0x70] sm:$0xff] }
 0xa25   :  { %v3623_v44 = vpop.eup %3622 }
 0xa26   :  { %v1977_v4 = vmul.f32 %v3623_v44, %v1975_v57  ;;  %vm1982_vm1 = vweird.f32 %v3623_v44  ;;  %v2025_v57 = vld [vmem:[#allocation7 + $0x30] sm:$0xff] }
 0xa27   :  { %vm1983_vm3 = vmor %vm1981_vm2, %vm1982_vm1  ;;  %2078 = vmatpush.msrb.mxu1 %v2025_v57 }
 0xa28   :  { %v1978_v7 = vsub.f32 1.0, %v1977_v4  ;;  %v2048_v4 = vld [vmem:[#allocation7 + $0xe8] sm:$0xff] }
 0xa29   :  { %2111 = vmatpush.msra.mxu3 %v2048_v4  ;;  %2079 = vmatpush.msrb.mxu1 %v2022_v63  ;;  %v4656_v63 = vpop.f32.mrf.mxu1 }
 0xa2a   :  { %v1979_v36 = vmul.f32 %v3623_v44, %v1978_v7  ;;  %v2023_v7 = vld [vmem:[#allocation7 + $0x20] sm:$0xff] }
 0xa2b   :  { %2112 = vmatpush.msra.mxu3 %v2045_v38  ;;  %2080 = vmatpush.msrb.mxu1 %v2019_v41 }
 0xa2c   :  { %v1980_v28 = vadd.f32 %v3623_v44, %v1979_v36  ;;  %v2159_v36 = vld [vmem:[#allocation12 + $0x110] sm:$0xff] }
 0xa2d   :  { %2185 = vmatpush.msra.mxu1 %v2159_v36  ;;  %2113 = vmatpush.msra.mxu3 %v2042_v19 }
 0xa2e   :  { %v1984_v55 = vsel %vm1983_vm3, %v3623_v44, %v1980_v28  ;;  %v2026_v44 = vld [vmem:[#allocation7 + $0x38] sm:$0xff]  ;;  %v2153_v28 = vld [vmem:[#allocation12 + $0xe0] sm:$0xff] }
 0xa2f   :  { %v1989_v33 = vsel %vm1986_vm4, %v1988_v58, %v1984_v55  ;;  %2186 = vmatpush.msra.mxu1 %v2156_v8  ;;  %2114 = vmatpush.msra.mxu3 %v2039_v42  ;;  %v2030_v55 = vld [vmem:[#allocation7 + $0x58] sm:$0xff]  ;;  %v2027_v58 = vld [vmem:[#allocation7 + $0x40] sm:$0xff] }
 0xa30   :  { %v2009_v14 = vsub.f32 1.0, %v1989_v33  ;;  %v2017_v32 = vmul.f32 %v1989_v33, %v4466_v16  ;;  %v2032_v16 = vld [vmem:[#allocation7 + $0x68] sm:$0xff]  ;;  %v2145_v33 = vld [vmem:[#allocation12 + $0xa0] sm:$0xff] }
 0xa31   :  { %2096 = vmatpush.msrb.mxu2 %v2032_v16  ;;  %2187 = vmatpush.msra.mxu1 %v2153_v28  ;;  %v2133_v16 = vld [vmem:[#allocation12 + $0x40] sm:$0xff] }
 0xa32   :  { %2115 = vmatpush.msra.mxu3 %v2036_v40 }
 0xa33   :  { %2097 = vmatpush.msrb.mxu2 %v2029_v30  ;;  %2188 = vmatpush.msra.mxu1 %v2150_v21  ;;  %v2126_v30 = vld [vmem:[#allocation12 + $0x8] sm:$0xff] }
 0xa34   :  { %2116 = vmatpush.msra.mxu3 %v2033_v61 }
 0xa35   :  { %2098 = vmatpush.msrb.mxu2 %v2026_v44  ;;  %2189 = vmatpush.msra.mxu1 %v2147_v48 }
 0xa36   :  { %2117 = vmatpush.msra.mxu3 %v2030_v55 }
 0xa37   :  { %2099 = vmatpush.msrb.mxu2 %v2023_v7  ;;  %2190 = vmatpush.msra.mxu1 %v2144_v59  ;;  %v1762_v7 = vpop.f32.mrf.mxu1 }
 0xa38   :  { %2118 = vmatpush.msra.mxu3 %v2027_v58  ;;  %v1763_v42 = vadd.f32 %v1762_v7, %v4511_v27 }
 0xa39   :  { %2100 = vmatpush.msrb.mxu2 %v2020_v5 }
 0xa3b   :  { %2205 = vmatpush.msra.mxu2 %v2160_v37 }
 0xa3d   :  { %2206 = vmatpush.msra.mxu2 %v2157_v46 }
 0xa3f   :  { %2207 = vmatpush.msra.mxu2 %v2154_v50  ;;  %v3492_v50 = vmul.f32 -1.442695, %v4612_v35 }
 0xa41   :  { %2208 = vmatpush.msra.mxu2 %v2151_v45 }
 0xa43   :  { %2209 = vmatpush.msra.mxu2 %v2148_v52 }
 0xa45   :  { %2210 = vmatpush.msra.mxu2 %v2145_v33 }
 0xa8e   :  { %v2012_v0 = vpop.permute.xlu0 %2011 }
 0xa8f   :  { %v2013_v9 = vrot.slane %v2012_v0, 7 }
 0xa91   :  { %v2014_v17 = vsel %vm380_vm15, %v2013_v9, %v2012_v0  ;;  %v2141_v0 = vld [vmem:[#allocation12 + $0x80] sm:$0xff]  ;;  %v2024_v9 = vld [vmem:[#allocation7 + $0x28] sm:$0xff] }
 0xa92   :  { %v2016_v20 = vmul.f32 %v2014_v17, %v2009_v14  ;;  %v2142_v14 = vld [vmem:[#allocation12 + $0x88] sm:$0xff]  ;;  %2191 = vmatpush.msra.mxu1 %v2141_v0  ;;  %2119 = vmatpush.msra.mxu3 %v2024_v9  ;;  %v2021_v17 = vld [vmem:[#allocation7 + $0x10] sm:$0xff] }
 0xa93   :  { %2211 = vmatpush.msra.mxu2 %v2142_v14 }
 0xa94   :  { %v4631_v22 = vadd.f32 %v2017_v32, %v2016_v20  ;;  %v2138_v32 = vld [vmem:[#allocation12 + $0x68] sm:$0xff]  ;;  %v2139_v20 = vld [vmem:[#allocation12 + $0x70] sm:$0xff]  ;;  %2120 = vmatpush.msra.mxu3 %v2021_v17 }
 0xa95   :  { %2192 = vmatpush.msra.mxu1 %v2138_v32  ;;  %2212 = vmatpush.msra.mxu2 %v2139_v20 }
 0xa96   :  { %v2057_v34 = vperm.slane %v4631_v22, 1  ;;  %v2056_v24 = vperm.slane %v4631_v22, 0 }
 0xa98   :  { %2060 = vrot.lane.b32.xlu2 %v2057_v34, %s3960_s21  ;;  %2058 = vrot.lane.b32.xlu1 %v2056_v24, %s3960_s21  ;;  %v2135_v34 = vld [vmem:[#allocation12 + $0x50] sm:$0xff]  ;;  %v2136_v24 = vld [vmem:[#allocation12 + $0x58] sm:$0xff] }
 0xa99   :  { %2193 = vmatpush.msra.mxu1 %v2135_v34  ;;  %2213 = vmatpush.msra.mxu2 %v2136_v24 }
 0xa9b   :  { %2194 = vmatpush.msra.mxu1 %v2132_v13  ;;  %2214 = vmatpush.msra.mxu2 %v2133_v16 }
 0xa9d   :  { %2195 = vmatpush.msra.mxu1 %v2129_v29  ;;  %2215 = vmatpush.msra.mxu2 %v2130_v53 }
 0xa9f   :  { %2196 = vmatpush.msra.mxu1 %v2126_v30  ;;  %2216 = vmatpush.msra.mxu2 %v2127_v26 }
 0xaa0   :  { %1807 = vrot.lane.b32.xlu2 %v4639_v10, %s3958_s13 }
 0xaf2   :  { %v2061_v57 = vpop.permute.xlu2 %2060 }
 0xafa   :  { %v1808_v7 = vpop.permute.xlu2 %1807 }
 0xb0a   :  { %v2059_v44 = vpop.permute.xlu1 %2058 }
 0xb0b   :  { %v4644_v4 = vsel %vm563_vm0, %v2059_v44, %v2061_v57 }
 0xb0c   :  { %3499 = vmatmul.msk.f32.vlgmr.msrb.gmra.mxu1 %vm380_vm15, %v4644_v4  ;;  %3500 = vmatmul.msk.f32.vlgmr.msrb.gmra.mxu2 %vm380_vm15, %v4644_v4 }
 0xb0d   :  { %3501 = vmatmul.msk.f32.vlgmr.msra.gmra.mxu3 %vm380_vm15, %v4644_v4 }
 0xb14   :  { %3503 = vmatmul.msk.f32.vlgmr.msra.gmra.mxu1 %vm380_vm15, %v4594_v39  ;;  %3504 = vmatmul.msk.f32.vlgmr.msra.gmra.mxu2 %vm380_vm15, %v4594_v39  ;;  %v2178_v39 = vpop.f32.mrf.mxu0 }
 0xb15   :  { %v2179_v46 = vadd.f32 %v2178_v39, %v4312_v56  ;;  %v1640_v39 = vadd.f32 %v4656_v63, %v4526_v60  ;;  %v1660_v63 = vadd.f32 %v4614_v62, %v4535_v23 }
 0xb17   :  { %v1785_v62 = vadd.f32 %v4639_v10, %v1640_v39 }
 0xb89   :  { %v2082_v38 = vpop.f32.mrf.mxu1 }
 0xb8a   :  { %v2083_v8 = vadd.f32 %v2082_v38, %v4310_v54 }
 0xb8c   :  { %v2221_v28 = vadd.f32 %v2179_v46, %v2083_v8 }
 0xb8e   :  { %v3505_v40 = vmul.f32 -1.442695, %v2221_v28 }
 0xb8f   :  { %v4658_v41 = vpop.f32.mrf.mxu2 }
 0xb90   :  { %3624 = vpow2.f32 %v3505_v40  ;;  %v2122_v40 = vpop.f32.mrf.mxu3 }
 0xb91   :  { %v2198_v5 = vpop.f32.mrf.mxu1  ;;  %3626 = vpow2.f32 %v3492_v50  ;;  %v2103_v50 = vadd.f32 %v4658_v41, %v4318_v1 }
 0xb92   :  { %v4661_v19 = vadd.f32 %v2198_v5, %v4303_v43 }
 0xb94   :  { %2263 = vrot.lane.b32.xlu0 %v4661_v19, %s3958_s13  ;;  %v2241_v41 = vadd.f32 %v4661_v19, %v2103_v50 }
 0xb96   :  { %v3625_v21 = vpop.eup %3624 }
 0xb97   :  { %v2218_v36 = vpop.f32.mrf.mxu2  ;;  %v3627_v61 = vpop.eup %3626  ;;  %v2225_v45 = vadd.f32 1.0, %v3625_v21  ;;  %v2123_v21 = vadd.f32 %v2122_v40, %v4320_v3 }
 0xb98   :  { %v2219_v37 = vadd.f32 %v2218_v36, %v4299_v31  ;;  %v1769_v48 = vadd.f32 1.0, %v3627_v61 }
 0xb99   :  { %3628 = vrcp.f32 %v2225_v45  ;;  %v2237_v35 = vand.u32 2147483648, %v2225_v45  ;;  %vm2231_vm7 = vweird.f32 %v2225_v45  ;;  %v2235_v20 = vand.u32 2147483647, %v2225_v45 }
 0xb9a   :  { %2265 = vrot.lane.b32.xlu1 %v2219_v37, %s3958_s13  ;;  %3630 = vrcp.f32 %v1769_v48  ;;  %v1781_v24 = vand.u32 2147483648, %v1769_v48  ;;  %vm1775_vm11 = vweird.f32 %v1769_v48  ;;  %v1779_v16 = vand.u32 2147483647, %v1769_v48 }
 0xb9b   :  { %v2238_v29 = vor.u32 1.1754944e-38, %v2237_v35  ;;  %vm2236_vm13 = vcmp.eq.f32.partialorder %v2235_v20, 8.507059e+37  ;;  %v3493_v35 = vmul.f32 -1.442695, %v1785_v62 }
 0xb9c   :  { %1809 = vrot.lane.b32.xlu0 %v1763_v42, %s3958_s13  ;;  %v1782_v44 = vor.u32 1.1754944e-38, %v1781_v24  ;;  %vm1780_vm14 = vcmp.eq.f32.partialorder %v1779_v16, 8.507059e+37  ;;  %v4697_v24 = vld [vmem:[#allocation3 + $0x3] ss:$4 sm:$0x7] }
 0xb9f   :  { %v3629_v55 = vpop.eup %3628 }
 0xba0   :  { %v3631_v52 = vpop.eup %3630  ;;  %v2227_v59 = vmul.f32 %v3629_v55, %v2225_v45  ;;  %vm2232_vm6 = vweird.f32 %v3629_v55 }
 0xba1   :  { %v1771_v58 = vmul.f32 %v3631_v52, %v1769_v48  ;;  %vm1776_vm8 = vweird.f32 %v3631_v52  ;;  %vm2233_vm10 = vmor %vm2231_vm7, %vm2232_vm6 }
 0xba2   :  { %v2228_v33 = vsub.f32 1.0, %v2227_v59  ;;  %vm1777_vm12 = vmor %vm1775_vm11, %vm1776_vm8 }
 0xba3   :  { %v1772_v0 = vsub.f32 1.0, %v1771_v58 }
 0xba4   :  { %v2229_v9 = vmul.f32 %v3629_v55, %v2228_v33  ;;  %v3506_v33 = vmul.f32 -1.442695, %v2241_v41 }
 0xba5   :  { %v1773_v14 = vmul.f32 %v3631_v52, %v1772_v0 }
 0xba6   :  { %v2230_v32 = vadd.f32 %v3629_v55, %v2229_v9 }
 0xba7   :  { %v1774_v34 = vadd.f32 %v3631_v52, %v1773_v14 }
 0xba8   :  { %v2234_v13 = vsel %vm2233_vm10, %v3629_v55, %v2230_v32 }
 0xba9   :  { %v1778_v30 = vsel %vm1777_vm12, %v3631_v52, %v1774_v34  ;;  %v4672_v26 = vsel %vm2236_vm13, %v2238_v29, %v2234_v13 }
 0xbaa   :  { %v1783_v36 = vsel %vm1780_vm14, %v1782_v44, %v1778_v30 }
 0xbab   :  { %v1822_v0 = vsub.f32 1.0, %v1783_v36  ;;  %v1835_v14 = vmul.f32 %v1783_v36, %v4556_v47 }
 0xc06   :  { %v2264_v17 = vpop.permute.xlu0 %2263 }
 0xc0c   :  { %v2266_v53 = vpop.permute.xlu1 %2265 }
 0xc0d   :  { %v2267_v57 = vsel %vm497_vm9, %v2264_v17, %v2266_v53 }
 0xc0e   :  { %v2269_v38 = vmul.f32 %v2267_v57, %v4672_v26  ;;  %v1810_v5 = vpop.permute.xlu0 %1809 }
 0xc0f   :  { %v1811_v37 = vsel %vm497_vm9, %v1808_v7, %v1810_v5 }
 0xc10   :  { %v1813_v42 = vmul.f32 %v1811_v37, %v1783_v36  ;;  %2271 = vrot.lane.b32.xlu1 %v2269_v38, %s3958_s13 }
 0xc12   :  { %1815 = vrot.lane.b32.xlu2 %v1813_v42, %s3958_s13 }
 0xc6c   :  { %v1816_v8 = vpop.permute.xlu2 %1815 }
 0xc6d   :  { %v1818_v46 = vadd.f32 %v1816_v8, %v1640_v39  ;;  %v1819_v55 = vadd.f32 %v1816_v8, %v1660_v63 }
 0xc6f   :  { %3632 = vtanh.f32 %v1818_v46  ;;  %v2278_v46 = vsub.f32 1.0, %v4672_v26 }
 0xc75   :  { %v3633_v28 = vpop.eup %3632 }
 0xc76   :  { %1826 = vrot.lane.b32.xlu2 %v3633_v28, %s3960_s21 }
 0xc82   :  { %v2272_v61 = vpop.permute.xlu1 %2271 }
 0xc83   :  { %v2274_v45 = vadd.f32 %v2272_v61, %v2103_v50  ;;  %v2275_v48 = vadd.f32 %v2272_v61, %v2123_v21 }
 0xc85   :  { %3634 = vtanh.f32 %v2274_v45  ;;  %v2291_v45 = vmul.f32 %v4672_v26, %v4548_v49 }
 0xc86   :  { %3636 = vtanh.f32 %v2275_v48 }
 0xc87   :  { %3638 = vtanh.f32 %v1819_v55 }
 0xc88   :  { %3640 = vpow2.f32 %v3506_v33 }
 0xc89   :  { %3642 = vpow2.f32 %v3493_v35 }
 0xc8b   :  { %v3635_v52 = vpop.eup %3634 }
 0xc8c   :  { %v3637_v59 = vpop.eup %3636  ;;  %2282 = vrot.lane.b32.xlu0 %v3635_v52, %s3960_s21 }
 0xc8d   :  { %2284 = vrot.lane.b32.xlu1 %v3637_v59, %s3960_s21  ;;  %v3639_v58 = vpop.eup %3638 }
 0xc8e   :  { %v3641_v20 = vpop.eup %3640 }
 0xc8f   :  { %v2245_v34 = vadd.f32 1.0, %v3641_v20  ;;  %v3643_v19 = vpop.eup %3642  ;;  %v2325_v20 = vld [vmem:[#allocation9 + $0xf0] sm:$0xff] }
 0xc90   :  { %v1789_v13 = vadd.f32 1.0, %v3643_v19  ;;  %v2319_v19 = vld [vmem:[#allocation9 + $0xc0] sm:$0xff] }
 0xc91   :  { %3644 = vrcp.f32 %v2245_v34  ;;  %v2257_v38 = vand.u32 2147483648, %v2245_v34  ;;  %vm2251_vm2 = vweird.f32 %v2245_v34  ;;  %v2255_v5 = vand.u32 2147483647, %v2245_v34 }
 0xc92   :  { %3646 = vrcp.f32 %v1789_v13  ;;  %v1801_v28 = vand.u32 2147483648, %v1789_v13  ;;  %vm1795_vm7 = vweird.f32 %v1789_v13  ;;  %v1799_v50 = vand.u32 2147483647, %v1789_v13 }
 0xc93   :  { %v2258_v42 = vor.u32 1.1754944e-38, %v2257_v38  ;;  %vm2256_vm4 = vcmp.eq.f32.partialorder %v2255_v5, 8.507059e+37  ;;  %v2321_v38 = vld [vmem:[#allocation9 + $0xd0] sm:$0xff]  ;;  %v2320_v5 = vld [vmem:[#allocation9 + $0xc8] sm:$0xff] }
 0xc94   :  { %1828 = vrot.lane.b32.xlu0 %v3639_v58, %s3960_s21  ;;  %v1802_v41 = vor.u32 1.1754944e-38, %v1801_v28  ;;  %vm1800_vm10 = vcmp.eq.f32.partialorder %v1799_v50, 8.507059e+37  ;;  %v2301_v28 = vld [vmem:[#allocation9 + $0x30] sm:$0xff]  ;;  %v2314_v50 = vld [vmem:[#allocation9 + $0x98] sm:$0xff] }
 0xc97   :  { %v3645_v16 = vpop.eup %3644 }
 0xc98   :  { %v2247_v10 = vmul.f32 %v3645_v16, %v2245_v34  ;;  %v3647_v29 = vpop.eup %3646  ;;  %vm2252_vm1 = vweird.f32 %v3645_v16  ;;  %v2322_v34 = vld [vmem:[#allocation9 + $0xd8] sm:$0xff] }
 0xc99   :  { %v1791_v30 = vmul.f32 %v3647_v29, %v1789_v13  ;;  %vm2253_vm3 = vmor %vm2251_vm2, %vm2252_vm1  ;;  %vm1796_vm6 = vweird.f32 %v3647_v29  ;;  %v2316_v13 = vld [vmem:[#allocation9 + $0xa8] sm:$0xff] }
 0xc9a   :  { %v2248_v53 = vsub.f32 1.0, %v2247_v10  ;;  %vm1797_vm8 = vmor %vm1795_vm7, %vm1796_vm6  ;;  %v2329_v10 = vld [vmem:[#allocation9 + $0x110] sm:$0xff] }
 0xc9b   :  { %v1792_v44 = vsub.f32 1.0, %v1791_v30  ;;  %2364 = vmatpush.msra.mxu0 %v2329_v10  ;;  %v2310_v30 = vld [vmem:[#allocation9 + $0x78] sm:$0xff]  ;;  %v2296_v10 = vld [vmem:[#allocation9 + $0x8] sm:$0xff] }
 0xc9c   :  { %v2249_v57 = vmul.f32 %v3645_v16, %v2248_v53  ;;  %v2326_v53 = vld [vmem:[#allocation9 + $0xf8] sm:$0xff] }
 0xc9d   :  { %v1793_v36 = vmul.f32 %v3647_v29, %v1792_v44  ;;  %v2323_v44 = vld [vmem:[#allocation9 + $0xe0] sm:$0xff]  ;;  %2365 = vmatpush.msra.mxu0 %v2326_v53  ;;  %v2619_v53 = vld [vmem:[#allocation10 + $0x108] sm:$0xff] }
 0xc9e   :  { %v2250_v7 = vadd.f32 %v3645_v16, %v2249_v57  ;;  %v2324_v57 = vld [vmem:[#allocation9 + $0xe8] sm:$0xff] }
 0xc9f   :  { %v1794_v8 = vadd.f32 %v3647_v29, %v1793_v36  ;;  %v2433_v36 = vld [vmem:[#allocation13 + $0x108] sm:$0xff]  ;;  %2366 = vmatpush.msra.mxu0 %v2323_v44  ;;  %v2419_v44 = vld [vmem:[#allocation13 + $0x98] sm:$0xff] }
 0xca0   :  { %v2254_v37 = vsel %vm2253_vm3, %v3645_v16, %v2250_v7  ;;  %v2330_v16 = vld [vmem:[#allocation9 + $0x118] sm:$0xff]  ;;  %v2307_v7 = vld [vmem:[#allocation9 + $0x60] sm:$0xff]  ;;  %2447 = vmatpush.msrb.mxu2 %v2433_v36 }
 0xca1   :  { %v2259_v39 = vsel %vm2256_vm4, %v2258_v42, %v2254_v37  ;;  %v1798_v55 = vsel %vm1797_vm8, %v3647_v29, %v1794_v8  ;;  %2384 = vmatpush.msrb.mxu1 %v2330_v16  ;;  %v2327_v29 = vld [vmem:[#allocation9 + $0x100] sm:$0xff]  ;;  %v2304_v37 = vld [vmem:[#allocation9 + $0x48] sm:$0xff]  ;;  %v2318_v42 = vld [vmem:[#allocation9 + $0xb8] sm:$0xff]  ;;  %2367 = vmatpush.msra.mxu0 %v2320_v5 }
 0xca2   :  { %v2279_v61 = vsub.f32 1.0, %v2259_v39  ;;  %v2292_v58 = vmul.f32 %v2259_v39, %v4573_v25  ;;  %v2328_v25 = vld [vmem:[#allocation9 + $0x108] sm:$0xff]  ;;  %v2430_v39 = vld [vmem:[#allocation13 + $0xf0] sm:$0xff]  ;;  %v2416_v36 = vld [vmem:[#allocation13 + $0x80] sm:$0xff] }
 0xca3   :  { %2344 = vmatpush.msrb.mxu3 %v2328_v25  ;;  %2385 = vmatpush.msrb.mxu1 %v2327_v29  ;;  %v2317_v8 = vld [vmem:[#allocation9 + $0xb0] sm:$0xff]  ;;  %v2428_v25 = vld [vmem:[#allocation13 + $0xe0] sm:$0xff] }
 0xca4   :  { %2448 = vmatpush.msrb.mxu2 %v2430_v39  ;;  %2368 = vmatpush.msra.mxu0 %v2317_v8  ;;  %v2297_v16 = vld [vmem:[#allocation9 + $0x10] sm:$0xff]  ;;  %v2403_v39 = vld [vmem:[#allocation13 + $0x18] sm:$0xff]  ;;  %v2413_v8 = vld [vmem:[#allocation13 + $0x68] sm:$0xff] }
 0xca5   :  { %2345 = vmatpush.msrb.mxu3 %v2325_v20  ;;  %2386 = vmatpush.msrb.mxu1 %v2324_v57  ;;  %v2300_v20 = vld [vmem:[#allocation9 + $0x28] sm:$0xff]  ;;  %v2422_v29 = vld [vmem:[#allocation13 + $0xb0] sm:$0xff] }
 0xca6   :  { %2369 = vmatpush.msra.mxu0 %v2314_v50  ;;  %v2409_v57 = vld [vmem:[#allocation13 + $0x48] sm:$0xff]  ;;  %v2406_v5 = vld [vmem:[#allocation13 + $0x30] sm:$0xff] }
 0xca7   :  { %2346 = vmatpush.msrb.mxu3 %v2322_v34  ;;  %2387 = vmatpush.msrb.mxu1 %v2321_v38  ;;  %v2299_v34 = vld [vmem:[#allocation9 + $0x20] sm:$0xff]  ;;  %v2410_v50 = vld [vmem:[#allocation13 + $0x50] sm:$0xff] }
 0xca8   :  { %v2432_v38 = vld [vmem:[#allocation13 + $0x100] sm:$0xff] }
 0xca9   :  { %2347 = vmatpush.msrb.mxu3 %v2319_v19  ;;  %2388 = vmatpush.msrb.mxu1 %v2318_v42  ;;  %v2415_v19 = vld [vmem:[#allocation13 + $0x78] sm:$0xff]  ;;  %v2429_v42 = vld [vmem:[#allocation13 + $0xe8] sm:$0xff] }
 0xcab   :  { %2348 = vmatpush.msrb.mxu3 %v2316_v13  ;;  %v2425_v13 = vld [vmem:[#allocation13 + $0xc8] sm:$0xff] }
 0xcd0   :  { %v1827_v9 = vpop.permute.xlu2 %1826 }
 0xcd1   :  { %v1833_v17 = vmul.f32 %v1827_v9, %v1822_v0  ;;  %v1803_v0 = vsel %vm1800_vm10, %v1802_v41, %v1798_v55  ;;  %v2308_v55 = vld [vmem:[#allocation9 + $0x68] sm:$0xff]  ;;  %v2306_v41 = vld [vmem:[#allocation9 + $0x58] sm:$0xff] }
 0xcd2   :  { %v1823_v49 = vsub.f32 1.0, %v1803_v0  ;;  %v1836_v62 = vmul.f32 %v1803_v0, %v4558_v51  ;;  %v2305_v0 = vld [vmem:[#allocation9 + $0x50] sm:$0xff] }
 0xcd3   :  { %v4693_v32 = vadd.f32 %v1835_v14, %v1833_v17 }
 0xcd5   :  { %2436 = vrot.lane.b32.xlu0 %v4693_v32, %s3960_s21 }
 0xcdd   :  { %2739 = vrot.lane.b32.xlu0 %v4697_v24, %s3958_s13 }
 0xcfe   :  { %v2283_v40 = vpop.permute.xlu0 %2282 }
 0xcff   :  { %v2285_v21 = vpop.permute.xlu1 %2284  ;;  %v2289_v48 = vmul.f32 %v2283_v40, %v2278_v46  ;;  %v2427_v46 = vld [vmem:[#allocation13 + $0xd8] sm:$0xff] }
 0xd00   :  { %v2286_v63 = vsel %vm563_vm0, %v2283_v40, %v2285_v21  ;;  %v2315_v40 = vld [vmem:[#allocation9 + $0xa0] sm:$0xff]  ;;  %v2298_v21 = vld [vmem:[#allocation9 + $0x18] sm:$0xff]  ;;  %2449 = vmatpush.msrb.mxu2 %v2427_v46 }
 0xd01   :  { %v2290_v52 = vmul.f32 %v2286_v63, %v2279_v61  ;;  %v4705_v59 = vadd.f32 %v2291_v45, %v2289_v48  ;;  %v2312_v61 = vld [vmem:[#allocation9 + $0x88] sm:$0xff]  ;;  %2389 = vmatpush.msrb.mxu1 %v2315_v40  ;;  %v2311_v45 = vld [vmem:[#allocation9 + $0x80] sm:$0xff]  ;;  %v2309_v63 = vld [vmem:[#allocation9 + $0x70] sm:$0xff] }
 0xd02   :  { %2370 = vmatpush.msra.mxu0 %v2311_v45  ;;  %v2295_v48 = vld [vmem:[#allocation9] sm:$0xff]  ;;  %v2620_v45 = vld [vmem:[#allocation10 + $0x110] sm:$0xff] }
 0xd03   :  { %2333 = vrot.lane.b32.xlu1 %v4705_v59, %s3960_s21  ;;  %v4710_v33 = vadd.f32 %v2292_v58, %v2290_v52  ;;  %2390 = vmatpush.msrb.mxu1 %v2312_v61  ;;  %v2424_v52 = vld [vmem:[#allocation13 + $0xc0] sm:$0xff]  ;;  %v2434_v58 = vld [vmem:[#allocation13 + $0x110] sm:$0xff]  ;;  %v2423_v61 = vld [vmem:[#allocation13 + $0xb8] sm:$0xff] }
 0xd04   :  { %2371 = vmatpush.msra.mxu0 %v2308_v55  ;;  %2450 = vmatpush.msrb.mxu2 %v2424_v52  ;;  %v2610_v46 = vld [vmem:[#allocation10 + $0xc0] sm:$0xff]  ;;  %v2617_v52 = vld [vmem:[#allocation10 + $0xf8] sm:$0xff] }
 0xd05   :  { %2335 = vrot.lane.b32.xlu2 %v4710_v33, %s3960_s21  ;;  %2391 = vmatpush.msrb.mxu1 %v2309_v63  ;;  %v2400_v40 = vld [vmem:[#allocation13] sm:$0xff]  ;;  %v2604_v63 = vld [vmem:[#allocation10 + $0x90] sm:$0xff] }
 0xd06   :  { %v1829_v26 = vpop.permute.xlu0 %1828  ;;  %2372 = vmatpush.msra.mxu0 %v2305_v0  ;;  %v2420_v55 = vld [vmem:[#allocation13 + $0xa0] sm:$0xff]  ;;  %v2417_v0 = vld [vmem:[#allocation13 + $0x88] sm:$0xff] }
 0xd07   :  { %v1830_v14 = vsel %vm563_vm0, %v1827_v9, %v1829_v26  ;;  %v2313_v9 = vld [vmem:[#allocation9 + $0x90] sm:$0xff]  ;;  %v2431_v26 = vld [vmem:[#allocation13 + $0xf8] sm:$0xff]  ;;  %2392 = vmatpush.msrb.mxu1 %v2306_v41 }
 0xd08   :  { %v1834_v17 = vmul.f32 %v1830_v14, %v1823_v49  ;;  %2349 = vmatpush.msrb.mxu3 %v2313_v9  ;;  %v2421_v49 = vld [vmem:[#allocation13 + $0xa8] sm:$0xff]  ;;  %v2303_v14 = vld [vmem:[#allocation9 + $0x40] sm:$0xff]  ;;  %v2601_v41 = vld [vmem:[#allocation10 + $0x78] sm:$0xff] }
 0xd09   :  { %2451 = vmatpush.msrb.mxu2 %v2421_v49  ;;  %2393 = vmatpush.msrb.mxu1 %v2303_v14  ;;  %v2412_v9 = vld [vmem:[#allocation13 + $0x60] sm:$0xff] }
 0xd0a   :  { %v4716_v35 = vadd.f32 %v1836_v62, %v1834_v17  ;;  %2350 = vmatpush.msrb.mxu3 %v2310_v30  ;;  %v2302_v17 = vld [vmem:[#allocation9 + $0x38] sm:$0xff]  ;;  %v2418_v62 = vld [vmem:[#allocation13 + $0x90] sm:$0xff]  ;;  %v2614_v49 = vld [vmem:[#allocation10 + $0xe0] sm:$0xff] }
 0xd0b   :  { %2373 = vmatpush.msra.mxu0 %v2302_v17  ;;  %2452 = vmatpush.msrb.mxu2 %v2418_v62  ;;  %v2435_v30 = vld [vmem:[#allocation13 + $0x118] sm:$0xff]  ;;  %v2598_v14 = vld [vmem:[#allocation10 + $0x60] sm:$0xff]  ;;  %v2414_v17 = vld [vmem:[#allocation13 + $0x70] sm:$0xff] }
 0xd0c   :  { %2438 = vrot.lane.b32.xlu1 %v4716_v35, %s3960_s21  ;;  %2351 = vmatpush.msrb.mxu3 %v2307_v7  ;;  %v2616_v7 = vld [vmem:[#allocation10 + $0xf0] sm:$0xff]  ;;  %v2611_v62 = vld [vmem:[#allocation10 + $0xc8] sm:$0xff] }
 0xd0d   :  { %2394 = vmatpush.msrb.mxu1 %v2300_v20  ;;  %2374 = vmatpush.msra.mxu0 %v2299_v34  ;;  %v2411_v20 = vld [vmem:[#allocation13 + $0x58] sm:$0xff]  ;;  %v2608_v34 = vld [vmem:[#allocation10 + $0xb0] sm:$0xff] }
 0xd0e   :  { %2352 = vmatpush.msrb.mxu3 %v2304_v37  ;;  %2453 = vmatpush.msrb.mxu2 %v2415_v19  ;;  %v2613_v37 = vld [vmem:[#allocation10 + $0xd8] sm:$0xff]  ;;  %v2592_v19 = vld [vmem:[#allocation10 + $0x30] sm:$0xff] }
 0xd0f   :  { %2395 = vmatpush.msrb.mxu1 %v2297_v16  ;;  %2375 = vmatpush.msra.mxu0 %v2296_v10  ;;  %v2605_v16 = vld [vmem:[#allocation10 + $0x98] sm:$0xff] }
 0xd10   :  { %2353 = vmatpush.msrb.mxu3 %v2301_v28  ;;  %2454 = vmatpush.msrb.mxu2 %v2412_v9  ;;  %v2426_v28 = vld [vmem:[#allocation13 + $0xd0] sm:$0xff]  ;;  %v2589_v10 = vld [vmem:[#allocation10 + $0x18] sm:$0xff]  ;;  %v2405_v9 = vld [vmem:[#allocation13 + $0x28] sm:$0xff] }
 0xd11   :  { %2626 = vmatpush.msra.mxu1 %v2619_v53  ;;  %2487 = vmatpush.msrb.mxu0 %v2435_v30  ;;  %v2586_v53 = vld [vmem:[#allocation10] sm:$0xff]  ;;  %v2402_v30 = vld [vmem:[#allocation13 + $0x10] sm:$0xff] }
 0xd12   :  { %2354 = vmatpush.msrb.mxu3 %v2298_v21  ;;  %2455 = vmatpush.msrb.mxu2 %v2409_v57  ;;  %v2607_v21 = vld [vmem:[#allocation10 + $0xa8] sm:$0xff] }
 0xd13   :  { %2627 = vmatpush.msra.mxu1 %v2616_v7  ;;  %2488 = vmatpush.msrb.mxu0 %v2432_v38  ;;  %v2599_v57 = vld [vmem:[#allocation10 + $0x68] sm:$0xff]  ;;  %v2593_v7 = vld [vmem:[#allocation10 + $0x38] sm:$0xff]  ;;  %v2590_v38 = vld [vmem:[#allocation10 + $0x20] sm:$0xff] }
 0xd14   :  { %2355 = vmatpush.msrb.mxu3 %v2295_v48  ;;  %2456 = vmatpush.msrb.mxu2 %v2406_v5  ;;  %v2407_v48 = vld [vmem:[#allocation13 + $0x38] sm:$0xff]  ;;  %v2587_v5 = vld [vmem:[#allocation10 + $0x8] sm:$0xff] }
 0xd15   :  { %2628 = vmatpush.msra.mxu1 %v2613_v37  ;;  %2489 = vmatpush.msrb.mxu0 %v2429_v42  ;;  %v2621_v42 = vld [vmem:[#allocation10 + $0x118] sm:$0xff] }
 0xd16   :  { %2467 = vmatpush.msra.mxu3 %v2434_v58  ;;  %2457 = vmatpush.msrb.mxu2 %v2403_v39  ;;  %v2404_v58 = vld [vmem:[#allocation13 + $0x20] sm:$0xff] }
 0xd17   :  { %2629 = vmatpush.msra.mxu1 %v2610_v46  ;;  %2490 = vmatpush.msrb.mxu0 %v2426_v28  ;;  %v2615_v46 = vld [vmem:[#allocation10 + $0xe8] sm:$0xff]  ;;  %v2612_v28 = vld [vmem:[#allocation10 + $0xd0] sm:$0xff] }
 0xd18   :  { %2468 = vmatpush.msra.mxu3 %v2431_v26  ;;  %2458 = vmatpush.msrb.mxu2 %v2400_v40  ;;  %v2401_v26 = vld [vmem:[#allocation13 + $0x8] sm:$0xff]  ;;  %v2609_v40 = vld [vmem:[#allocation10 + $0xb8] sm:$0xff] }
 0xd19   :  { %2630 = vmatpush.msra.mxu1 %v2607_v21  ;;  %2491 = vmatpush.msrb.mxu0 %v2423_v61 }
 0xd1a   :  { %2469 = vmatpush.msra.mxu3 %v2428_v25  ;;  %2646 = vmatpush.msra.mxu2 %v2620_v45  ;;  %v2595_v25 = vld [vmem:[#allocation10 + $0x48] sm:$0xff]  ;;  %v2606_v45 = vld [vmem:[#allocation10 + $0xa0] sm:$0xff] }
 0xd1b   :  { %2631 = vmatpush.msra.mxu1 %v2604_v63  ;;  %2492 = vmatpush.msrb.mxu0 %v2420_v55  ;;  %v2600_v63 = vld [vmem:[#allocation10 + $0x70] sm:$0xff]  ;;  %v2597_v55 = vld [vmem:[#allocation10 + $0x58] sm:$0xff] }
 0xd1c   :  { %2470 = vmatpush.msra.mxu3 %v2425_v13  ;;  %2647 = vmatpush.msra.mxu2 %v2617_v52  ;;  %v2408_v13 = vld [vmem:[#allocation13 + $0x40] sm:$0xff] }
 0xd1d   :  { %2632 = vmatpush.msra.mxu1 %v2601_v41  ;;  %2493 = vmatpush.msrb.mxu0 %v2417_v0  ;;  %v2594_v52 = vld [vmem:[#allocation10 + $0x40] sm:$0xff]  ;;  %v2588_v41 = vld [vmem:[#allocation10 + $0x10] sm:$0xff]  ;;  %v2896_v0 = vld [vmem:[#allocation12 + $0x108] sm:$0xff] }
 0xd1e   :  { %2471 = vmatpush.msra.mxu3 %v2422_v29  ;;  %2648 = vmatpush.msra.mxu2 %v2614_v49  ;;  %v2602_v29 = vld [vmem:[#allocation10 + $0x80] sm:$0xff]  ;;  %v2893_v49 = vld [vmem:[#allocation12 + $0xf0] sm:$0xff] }
 0xd1f   :  { %2633 = vmatpush.msra.mxu1 %v2598_v14  ;;  %2494 = vmatpush.msrb.mxu0 %v2414_v17  ;;  %v2887_v14 = vld [vmem:[#allocation12 + $0xc0] sm:$0xff]  ;;  %v2884_v17 = vld [vmem:[#allocation12 + $0xa8] sm:$0xff] }
 0xd20   :  { %2472 = vmatpush.msra.mxu3 %v2419_v44  ;;  %2649 = vmatpush.msra.mxu2 %v2611_v62  ;;  %v2596_v44 = vld [vmem:[#allocation10 + $0x50] sm:$0xff] }
 0xd21   :  { %2634 = vmatpush.msra.mxu1 %v2595_v25  ;;  %2495 = vmatpush.msrb.mxu0 %v2411_v20  ;;  %v2881_v62 = vld [vmem:[#allocation12 + $0x90] sm:$0xff]  ;;  %v2878_v25 = vld [vmem:[#allocation12 + $0x78] sm:$0xff]  ;;  %v2875_v20 = vld [vmem:[#allocation12 + $0x60] sm:$0xff] }
 0xd22   :  { %2473 = vmatpush.msra.mxu3 %v2416_v36  ;;  %2650 = vmatpush.msra.mxu2 %v2608_v34  ;;  %v2872_v34 = vld [vmem:[#allocation12 + $0x48] sm:$0xff] }
 0xd23   :  { %2635 = vmatpush.msra.mxu1 %v2592_v19  ;;  %2496 = vmatpush.msrb.mxu0 %v2408_v13  ;;  %v2869_v19 = vld [vmem:[#allocation12 + $0x30] sm:$0xff]  ;;  %v2866_v13 = vld [vmem:[#allocation12 + $0x18] sm:$0xff] }
 0xd24   :  { %2474 = vmatpush.msra.mxu3 %v2413_v8  ;;  %2651 = vmatpush.msra.mxu2 %v2605_v16  ;;  %v2618_v8 = vld [vmem:[#allocation10 + $0x100] sm:$0xff] }
 0xd25   :  { %2636 = vmatpush.msra.mxu1 %v2589_v10  ;;  %2497 = vmatpush.msrb.mxu0 %v2405_v9 }
 0xd26   :  { %2475 = vmatpush.msra.mxu3 %v2410_v50  ;;  %2652 = vmatpush.msra.mxu2 %v2602_v29 }
 0xd27   :  { %2637 = vmatpush.msra.mxu1 %v2586_v53  ;;  %2498 = vmatpush.msrb.mxu0 %v2402_v30 }
 0xd28   :  { %2476 = vmatpush.msra.mxu3 %v2407_v48  ;;  %2653 = vmatpush.msra.mxu2 %v2599_v57  ;;  %v2603_v48 = vld [vmem:[#allocation10 + $0x88] sm:$0xff] }
 0xd2a   :  { %2477 = vmatpush.msra.mxu3 %v2404_v58  ;;  %2654 = vmatpush.msra.mxu2 %v2596_v44  ;;  %v2591_v58 = vld [vmem:[#allocation10 + $0x28] sm:$0xff] }
 0xd2c   :  { %2478 = vmatpush.msra.mxu3 %v2401_v26  ;;  %2655 = vmatpush.msra.mxu2 %v2593_v7  ;;  %v2890_v26 = vld [vmem:[#allocation12 + $0xd8] sm:$0xff] }
 0xd2e   :  { %2656 = vmatpush.msra.mxu2 %v2590_v38 }
 0xd30   :  { %2657 = vmatpush.msra.mxu2 %v2587_v5 }
 0xd47   :  { %v2437_v50 = vpop.permute.xlu0 %2436 }
 0xd5f   :  { %v2336_v36 = vpop.permute.xlu2 %2335 }
 0xd75   :  { %v2334_v37 = vpop.permute.xlu1 %2333 }
 0xd76   :  { %v4721_v39 = vsel %vm563_vm0, %v2334_v37, %v2336_v36 }
 0xd77   :  { %3507 = vmatmul.msk.f32.vlgmr.msrb.gmra.mxu3 %vm380_vm15, %v4721_v39  ;;  %3508 = vmatmul.msk.f32.vlgmr.msra.gmra.mxu0 %vm380_vm15, %v4721_v39 }
 0xd78   :  { %3509 = vmatmul.msk.f32.vlgmr.msrb.gmra.mxu1 %vm380_vm15, %v4721_v39  ;;  %2666 = vmatpush.msrb.mxu3 %v2621_v42 }
 0xd7a   :  { %2667 = vmatpush.msrb.mxu3 %v2618_v8 }
 0xd7c   :  { %2668 = vmatpush.msrb.mxu3 %v2615_v46 }
 0xd7e   :  { %2669 = vmatpush.msrb.mxu3 %v2612_v28  ;;  %v2439_v21 = vpop.permute.xlu1 %2438 }
 0xd7f   :  { %v2440_v61 = vsel %vm563_vm0, %v2437_v50, %v2439_v21 }
 0xd80   :  { %3515 = vmatmul.msk.f32.vlgmr.msra.gmra.mxu1 %vm380_vm15, %v4644_v4  ;;  %2670 = vmatpush.msrb.mxu3 %v2609_v40 }
 0xd81   :  { %3510 = vmatmul.msk.f32.vlgmr.msrb.gmra.mxu2 %vm380_vm15, %v2440_v61  ;;  %3511 = vmatmul.msk.f32.vlgmr.msra.gmra.mxu3 %vm380_vm15, %v2440_v61 }
 0xd82   :  { %3512 = vmatmul.msk.f32.vlgmr.msrb.gmra.mxu0 %vm380_vm15, %v2440_v61  ;;  %2671 = vmatpush.msrb.mxu3 %v2606_v45 }
 0xd84   :  { %2672 = vmatpush.msrb.mxu3 %v2603_v48 }
 0xd86   :  { %2673 = vmatpush.msrb.mxu3 %v2600_v63 }
 0xd88   :  { %2674 = vmatpush.msrb.mxu3 %v2597_v55 }
 0xd89   :  { %3516 = vmatmul.msk.f32.vlgmr.msra.gmra.mxu2 %vm380_vm15, %v4644_v4 }
 0xd8a   :  { %2675 = vmatpush.msrb.mxu3 %v2594_v52 }
 0xd8c   :  { %2676 = vmatpush.msrb.mxu3 %v2591_v58 }
 0xd8e   :  { %2677 = vmatpush.msrb.mxu3 %v2588_v41 }
 0xd8f   :  { %3517 = vmatmul.msk.f32.vlgmr.msrb.gmra.mxu3 %vm380_vm15, %v4644_v4  ;;  %v2863_v4 = vld [vmem:[#allocation12] sm:$0xff] }
 0xd90   :  { %2903 = vmatpush.msra.mxu3 %v2896_v0 }
 0xd92   :  { %2904 = vmatpush.msra.mxu3 %v2893_v49 }
 0xd94   :  { %2905 = vmatpush.msra.mxu3 %v2890_v26 }
 0xd96   :  { %2906 = vmatpush.msra.mxu3 %v2887_v14 }
 0xd98   :  { %2907 = vmatpush.msra.mxu3 %v2884_v17 }
 0xd9a   :  { %2908 = vmatpush.msra.mxu3 %v2881_v62 }
 0xd9c   :  { %2909 = vmatpush.msra.mxu3 %v2878_v25 }
 0xd9e   :  { %2910 = vmatpush.msra.mxu3 %v2875_v20 }
 0xda0   :  { %2911 = vmatpush.msra.mxu3 %v2872_v34 }
 0xda2   :  { %2912 = vmatpush.msra.mxu3 %v2869_v19 }
 0xda4   :  { %2913 = vmatpush.msra.mxu3 %v2866_v13 }
 0xda6   :  { %2914 = vmatpush.msra.mxu3 %v2863_v4 }
 0xda7   :  { %3523 = vmatmul.msk.f32.vlgmr.msra.gmra.mxu3 %vm380_vm15, %v4721_v39 }
 0xdf5   :  { %v4741_v10 = vpop.f32.mrf.mxu1 }
 0xdfa   :  { %v2357_v16 = vpop.f32.mrf.mxu3 }
 0xdfb   :  { %v2358_v29 = vadd.f32 %v2357_v16, %v4405_v6 }
 0xdfd   :  { %v2639_v44 = vpop.f32.mrf.mxu1 }
 0xdfe   :  { %v2640_v5 = vadd.f32 %v2639_v44, %v4212_v12 }
 0xe00   :  { %v2684_v40 = vadd.f32 %v4697_v24, %v2640_v5 }
 0xe02   :  { %v3518_v50 = vmul.f32 -1.442695, %v2684_v40  ;;  %v2778_v40 = vld [vmem:[#allocation7 + $0xa8] sm:$0xff] }
 0xe04   :  { %v2460_v9 = vpop.f32.mrf.mxu2  ;;  %v4747_v57 = vpop.f32.mrf.mxu3  ;;  %3648 = vpow2.f32 %v3518_v50  ;;  %v2779_v50 = vld [vmem:[#allocation7 + $0xb0] sm:$0xff] }
 0xe05   :  { %v2461_v53 = vadd.f32 %v2460_v9, %v4402_v2 }
 0xe07   :  { %v4745_v30 = vadd.f32 %v2461_v53, %v2358_v29 }
 0xe0a   :  { %v3649_v21 = vpop.eup %3648 }
 0xe0b   :  { %v2688_v61 = vadd.f32 1.0, %v3649_v21 }
 0xe0c   :  { %v2659_v7 = vpop.f32.mrf.mxu2 }
 0xe0d   :  { %v2660_v38 = vadd.f32 %v2659_v7, %v4210_v11  ;;  %3650 = vrcp.f32 %v2688_v61  ;;  %v2700_v55 = vand.u32 2147483648, %v2688_v61  ;;  %vm2694_vm12 = vweird.f32 %v2688_v61  ;;  %v2790_v7 = vld [vmem:[#allocation7 + $0x108] sm:$0xff] }
 0xe0e   :  { %v2698_v52 = vand.u32 2147483647, %v2688_v61  ;;  %2807 = vmatpush.msra.mxu0 %v2790_v7  ;;  %v2757_v7 = vld [vmem:[#allocation7] sm:$0xff] }
 0xe0f   :  { %v2706_v36 = vrot.slane %v2660_v38, 7  ;;  %v2701_v26 = vor.u32 1.1754944e-38, %v2700_v55 }
 0xe10   :  { %vm2699_vm13 = vcmp.eq.f32.partialorder %v2698_v52, 8.507059e+37 }
 0xe11   :  { %v2707_v37 = vsel %vm468_vm5, %v2640_v5, %v2706_v36  ;;  %v2787_v5 = vld [vmem:[#allocation7 + $0xf0] sm:$0xff]  ;;  %v2788_v36 = vld [vmem:[#allocation7 + $0xf8] sm:$0xff] }
 0xe12   :  { %v2679_v42 = vpop.f32.mrf.mxu3  ;;  %v2709_v13 = vadd.f32 %v2707_v37, %v4697_v24  ;;  %2808 = vmatpush.msra.mxu0 %v2787_v5  ;;  %v2781_v24 = vld [vmem:[#allocation7 + $0xc0] sm:$0xff]  ;;  %v2782_v37 = vld [vmem:[#allocation7 + $0xc8] sm:$0xff]  ;;  %v2780_v5 = vld [vmem:[#allocation7 + $0xb8] sm:$0xff] }
 0xe13   :  { %v2680_v8 = vadd.f32 %v2679_v42, %v4216_v18  ;;  %v3651_v11 = vpop.eup %3650  ;;  %v2740_v18 = vpop.permute.xlu0 %2739 }
 0xe14   :  { %v2690_v12 = vmul.f32 %v3651_v11, %v2688_v61  ;;  %vm2695_vm11 = vweird.f32 %v3651_v11  ;;  %v2741_v0 = vrot.slane %v2740_v18, 1  ;;  %v2742_v49 = vrot.slane %v2740_v18, 2 }
 0xe15   :  { %v2730_v46 = vrot.slane %v2680_v8, 7  ;;  %v3519_v4 = vmul.f32 -1.442695, %v2709_v13  ;;  %v2784_v8 = vld [vmem:[#allocation7 + $0xd8] sm:$0xff]  ;;  %v2767_v13 = vld [vmem:[#allocation7 + $0x50] sm:$0xff] }
 0xe16   :  { %v2691_v45 = vsub.f32 1.0, %v2690_v12  ;;  %v2743_v20 = vsel %vm497_vm9, %v2741_v0, %v2742_v49  ;;  %2809 = vmatpush.msra.mxu0 %v2784_v8  ;;  %v2776_v12 = vld [vmem:[#allocation7 + $0x98] sm:$0xff]  ;;  %v2777_v8 = vld [vmem:[#allocation7 + $0xa0] sm:$0xff] }
 0xe17   :  { %v2731_v28 = vsel %vm468_vm5, %v2660_v38, %v2730_v46  ;;  %vm2696_vm5 = vmor %vm2694_vm12, %vm2695_vm11  ;;  %v2791_v38 = vld [vmem:[#allocation7 + $0x110] sm:$0xff]  ;;  %v2785_v46 = vld [vmem:[#allocation7 + $0xe0] sm:$0xff] }
 0xe18   :  { %2732 = vrot.lane.b32.xlu2 %v2731_v28, %s3958_s13  ;;  %v2692_v48 = vmul.f32 %v3651_v11, %v2691_v45  ;;  %2827 = vmatpush.msrb.mxu1 %v2791_v38  ;;  %v2758_v38 = vld [vmem:[#allocation7 + $0x8] sm:$0xff] }
 0xe19   :  { %2810 = vmatpush.msra.mxu0 %v2781_v24  ;;  %v2895_v24 = vld [vmem:[#allocation12 + $0x100] sm:$0xff] }
 0xe1a   :  { %v2693_v63 = vadd.f32 %v3651_v11, %v2692_v48  ;;  %2828 = vmatpush.msrb.mxu1 %v2788_v36  ;;  %v2772_v48 = vld [vmem:[#allocation7 + $0x78] sm:$0xff]  ;;  %v2897_v36 = vld [vmem:[#allocation12 + $0x110] sm:$0xff] }
 0xe1b   :  { %2811 = vmatpush.msra.mxu0 %v2778_v40  ;;  %v2892_v40 = vld [vmem:[#allocation12 + $0xe8] sm:$0xff] }
 0xe1c   :  { %v2697_v58 = vsel %vm2696_vm5, %v3651_v11, %v2693_v63  ;;  %2829 = vmatpush.msrb.mxu1 %v2785_v46  ;;  %v2775_v11 = vld [vmem:[#allocation7 + $0x90] sm:$0xff]  ;;  %v2773_v63 = vld [vmem:[#allocation7 + $0x80] sm:$0xff]  ;;  %v2894_v46 = vld [vmem:[#allocation12 + $0xf8] sm:$0xff] }
 0xe1d   :  { %v2702_v17 = vsel %vm2699_vm13, %v2701_v26, %v2697_v58  ;;  %2812 = vmatpush.msra.mxu0 %v2775_v11  ;;  %v2768_v11 = vld [vmem:[#allocation7 + $0x58] sm:$0xff] }
 0xe1e   :  { %2830 = vmatpush.msrb.mxu1 %v2782_v37  ;;  %v2774_v37 = vld [vmem:[#allocation7 + $0x88] sm:$0xff] }
 0xe1f   :  { %2813 = vmatpush.msra.mxu0 %v2772_v48  ;;  %v2765_v48 = vld [vmem:[#allocation7 + $0x40] sm:$0xff] }
 0xe20   :  { %2831 = vmatpush.msrb.mxu1 %v2779_v50  ;;  %v2771_v50 = vld [vmem:[#allocation7 + $0x70] sm:$0xff] }
 0xe22   :  { %2832 = vmatpush.msrb.mxu1 %v2776_v12  ;;  %v2885_v12 = vld [vmem:[#allocation12 + $0xb0] sm:$0xff] }
 0xe24   :  { %2833 = vmatpush.msrb.mxu1 %v2773_v63  ;;  %v2882_v63 = vld [vmem:[#allocation12 + $0x98] sm:$0xff] }
 0xe72   :  { %v2733_v41 = vpop.permute.xlu2 %2732 }
 0xe73   :  { %v2734_v14 = vrot.slane %v2733_v41, 1 }
 0xe75   :  { %v2735_v62 = vsel %vm497_vm9, %v2733_v41, %v2734_v14 }
 0xe76   :  { %v2737_v25 = vmul.f32 %v2735_v62, %v2702_v17 }
 0xe78   :  { %v2745_v34 = vadd.f32 %v2743_v20, %v2737_v25  ;;  %v4766_v25 = vadd.f32 %v4747_v57, %v4477_v15  ;;  %v2769_v20 = vld [vmem:[#allocation7 + $0x60] sm:$0xff]  ;;  %v2760_v57 = vld [vmem:[#allocation7 + $0x18] sm:$0xff] }
 0xe79   :  { %2814 = vmatpush.msra.mxu0 %v2769_v20  ;;  %v2867_v20 = vld [vmem:[#allocation12 + $0x20] sm:$0xff] }
 0xe7a   :  { %3652 = vtanh.f32 %v2745_v34  ;;  %v2770_v34 = vld [vmem:[#allocation7 + $0x68] sm:$0xff] }
 0xe7b   :  { %3654 = vpow2.f32 %v3519_v4  ;;  %2834 = vmatpush.msrb.mxu1 %v2770_v34  ;;  %v2789_v4 = vld [vmem:[#allocation7 + $0x100] sm:$0xff]  ;;  %v2868_v34 = vld [vmem:[#allocation12 + $0x28] sm:$0xff] }
 0xe7d   :  { %2835 = vmatpush.msrb.mxu1 %v2767_v13 }
 0xe80   :  { %v3653_v19 = vpop.eup %3652 }
 0xe81   :  { %2749 = vrot.lane.b32.xlu1 %v3653_v19, %s3959_s17  ;;  %v3655_v16 = vpop.eup %3654  ;;  %v2792_v19 = vld [vmem:[#allocation7 + $0x118] sm:$0xff] }
 0xe82   :  { %v2713_v9 = vadd.f32 1.0, %v3655_v16  ;;  %2847 = vmatpush.msrb.mxu2 %v2792_v19  ;;  %v2763_v16 = vld [vmem:[#allocation7 + $0x30] sm:$0xff]  ;;  %v2864_v19 = vld [vmem:[#allocation12 + $0x8] sm:$0xff] }
 0xe84   :  { %3656 = vrcp.f32 %v2713_v9  ;;  %v2725_v21 = vand.u32 2147483648, %v2713_v9  ;;  %vm2719_vm1 = vweird.f32 %v2713_v9  ;;  %v2723_v61 = vand.u32 2147483647, %v2713_v9  ;;  %2848 = vmatpush.msrb.mxu2 %v2789_v4 }
 0xe86   :  { %v2726_v55 = vor.u32 1.1754944e-38, %v2725_v21  ;;  %vm2724_vm3 = vcmp.eq.f32.partialorder %v2723_v61, 8.507059e+37  ;;  %v2888_v21 = vld [vmem:[#allocation12 + $0xc8] sm:$0xff]  ;;  %v2889_v61 = vld [vmem:[#allocation12 + $0xd0] sm:$0xff] }
 0xe8a   :  { %v3657_v29 = vpop.eup %3656 }
 0xe8b   :  { %v2715_v53 = vmul.f32 %v3657_v29, %v2713_v9  ;;  %vm2720_vm14 = vweird.f32 %v3657_v29  ;;  %v2764_v9 = vld [vmem:[#allocation7 + $0x38] sm:$0xff] }
 0xe8c   :  { %vm2721_vm2 = vmor %vm2719_vm1, %vm2720_vm14  ;;  %2836 = vmatpush.msrb.mxu1 %v2764_v9  ;;  %v4778_v9 = vpop.f32.mrf.mxu0 }
 0xe8d   :  { %v2716_v44 = vsub.f32 1.0, %v2715_v53  ;;  %v2761_v53 = vld [vmem:[#allocation7 + $0x20] sm:$0xff] }
 0xe8e   :  { %2837 = vmatpush.msrb.mxu1 %v2761_v53 }
 0xe8f   :  { %v2717_v42 = vmul.f32 %v3657_v29, %v2716_v44  ;;  %v2783_v44 = vld [vmem:[#allocation7 + $0xd0] sm:$0xff] }
 0xe90   :  { %2838 = vmatpush.msrb.mxu1 %v2758_v38 }
 0xe91   :  { %v2718_v28 = vadd.f32 %v3657_v29, %v2717_v42  ;;  %v2898_v42 = vld [vmem:[#allocation12 + $0x118] sm:$0xff] }
 0xe92   :  { %2943 = vmatpush.msra.mxu1 %v2898_v42 }
 0xe93   :  { %v2722_v45 = vsel %vm2721_vm2, %v3657_v29, %v2718_v28  ;;  %v2786_v29 = vld [vmem:[#allocation7 + $0xe8] sm:$0xff]  ;;  %v2891_v28 = vld [vmem:[#allocation12 + $0xe0] sm:$0xff] }
 0xe94   :  { %v2727_v18 = vsel %vm2724_vm3, %v2726_v55, %v2722_v45  ;;  %2849 = vmatpush.msrb.mxu2 %v2786_v29  ;;  %2944 = vmatpush.msra.mxu1 %v2895_v24  ;;  %v2886_v45 = vld [vmem:[#allocation12 + $0xb8] sm:$0xff]  ;;  %v2883_v55 = vld [vmem:[#allocation12 + $0xa0] sm:$0xff]  ;;  %v2500_v29 = vpop.f32.mrf.mxu0 }
 0xe95   :  { %v2747_v41 = vsub.f32 1.0, %v2727_v18  ;;  %v2755_v49 = vmul.f32 %v2727_v18, %v4631_v22  ;;  %v2766_v22 = vld [vmem:[#allocation7 + $0x48] sm:$0xff] }
 0xe96   :  { %2815 = vmatpush.msra.mxu0 %v2766_v22  ;;  %2850 = vmatpush.msrb.mxu2 %v2783_v44  ;;  %v2762_v18 = vld [vmem:[#allocation7 + $0x28] sm:$0xff]  ;;  %v2865_v22 = vld [vmem:[#allocation12 + $0x10] sm:$0xff] }
 0xe97   :  { %2945 = vmatpush.msra.mxu1 %v2892_v40 }
 0xe98   :  { %2816 = vmatpush.msra.mxu0 %v2763_v16  ;;  %2851 = vmatpush.msrb.mxu2 %v2780_v5 }
 0xe99   :  { %2946 = vmatpush.msra.mxu1 %v2889_v61 }
 0xe9a   :  { %2817 = vmatpush.msra.mxu0 %v2760_v57  ;;  %2852 = vmatpush.msrb.mxu2 %v2777_v8 }
 0xe9b   :  { %2947 = vmatpush.msra.mxu1 %v2886_v45 }
 0xe9c   :  { %2818 = vmatpush.msra.mxu0 %v2757_v7  ;;  %2853 = vmatpush.msrb.mxu2 %v2774_v37 }
 0xe9d   :  { %2948 = vmatpush.msra.mxu1 %v2883_v55 }
 0xe9e   :  { %2923 = vmatpush.msrb.mxu0 %v2897_v36  ;;  %2854 = vmatpush.msrb.mxu2 %v2771_v50  ;;  %v2501_v36 = vadd.f32 %v2500_v29, %v4511_v27 }
 0xea0   :  { %2924 = vmatpush.msrb.mxu0 %v2894_v46  ;;  %2855 = vmatpush.msrb.mxu2 %v2768_v11 }
 0xea2   :  { %2925 = vmatpush.msrb.mxu0 %v2891_v28  ;;  %2856 = vmatpush.msrb.mxu2 %v2765_v48 }
 0xea4   :  { %2926 = vmatpush.msrb.mxu0 %v2888_v21  ;;  %2857 = vmatpush.msrb.mxu2 %v2762_v18 }
 0xea6   :  { %2927 = vmatpush.msrb.mxu0 %v2885_v12 }
 0xea8   :  { %2928 = vmatpush.msrb.mxu0 %v2882_v63 }
 0xef3   :  { %v2750_v52 = vpop.permute.xlu1 %2749 }
 0xef4   :  { %v2751_v58 = vrot.slane %v2750_v52, 7 }
 0xef6   :  { %v2752_v0 = vsel %vm380_vm15, %v2751_v58, %v2750_v52  ;;  %v2879_v52 = vld [vmem:[#allocation12 + $0x80] sm:$0xff]  ;;  %v2880_v58 = vld [vmem:[#allocation12 + $0x88] sm:$0xff] }
 0xef7   :  { %v2754_v26 = vmul.f32 %v2752_v0, %v2747_v41  ;;  %2929 = vmatpush.msrb.mxu0 %v2879_v52  ;;  %2949 = vmatpush.msra.mxu1 %v2880_v58  ;;  %v2759_v41 = vld [vmem:[#allocation7 + $0x10] sm:$0xff]  ;;  %v2876_v0 = vld [vmem:[#allocation12 + $0x68] sm:$0xff] }
 0xef8   :  { %2858 = vmatpush.msrb.mxu2 %v2759_v41 }
 0xef9   :  { %v2756_v14 = vadd.f32 %v2755_v49, %v2754_v26  ;;  %v2877_v49 = vld [vmem:[#allocation12 + $0x70] sm:$0xff]  ;;  %2930 = vmatpush.msrb.mxu0 %v2876_v0 }
 0xefa   :  { %2950 = vmatpush.msra.mxu1 %v2877_v49  ;;  %v2873_v26 = vld [vmem:[#allocation12 + $0x50] sm:$0xff] }
 0xefb   :  { %v2795_v17 = vperm.slane %v2756_v14, 1  ;;  %v2794_v62 = vperm.slane %v2756_v14, 0  ;;  %v2874_v14 = vld [vmem:[#allocation12 + $0x58] sm:$0xff]  ;;  %2931 = vmatpush.msrb.mxu0 %v2873_v26 }
 0xefc   :  { %2951 = vmatpush.msra.mxu1 %v2874_v14 }
 0xefd   :  { %2798 = vrot.lane.b32.xlu0 %v2795_v17, %s3960_s21  ;;  %2796 = vrot.lane.b32.xlu2 %v2794_v62, %s3960_s21  ;;  %v2870_v17 = vld [vmem:[#allocation12 + $0x38] sm:$0xff]  ;;  %v2871_v62 = vld [vmem:[#allocation12 + $0x40] sm:$0xff] }
 0xefe   :  { %2932 = vmatpush.msrb.mxu0 %v2870_v17  ;;  %2952 = vmatpush.msra.mxu1 %v2871_v62 }
 0xf00   :  { %2933 = vmatpush.msrb.mxu0 %v2867_v20  ;;  %2953 = vmatpush.msra.mxu1 %v2868_v34 }
 0xf02   :  { %2934 = vmatpush.msrb.mxu0 %v2864_v19  ;;  %2954 = vmatpush.msra.mxu1 %v2865_v22 }
 0xf05   :  { %2545 = vrot.lane.b32.xlu0 %v4766_v25, %s3958_s13 }
 0xf57   :  { %v2797_v13 = vpop.permute.xlu2 %2796 }
 0xf6f   :  { %v2799_v4 = vpop.permute.xlu0 %2798 }
 0xf70   :  { %v2800_v16 = vsel %vm563_vm0, %v2797_v13, %v2799_v4 }
 0xf71   :  { %3520 = vmatmul.msk.f32.vlgmr.msra.gmra.mxu0 %vm380_vm15, %v2800_v16  ;;  %3521 = vmatmul.msk.f32.vlgmr.msrb.gmra.mxu1 %vm380_vm15, %v2800_v16 }
 0xf72   :  { %3522 = vmatmul.msk.f32.vlgmr.msrb.gmra.mxu2 %vm380_vm15, %v2800_v16 }
 0xf77   :  { %v2546_v34 = vpop.permute.xlu0 %2545 }
 0xf79   :  { %3524 = vmatmul.msk.f32.vlgmr.msrb.gmra.mxu0 %vm380_vm15, %v4721_v39  ;;  %3525 = vmatmul.msk.f32.vlgmr.msra.gmra.mxu1 %vm380_vm15, %v4721_v39  ;;  %v2916_v39 = vpop.f32.mrf.mxu3 }
 0xf7a   :  { %v2917_v8 = vadd.f32 %v2916_v39, %v4312_v56 }
 0xfee   :  { %v2820_v57 = vpop.f32.mrf.mxu0  ;;  %v2840_v53 = vpop.f32.mrf.mxu1 }
 0xfef   :  { %v2821_v42 = vadd.f32 %v2820_v57, %v4310_v54  ;;  %v2841_v29 = vadd.f32 %v2840_v53, %v4318_v1 }
 0xff1   :  { %v2959_v46 = vadd.f32 %v2917_v8, %v2821_v42  ;;  %v2378_v42 = vadd.f32 %v4778_v9, %v4526_v60  ;;  %v2398_v8 = vadd.f32 %v4741_v10, %v4535_v23 }
 0xff3   :  { %v3526_v24 = vmul.f32 -1.442695, %v2959_v46 }
 0xff5   :  { %3658 = vpow2.f32 %v3526_v24  ;;  %v2860_v16 = vpop.f32.mrf.mxu2 }
 0xff6   :  { %v2936_v44 = vpop.f32.mrf.mxu0  ;;  %v2956_v7 = vpop.f32.mrf.mxu1  ;;  %v2861_v57 = vadd.f32 %v2860_v16, %v4320_v3 }
 0xff7   :  { %v4781_v38 = vadd.f32 %v2936_v44, %v4303_v43  ;;  %v2957_v5 = vadd.f32 %v2956_v7, %v4299_v31  ;;  %v3513_v43 = vmul.f32 -1.442695, %v4745_v30 }
 0xff9   :  { %3003 = vrot.lane.b32.xlu2 %v2957_v5, %s3958_s13  ;;  %3001 = vrot.lane.b32.xlu1 %v4781_v38, %s3958_s13  ;;  %3660 = vpow2.f32 %v3513_v43  ;;  %v2979_v43 = vadd.f32 %v4781_v38, %v2841_v29 }
 0xffb   :  { %v3659_v31 = vpop.eup %3658 }
 0xffc   :  { %v2963_v37 = vadd.f32 1.0, %v3659_v31  ;;  %v3527_v31 = vmul.f32 -1.442695, %v2979_v43  ;;  %v3064_v43 = vld [vmem:[#allocation9 + $0xf8] sm:$0xff] }
 0xffe   :  { %3662 = vrcp.f32 %v2963_v37  ;;  %v2975_v48 = vand.u32 2147483648, %v2963_v37  ;;  %vm2969_vm6 = vweird.f32 %v2963_v37  ;;  %v2973_v63 = vand.u32 2147483647, %v2963_v37 }
 0xfff   :  { %v3661_v28 = vpop.eup %3660 }
0x1000   :  { %v2507_v40 = vadd.f32 1.0, %v3661_v28  ;;  %v2976_v18 = vor.u32 1.1754944e-38, %v2975_v48  ;;  %vm2974_vm8 = vcmp.eq.f32.partialorder %v2973_v63, 8.507059e+37 }
0x1001   :  { %2547 = vrot.lane.b32.xlu1 %v2501_v36, %s3958_s13 }
0x1002   :  { %3664 = vrcp.f32 %v2507_v40  ;;  %v2519_v14 = vand.u32 2147483648, %v2507_v40  ;;  %vm2513_vm11 = vweird.f32 %v2507_v40  ;;  %v2517_v17 = vand.u32 2147483647, %v2507_v40 }
0x1004   :  { %v3663_v50 = vpop.eup %3662  ;;  %v2520_v20 = vor.u32 1.1754944e-38, %v2519_v14  ;;  %vm2518_vm5 = vcmp.eq.f32.partialorder %v2517_v17, 8.507059e+37 }
0x1005   :  { %v2965_v21 = vmul.f32 %v3663_v50, %v2963_v37  ;;  %vm2970_vm4 = vweird.f32 %v3663_v50 }
0x1006   :  { %vm2971_vm7 = vmor %vm2969_vm6, %vm2970_vm4 }
0x1007   :  { %v2966_v61 = vsub.f32 1.0, %v2965_v21 }
0x1008   :  { %v3665_v11 = vpop.eup %3664 }
0x1009   :  { %v2967_v12 = vmul.f32 %v3663_v50, %v2966_v61  ;;  %v2509_v54 = vmul.f32 %v3665_v11, %v2507_v40  ;;  %vm2514_vm10 = vweird.f32 %v3665_v11  ;;  %v2523_v40 = vadd.f32 %v4766_v25, %v2378_v42 }
0x100a   :  { %vm2515_vm12 = vmor %vm2513_vm11, %vm2514_vm10 }
0x100b   :  { %v2968_v45 = vadd.f32 %v3663_v50, %v2967_v12  ;;  %v2510_v56 = vsub.f32 1.0, %v2509_v54  ;;  %v3514_v21 = vmul.f32 -1.442695, %v2523_v40  ;;  %v3058_v40 = vld [vmem:[#allocation9 + $0xc8] sm:$0xff] }
0x100d   :  { %v2972_v30 = vsel %vm2971_vm7, %v3663_v50, %v2968_v45  ;;  %v2511_v55 = vmul.f32 %v3665_v11, %v2510_v56 }
0x100e   :  { %v4792_v41 = vsel %vm2974_vm8, %v2976_v18, %v2972_v30 }
0x100f   :  { %v2512_v26 = vadd.f32 %v3665_v11, %v2511_v55  ;;  %v3016_v30 = vsub.f32 1.0, %v4792_v41 }
0x1011   :  { %v2516_v62 = vsel %vm2515_vm12, %v3665_v11, %v2512_v26 }
0x1012   :  { %v4797_v22 = vsel %vm2518_vm5, %v2520_v20, %v2516_v62 }
0x1053   :  { %v3004_v52 = vpop.permute.xlu2 %3003 }
0x106b   :  { %v3002_v58 = vpop.permute.xlu1 %3001 }
0x106c   :  { %v3005_v0 = vsel %vm497_vm9, %v3002_v58, %v3004_v52  ;;  %v3029_v52 = vmul.f32 %v4792_v41, %v4705_v59 }
0x106d   :  { %v3007_v49 = vmul.f32 %v3005_v0, %v4792_v41 }
0x106f   :  { %3009 = vrot.lane.b32.xlu2 %v3007_v49, %s3958_s13 }
0x1073   :  { %v2548_v19 = vpop.permute.xlu1 %2547 }
0x1074   :  { %v2549_v13 = vsel %vm497_vm9, %v2546_v34, %v2548_v19 }
0x1075   :  { %v2551_v4 = vmul.f32 %v2549_v13, %v4797_v22 }
0x1077   :  { %2553 = vrot.lane.b32.xlu0 %v2551_v4, %s3958_s13 }
0x10c9   :  { %v3010_v44 = vpop.permute.xlu2 %3009 }
0x10ca   :  { %v3012_v7 = vadd.f32 %v3010_v44, %v2841_v29  ;;  %v3013_v5 = vadd.f32 %v3010_v44, %v2861_v57  ;;  %v2560_v29 = vsub.f32 1.0, %v4797_v22 }
0x10cc   :  { %3666 = vtanh.f32 %v3012_v7 }
0x10cd   :  { %3668 = vtanh.f32 %v3013_v5  ;;  %v2573_v5 = vmul.f32 %v4797_v22, %v4693_v32  ;;  %v3063_v22 = vld [vmem:[#allocation9 + $0xf0] sm:$0xff] }
0x10d2   :  { %v3667_v36 = vpop.eup %3666 }
0x10d3   :  { %v3669_v39 = vpop.eup %3668  ;;  %3020 = vrot.lane.b32.xlu1 %v3667_v36, %s3960_s21 }
0x10d4   :  { %3022 = vrot.lane.b32.xlu2 %v3669_v39, %s3960_s21 }
0x10e9   :  { %v2554_v1 = vpop.permute.xlu0 %2553 }
0x10ea   :  { %v2556_v53 = vadd.f32 %v2554_v1, %v2378_v42  ;;  %v2557_v3 = vadd.f32 %v2554_v1, %v2398_v8 }
0x10ec   :  { %3670 = vtanh.f32 %v2556_v53 }
0x10ed   :  { %3672 = vtanh.f32 %v2557_v3  ;;  %v3066_v3 = vld [vmem:[#allocation9 + $0x108] sm:$0xff] }
0x10ee   :  { %3674 = vpow2.f32 %v3527_v31  ;;  %3082 = vmatpush.msra.mxu2 %v3066_v3  ;;  %v3065_v31 = vld [vmem:[#allocation9 + $0x100] sm:$0xff]  ;;  %v3157_v3 = vld [vmem:[#allocation13 + $0x98] sm:$0xff] }
0x10f0   :  { %3083 = vmatpush.msra.mxu2 %v3063_v22  ;;  %v3154_v22 = vld [vmem:[#allocation13 + $0x80] sm:$0xff] }
0x10f2   :  { %v3671_v46 = vpop.eup %3670 }
0x10f3   :  { %v3673_v24 = vpop.eup %3672  ;;  %2564 = vrot.lane.b32.xlu0 %v3671_v46, %s3960_s21  ;;  %v3067_v46 = vld [vmem:[#allocation9 + $0x110] sm:$0xff] }
0x10f4   :  { %2566 = vrot.lane.b32.xlu1 %v3673_v24, %s3960_s21  ;;  %v3675_v37 = vpop.eup %3674  ;;  %v3068_v24 = vld [vmem:[#allocation9 + $0x118] sm:$0xff]  ;;  %3102 = vmatpush.msrb.mxu3 %v3067_v46  ;;  %v3158_v46 = vld [vmem:[#allocation13 + $0xa0] sm:$0xff] }
0x10f5   :  { %v2983_v9 = vadd.f32 1.0, %v3675_v37  ;;  %3122 = vmatpush.msra.mxu0 %v3068_v24  ;;  %v3060_v37 = vld [vmem:[#allocation9 + $0xd8] sm:$0xff] }
0x10f6   :  { %3103 = vmatpush.msrb.mxu3 %v3064_v43  ;;  %3084 = vmatpush.msra.mxu2 %v3060_v37  ;;  %v3153_v24 = vld [vmem:[#allocation13 + $0x78] sm:$0xff]  ;;  %v3155_v43 = vld [vmem:[#allocation13 + $0x88] sm:$0xff] }
0x10f7   :  { %3676 = vrcp.f32 %v2983_v9  ;;  %v2995_v12 = vand.u32 2147483648, %v2983_v9  ;;  %vm2989_vm14 = vweird.f32 %v2983_v9  ;;  %v2993_v54 = vand.u32 2147483647, %v2983_v9  ;;  %3123 = vmatpush.msra.mxu0 %v3065_v31  ;;  %v3150_v31 = vld [vmem:[#allocation13 + $0x60] sm:$0xff]  ;;  %v3151_v37 = vld [vmem:[#allocation13 + $0x68] sm:$0xff] }
0x10f8   :  { %3678 = vpow2.f32 %v3514_v21  ;;  %v3054_v21 = vld [vmem:[#allocation9 + $0xa8] sm:$0xff] }
0x10f9   :  { %v2996_v56 = vor.u32 1.1754944e-38, %v2995_v12  ;;  %vm2994_vm2 = vcmp.eq.f32.partialorder %v2993_v54, 8.507059e+37  ;;  %v3051_v12 = vld [vmem:[#allocation9 + $0x90] sm:$0xff]  ;;  %v3052_v54 = vld [vmem:[#allocation9 + $0x98] sm:$0xff] }
0x10fd   :  { %v3677_v28 = vpop.eup %3676 }
0x10fe   :  { %v2985_v10 = vmul.f32 %v3677_v28, %v2983_v9  ;;  %vm2990_vm13 = vweird.f32 %v3677_v28  ;;  %v3679_v45 = vpop.eup %3678  ;;  %v3061_v9 = vld [vmem:[#allocation9 + $0xe0] sm:$0xff] }
0x10ff   :  { %vm2991_vm1 = vmor %vm2989_vm14, %vm2990_vm13  ;;  %v2527_v63 = vadd.f32 1.0, %v3679_v45  ;;  %3104 = vmatpush.msrb.mxu3 %v3061_v9  ;;  %v3048_v45 = vld [vmem:[#allocation9 + $0x78] sm:$0xff]  ;;  %v3152_v9 = vld [vmem:[#allocation13 + $0x70] sm:$0xff] }
0x1100   :  { %v2986_v50 = vsub.f32 1.0, %v2985_v10  ;;  %v3057_v10 = vld [vmem:[#allocation9 + $0xc0] sm:$0xff] }
0x1101   :  { %3680 = vrcp.f32 %v2527_v63  ;;  %v2539_v59 = vand.u32 2147483648, %v2527_v63  ;;  %vm2533_vm4 = vweird.f32 %v2527_v63  ;;  %v2537_v41 = vand.u32 2147483647, %v2527_v63  ;;  %3085 = vmatpush.msra.mxu2 %v3057_v10  ;;  %3105 = vmatpush.msrb.mxu3 %v3058_v40  ;;  %v3148_v10 = vld [vmem:[#allocation13 + $0x50] sm:$0xff]  ;;  %v3149_v40 = vld [vmem:[#allocation13 + $0x58] sm:$0xff] }
0x1102   :  { %v2987_v61 = vmul.f32 %v3677_v28, %v2986_v50  ;;  %v3059_v50 = vld [vmem:[#allocation9 + $0xd0] sm:$0xff] }
0x1103   :  { %v2540_v16 = vor.u32 1.1754944e-38, %v2539_v59  ;;  %vm2538_vm7 = vcmp.eq.f32.partialorder %v2537_v41, 8.507059e+37  ;;  %3086 = vmatpush.msra.mxu2 %v3054_v21  ;;  %v3173_v59 = vld [vmem:[#allocation13 + $0x118] sm:$0xff]  ;;  %v3168_v41 = vld [vmem:[#allocation13 + $0xf0] sm:$0xff] }
0x1104   :  { %v2988_v11 = vadd.f32 %v3677_v28, %v2987_v61  ;;  %v3055_v61 = vld [vmem:[#allocation9 + $0xb0] sm:$0xff]  ;;  %v3145_v21 = vld [vmem:[#allocation13 + $0x38] sm:$0xff] }
0x1105   :  { %3106 = vmatpush.msrb.mxu3 %v3055_v61  ;;  %3087 = vmatpush.msra.mxu2 %v3051_v12  ;;  %v3146_v61 = vld [vmem:[#allocation13 + $0x40] sm:$0xff] }
0x1106   :  { %v2992_v38 = vsel %vm2991_vm1, %v3677_v28, %v2988_v11  ;;  %v3062_v28 = vld [vmem:[#allocation9 + $0xe8] sm:$0xff]  ;;  %v3056_v11 = vld [vmem:[#allocation9 + $0xb8] sm:$0xff]  ;;  %v3142_v12 = vld [vmem:[#allocation13 + $0x20] sm:$0xff]  ;;  %vm1108_vm1 = vcmask 1040640  }
0x1107   :  { %v2997_v48 = vsel %vm2994_vm2, %v2996_v56, %v2992_v38  ;;  %v3681_v62 = vpop.eup %3680  ;;  %3124 = vmatpush.msra.mxu0 %v3062_v28  ;;  %v3053_v38 = vld [vmem:[#allocation9 + $0xa0] sm:$0xff]  ;;  %3107 = vmatpush.msrb.mxu3 %v3052_v54  ;;  %v3147_v28 = vld [vmem:[#allocation13 + $0x48] sm:$0xff] }
0x1108   :  { %v3017_v25 = vsub.f32 1.0, %v2997_v48  ;;  %v3030_v26 = vmul.f32 %v2997_v48, %v4710_v33  ;;  %v2529_v20 = vmul.f32 %v3681_v62, %v2527_v63  ;;  %vm2534_vm3 = vweird.f32 %v3681_v62  ;;  %v3049_v56 = vld [vmem:[#allocation9 + $0x80] sm:$0xff]  ;;  %v3050_v48 = vld [vmem:[#allocation9 + $0x88] sm:$0xff]  ;;  %3088 = vmatpush.msra.mxu2 %v3048_v45 }
0x1109   :  { %vm2535_vm6 = vmor %vm2533_vm4, %vm2534_vm3  ;;  %3125 = vmatpush.msra.mxu0 %v3059_v50  ;;  %v3045_v63 = vld [vmem:[#allocation9 + $0x60] sm:$0xff]  ;;  %3108 = vmatpush.msrb.mxu3 %v3049_v56  ;;  %v3144_v50 = vld [vmem:[#allocation13 + $0x30] sm:$0xff] }
0x110a   :  { %v2530_v34 = vsub.f32 1.0, %v2529_v20  ;;  %3089 = vmatpush.msra.mxu2 %v3045_v63  ;;  %v3034_v20 = vld [vmem:[#allocation9 + $0x8] sm:$0xff]  ;;  %v3138_v56 = vld [vmem:[#allocation13] sm:$0xff]  ;;  %v3140_v63 = vld [vmem:[#allocation13 + $0x10] sm:$0xff] }
0x110b   :  { %3126 = vmatpush.msra.mxu0 %v3056_v11  ;;  %v3141_v11 = vld [vmem:[#allocation13 + $0x18] sm:$0xff]  ;;  %v3143_v54 = vld [vmem:[#allocation13 + $0x28] sm:$0xff] }
0x110c   :  { %v2531_v19 = vmul.f32 %v3681_v62, %v2530_v34  ;;  %v3035_v34 = vld [vmem:[#allocation9 + $0x10] sm:$0xff] }
0x110d   :  { %3127 = vmatpush.msra.mxu0 %v3053_v38 }
0x110e   :  { %v2532_v13 = vadd.f32 %v3681_v62, %v2531_v19  ;;  %v3171_v19 = vld [vmem:[#allocation13 + $0x108] sm:$0xff] }
0x110f   :  { %3128 = vmatpush.msra.mxu0 %v3050_v48  ;;  %3185 = vmatpush.msrb.mxu1 %v3171_v19  ;;  %v3139_v48 = vld [vmem:[#allocation13 + $0x8] sm:$0xff] }
0x1110   :  { %v2536_v4 = vsel %vm2535_vm6, %v3681_v62, %v2532_v13  ;;  %v3033_v62 = vld [vmem:[#allocation9] sm:$0xff]  ;;  %v3172_v13 = vld [vmem:[#allocation13 + $0x110] sm:$0xff] }
0x1111   :  { %v2541_v33 = vsel %vm2538_vm7, %v2540_v16, %v2536_v4  ;;  %v3169_v4 = vld [vmem:[#allocation13 + $0xf8] sm:$0xff]  ;;  %v3170_v16 = vld [vmem:[#allocation13 + $0x100] sm:$0xff]  ;;  %3186 = vmatpush.msrb.mxu1 %v3168_v41 }
0x1112   :  { %v2561_v7 = vsub.f32 1.0, %v2541_v33  ;;  %v2574_v1 = vmul.f32 %v2541_v33, %v4716_v35  ;;  %v3165_v33 = vld [vmem:[#allocation13 + $0xd8] sm:$0xff] }
0x1113   :  { %3187 = vmatpush.msrb.mxu1 %v3165_v33 }
0x112e   :  { %v3023_v55 = vpop.permute.xlu2 %3022 }
0x1145   :  { %v3021_v18 = vpop.permute.xlu1 %3020 }
0x1146   :  { %v3024_v58 = vsel %vm563_vm0, %v3021_v18, %v3023_v55  ;;  %v3027_v0 = vmul.f32 %v3021_v18, %v3016_v30  ;;  %v3046_v30 = vld [vmem:[#allocation9 + $0x68] sm:$0xff]  ;;  %v3047_v55 = vld [vmem:[#allocation9 + $0x70] sm:$0xff] }
0x1147   :  { %v3028_v49 = vmul.f32 %v3024_v58, %v3017_v25  ;;  %v3042_v25 = vld [vmem:[#allocation9 + $0x48] sm:$0xff]  ;;  %v3043_v18 = vld [vmem:[#allocation9 + $0x50] sm:$0xff]  ;;  %3109 = vmatpush.msrb.mxu3 %v3046_v30  ;;  %3129 = vmatpush.msra.mxu0 %v3047_v55 }
0x1148   :  { %v3031_v14 = vadd.f32 %v3029_v52, %v3027_v0  ;;  %v3044_v52 = vld [vmem:[#allocation9 + $0x58] sm:$0xff]  ;;  %v3039_v58 = vld [vmem:[#allocation9 + $0x30] sm:$0xff]  ;;  %3090 = vmatpush.msra.mxu2 %v3042_v25 }
0x1149   :  { %v3032_v17 = vadd.f32 %v3030_v26, %v3028_v49  ;;  %v3040_v0 = vld [vmem:[#allocation9 + $0x38] sm:$0xff]  ;;  %3110 = vmatpush.msrb.mxu3 %v3043_v18  ;;  %v3041_v49 = vld [vmem:[#allocation9 + $0x40] sm:$0xff]  ;;  %3130 = vmatpush.msra.mxu0 %v3044_v52 }
0x114a   :  { %3071 = vrot.lane.b32.xlu2 %v3031_v14, %s3960_s21  ;;  %v3036_v26 = vld [vmem:[#allocation9 + $0x18] sm:$0xff]  ;;  %v3037_v14 = vld [vmem:[#allocation9 + $0x20] sm:$0xff]  ;;  %3091 = vmatpush.msra.mxu2 %v3039_v58 }
0x114b   :  { %3073 = vrot.lane.b32.xlu0 %v3032_v17, %s3960_s21  ;;  %3111 = vmatpush.msrb.mxu3 %v3040_v0  ;;  %v3038_v17 = vld [vmem:[#allocation9 + $0x28] sm:$0xff] }
0x114c   :  { %3131 = vmatpush.msra.mxu0 %v3041_v49  ;;  %3092 = vmatpush.msra.mxu2 %v3036_v26 }
0x114d   :  { %3112 = vmatpush.msrb.mxu3 %v3037_v14 }
0x114e   :  { %3132 = vmatpush.msra.mxu0 %v3038_v17  ;;  %3093 = vmatpush.msra.mxu2 %v3033_v62 }
0x114f   :  { %3113 = vmatpush.msrb.mxu3 %v3034_v20 }
0x1150   :  { %3133 = vmatpush.msra.mxu0 %v3035_v34  ;;  %3205 = vmatpush.msrb.mxu2 %v3172_v13 }
0x1151   :  { %3225 = vmatpush.msra.mxu3 %v3173_v59 }
0x1152   :  { %3206 = vmatpush.msrb.mxu2 %v3169_v4 }
0x1153   :  { %3226 = vmatpush.msra.mxu3 %v3170_v16 }
0x1165   :  { %v2565_v57 = vpop.permute.xlu0 %2564 }
0x1166   :  { %v2567_v44 = vpop.permute.xlu1 %2566  ;;  %v2571_v36 = vmul.f32 %v2565_v57, %v2560_v29  ;;  %v3166_v29 = vld [vmem:[#allocation13 + $0xe0] sm:$0xff] }
0x1167   :  { %v2568_v39 = vsel %vm563_vm0, %v2565_v57, %v2567_v44  ;;  %v3167_v57 = vld [vmem:[#allocation13 + $0xe8] sm:$0xff]  ;;  %v3162_v44 = vld [vmem:[#allocation13 + $0xc0] sm:$0xff]  ;;  %3207 = vmatpush.msrb.mxu2 %v3166_v29 }
0x1168   :  { %v2572_v42 = vmul.f32 %v2568_v39, %v2561_v7  ;;  %v4825_v8 = vadd.f32 %v2573_v5, %v2571_v36  ;;  %v3163_v7 = vld [vmem:[#allocation13 + $0xc8] sm:$0xff]  ;;  %v3164_v5 = vld [vmem:[#allocation13 + $0xd0] sm:$0xff]  ;;  %3227 = vmatpush.msra.mxu3 %v3167_v57  ;;  %3188 = vmatpush.msrb.mxu1 %v3162_v44 }
0x1169   :  { %v3159_v36 = vld [vmem:[#allocation13 + $0xa8] sm:$0xff]  ;;  %v3160_v39 = vld [vmem:[#allocation13 + $0xb0] sm:$0xff]  ;;  %3208 = vmatpush.msrb.mxu2 %v3163_v7 }
0x116a   :  { %3174 = vrot.lane.b32.xlu1 %v4825_v8, %s3960_s21  ;;  %v4830_v53 = vadd.f32 %v2574_v1, %v2572_v42  ;;  %v3161_v42 = vld [vmem:[#allocation13 + $0xb8] sm:$0xff]  ;;  %3228 = vmatpush.msra.mxu3 %v3164_v5  ;;  %v3156_v1 = vld [vmem:[#allocation13 + $0x90] sm:$0xff] }
0x116b   :  { %3189 = vmatpush.msrb.mxu1 %v3159_v36  ;;  %3209 = vmatpush.msrb.mxu2 %v3160_v39 }
0x116c   :  { %3176 = vrot.lane.b32.xlu2 %v4830_v53, %s3960_s21  ;;  %3229 = vmatpush.msra.mxu3 %v3161_v42 }
0x116d   :  { %3190 = vmatpush.msrb.mxu1 %v3156_v1  ;;  %3210 = vmatpush.msrb.mxu2 %v3157_v3 }
0x116e   :  { %3230 = vmatpush.msra.mxu3 %v3158_v46 }
0x116f   :  { %3191 = vmatpush.msrb.mxu1 %v3153_v24  ;;  %3211 = vmatpush.msrb.mxu2 %v3154_v22 }
0x1170   :  { %3231 = vmatpush.msra.mxu3 %v3155_v43 }
0x1171   :  { %3192 = vmatpush.msrb.mxu1 %v3150_v31  ;;  %3212 = vmatpush.msrb.mxu2 %v3151_v37 }
0x1172   :  { %3232 = vmatpush.msra.mxu3 %v3152_v9 }
0x1173   :  { %3193 = vmatpush.msrb.mxu1 %v3147_v28  ;;  %3213 = vmatpush.msrb.mxu2 %v3148_v10 }
0x1174   :  { %3233 = vmatpush.msra.mxu3 %v3149_v40 }
0x1175   :  { %3194 = vmatpush.msrb.mxu1 %v3144_v50  ;;  %3214 = vmatpush.msrb.mxu2 %v3145_v21 }
0x1176   :  { %3234 = vmatpush.msra.mxu3 %v3146_v61 }
0x1177   :  { %3195 = vmatpush.msrb.mxu1 %v3141_v11  ;;  %3215 = vmatpush.msrb.mxu2 %v3142_v12 }
0x1178   :  { %3235 = vmatpush.msra.mxu3 %v3143_v54 }
0x1179   :  { %3196 = vmatpush.msrb.mxu1 %v3138_v56  ;;  %3216 = vmatpush.msrb.mxu2 %v3139_v48 }
0x117a   :  { %3236 = vmatpush.msra.mxu3 %v3140_v63 }
0x11a4   :  { %v3072_v38 = vpop.permute.xlu2 %3071 }
0x11bd   :  { %v3074_v45 = vpop.permute.xlu0 %3073 }
0x11be   :  { %v3075_v30 = vsel %vm563_vm0, %v3072_v38, %v3074_v45 }
0x11bf   :  { %3528 = vmatmul.msk.f32.vlgmr.msra.gmra.mxu2 %vm380_vm15, %v3075_v30  ;;  %3529 = vmatmul.msk.f32.vlgmr.msrb.gmra.mxu3 %vm380_vm15, %v3075_v30 }
0x11c0   :  { %3530 = vmatmul.msk.f32.vlgmr.msra.gmra.mxu0 %vm380_vm15, %v3075_v30 }
0x11c6   :  { %v3177_v55 = vpop.permute.xlu2 %3176 }
0x11dc   :  { %v3175_v25 = vpop.permute.xlu1 %3174 }
0x11dd   :  { %v3178_v18 = vsel %vm563_vm0, %v3175_v25, %v3177_v55 }
0x11de   :  { %3531 = vmatmul.msk.f32.vlgmr.msrb.gmra.mxu1 %vm380_vm15, %v3178_v18  ;;  %3532 = vmatmul.msk.f32.vlgmr.msrb.gmra.mxu2 %vm380_vm15, %v3178_v18 }
0x11df   :  { %3533 = vmatmul.msk.f32.vlgmr.msra.gmra.mxu3 %vm380_vm15, %v3178_v18 }
0x123d   :  { %v3135_v39 = vpop.f32.mrf.mxu0 }
0x123e   :  { %v3136_v42 = vadd.f32 %v3135_v39, %v4535_v23  ;;  %v3367_v39 = vld [vmem:[%s4970_s14 + $0x8] sm:$0xff] }
0x1242   :  { %v3095_v52 = vpop.f32.mrf.mxu2  ;;  %v3115_v58 = vpop.f32.mrf.mxu3 }
0x1243   :  { %v3096_v20 = vadd.f32 %v3095_v52, %v4405_v6  ;;  %v3116_v1 = vadd.f32 %v3115_v58, %v4526_v60 }
0x125b   :  { %v3198_v17 = vpop.f32.mrf.mxu1 }
0x125c   :  { %v3199_v62 = vadd.f32 %v3198_v17, %v4402_v2  ;;  %v3339_v17 = vld [vmem:[%s4968_s12 + $0x70] sm:$0xff] }
0x125e   :  { %v3241_v34 = vadd.f32 %v3199_v62, %v3096_v20  ;;  %v3338_v62 = vld [vmem:[%s4968_s12 + $0x68] sm:$0xff]  ;;  %v3337_v20 = vld [vmem:[%s4968_s12 + $0x60] sm:$0xff] }
0x1260   :  { %v3534_v19 = vmul.f32 -1.442695, %v3241_v34  ;;  %v3336_v34 = vld [vmem:[%s4968_s12 + $0x58] sm:$0xff] }
0x1261   :  { %v3218_v0 = vpop.f32.mrf.mxu2 }
0x1262   :  { %v3219_v49 = vadd.f32 %v3218_v0, %v4477_v15  ;;  %v3238_v26 = vpop.f32.mrf.mxu3  ;;  %3682 = vpow2.f32 %v3534_v19  ;;  %v3335_v19 = vld [vmem:[%s4968_s12 + $0x50] sm:$0xff] }
0x1263   :  { %v3239_v14 = vadd.f32 %v3238_v26, %v4511_v27 }
0x1264   :  { %3283 = vrot.lane.b32.xlu0 %v3219_v49, %s3958_s13  ;;  %v3261_v60 = vadd.f32 %v3219_v49, %v3116_v1 }
0x1265   :  { %3285 = vrot.lane.b32.xlu1 %v3239_v14, %s3958_s13  ;;  %v3340_v14 = vld [vmem:[%s4968_s12 + $0x78] sm:$0xff] }
0x1266   :  { %v3535_v23 = vmul.f32 -1.442695, %v3261_v60  ;;  %3345 = vmatpush.msrb.mxu0 %v3340_v14  ;;  %v3399_v60 = vld [vmem:[%s4972_s16 + $0x8] sm:$0xff] }
0x1268   :  { %v3683_v13 = vpop.eup %3682  ;;  %3346 = vmatpush.msrb.mxu0 %v3339_v17 }
0x1269   :  { %v3245_v59 = vadd.f32 1.0, %v3683_v13  ;;  %v3334_v13 = vld [vmem:[%s4968_s12 + $0x48] sm:$0xff] }
0x126a   :  { %3347 = vmatpush.msrb.mxu0 %v3338_v62 }
0x126b   :  { %3684 = vrcp.f32 %v3245_v59  ;;  %v3257_v33 = vand.u32 2147483648, %v3245_v59  ;;  %vm3251_vm8 = vweird.f32 %v3245_v59  ;;  %v3255_v29 = vand.u32 2147483647, %v3245_v59 }
0x126c   :  { %3348 = vmatpush.msrb.mxu0 %v3337_v20 }
0x126d   :  { %v3258_v44 = vor.u32 1.1754944e-38, %v3257_v33  ;;  %vm3256_vm11 = vcmp.eq.f32.partialorder %v3255_v29, 8.507059e+37  ;;  %v3327_v33 = vld [vmem:[%s4968_s12 + $0x10] sm:$0xff]  ;;  %v3326_v29 = vld [vmem:[%s4968_s12 + $0x8] sm:$0xff] }
0x126e   :  { %3349 = vmatpush.msrb.mxu0 %v3336_v34 }
0x1270   :  { %3350 = vmatpush.msrb.mxu0 %v3335_v19 }
0x1271   :  { %v3685_v41 = vpop.eup %3684 }
0x1272   :  { %v3247_v15 = vmul.f32 %v3685_v41, %v3245_v59  ;;  %vm3252_vm15 = vweird.f32 %v3685_v41  ;;  %v3333_v59 = vld [vmem:[%s4968_s12 + $0x40] sm:$0xff]  ;;  %3351 = vmatpush.msrb.mxu0 %v3334_v13 }
0x1273   :  { %vm3253_vm10 = vmor %vm3251_vm8, %vm3252_vm15 }
0x1274   :  { %v3248_v4 = vsub.f32 1.0, %v3247_v15  ;;  %3352 = vmatpush.msrb.mxu0 %v3333_v59  ;;  %v3331_v15 = vld [vmem:[%s4968_s12 + $0x30] sm:$0xff] }
0x1276   :  { %v3249_v16 = vmul.f32 %v3685_v41, %v3248_v4  ;;  %v3330_v4 = vld [vmem:[%s4968_s12 + $0x28] sm:$0xff] }
0x1278   :  { %v3250_v27 = vadd.f32 %v3685_v41, %v3249_v16  ;;  %v3329_v16 = vld [vmem:[%s4968_s12 + $0x20] sm:$0xff] }
0x127a   :  { %v3254_v57 = vsel %vm3253_vm10, %v3685_v41, %v3250_v27  ;;  %v3332_v41 = vld [vmem:[%s4968_s12 + $0x38] sm:$0xff] }
0x127b   :  { %v3259_v7 = vsel %vm3256_vm11, %v3258_v44, %v3254_v57  ;;  %3353 = vmatpush.msrb.mxu0 %v3332_v41  ;;  %v3328_v27 = vld [vmem:[%s4968_s12 + $0x18] sm:$0xff]  ;;  %v3325_v57 = vld [vmem:[%s4968_s12] sm:$0xff]  ;;  %v3368_v44 = vld [vmem:[%s4970_s14 + $0x10] sm:$0xff] }
0x127c   :  { %v3298_v11 = vsub.f32 1.0, %v3259_v7  ;;  %v3311_v45 = vmul.f32 %v3259_v7, %v4825_v8 }
0x127d   :  { %3354 = vmatpush.msrb.mxu0 %v3331_v15 }
0x127f   :  { %3355 = vmatpush.msrb.mxu0 %v3330_v4 }
0x1281   :  { %3356 = vmatpush.msrb.mxu0 %v3329_v16 }
0x1283   :  { %3357 = vmatpush.msrb.mxu0 %v3328_v27 }
0x1285   :  { %3358 = vmatpush.msrb.mxu0 %v3327_v33 }
0x1287   :  { %3359 = vmatpush.msrb.mxu0 %v3326_v29 }
0x1289   :  { %3360 = vmatpush.msrb.mxu0 %v3325_v57 }
0x12d6   :  { %v3284_v2 = vpop.permute.xlu0 %3283 }
0x12d7   :  { %v3286_v6 = vpop.permute.xlu1 %3285 }
0x12d8   :  { %v3287_v5 = vsel %vm497_vm9, %v3284_v2, %v3286_v6  ;;  %v3369_v2 = vld [vmem:[%s4970_s14 + $0x18] sm:$0xff] }
0x12d9   :  { %v3289_v36 = vmul.f32 %v3287_v5, %v3259_v7  ;;  %3389 = vmatpush.msra.mxu1 %v3369_v2 }
0x12db   :  { %3291 = vrot.lane.b32.xlu2 %v3289_v36, %s3958_s13  ;;  %3390 = vmatpush.msra.mxu1 %v3368_v44 }
0x12dd   :  { %3391 = vmatpush.msra.mxu1 %v3367_v39 }
0x12e3   :  { %1102 = vrot.lane.b32.xlu2 %v4556_v47, %s3958_s13 }
0x12eb   :  { %1843 = vrot.lane.b32.xlu2 %v4716_v35, %s3958_s13 }
0x1335   :  { %v3292_v3 = vpop.permute.xlu2 %3291 }
0x1336   :  { %v3294_v46 = vadd.f32 %v3292_v3, %v3116_v1  ;;  %v3295_v24 = vadd.f32 %v3292_v3, %v3136_v42  ;;  %v3366_v42 = vld [vmem:[%s4970_s14] sm:$0xff]  ;;  %v3401_v1 = vld [vmem:[%s4972_s16 + $0x18] sm:$0xff]  ;;  %v3400_v3 = vld [vmem:[%s4972_s16 + $0x10] sm:$0xff] }
0x1337   :  { %3392 = vmatpush.msra.mxu1 %v3366_v42  ;;  %3421 = vmatpush.msra.mxu2 %v3401_v1 }
0x1338   :  { %3686 = vtanh.f32 %v3294_v46  ;;  %v3555_v46 = vld [vmem:[#allocation15] ss:$0 sm:$0xff] }
0x1339   :  { %3688 = vtanh.f32 %v3295_v24  ;;  %3422 = vmatpush.msra.mxu2 %v3400_v3 }
0x133a   :  { %3690 = vpow2.f32 %v3535_v23  ;;  %v3398_v23 = vld [vmem:[%s4972_s16] sm:$0xff] }
0x133b   :  { %3423 = vmatpush.msra.mxu2 %v3399_v60 }
0x133d   :  { %v1103_v61 = vpop.permute.xlu2 %1102  ;;  %3424 = vmatpush.msra.mxu2 %v3398_v23 }
0x133e   :  { %v3687_v22 = vpop.eup %3686 }
0x133f   :  { %v3689_v43 = vpop.eup %3688  ;;  %3302 = vrot.lane.b32.xlu0 %v3687_v22, %s3960_s21 }
0x1340   :  { %3304 = vrot.lane.b32.xlu1 %v3689_v43, %s3960_s21  ;;  %v3691_v47 = vpop.eup %3690 }
0x1341   :  { %v3265_v35 = vadd.f32 1.0, %v3691_v47  ;;  %v3556_v47 = vld [vmem:[#allocation16] ss:$0 sm:$0xff] }
0x1343   :  { %3692 = vrcp.f32 %v3265_v35  ;;  %v3277_v10 = vand.u32 2147483648, %v3265_v35  ;;  %vm3271_vm5 = vweird.f32 %v3265_v35 }
0x1345   :  { %v3278_v50 = vor.u32 1.1754944e-38, %v3277_v10  ;;  %v1844_v52 = vpop.permute.xlu2 %1843 }
0x1347   :  { %1104 = vrot.lane.b32.xlu0 %v4558_v51, %s3958_s13 }
0x1348   :  { %1841 = vrot.lane.b32.xlu1 %v4693_v32, %s3958_s13  ;;  %v3275_v32 = vand.u32 2147483647, %v3265_v35 }
0x1349   :  { %v3693_v31 = vpop.eup %3692 }
0x134a   :  { %v3267_v37 = vmul.f32 %v3693_v31, %v3265_v35  ;;  %vm3272_vm12 = vweird.f32 %v3693_v31  ;;  %vm3276_vm14 = vcmp.eq.f32.partialorder %v3275_v32, 8.507059e+37 }
0x134b   :  { %vm3273_vm13 = vmor %vm3271_vm5, %vm3272_vm12 }
0x134c   :  { %v3268_v9 = vsub.f32 1.0, %v3267_v37 }
0x134e   :  { %v3269_v28 = vmul.f32 %v3693_v31, %v3268_v9  ;;  %v3557_v9 = vld [vmem:[#allocation18] ss:$0 sm:$0xff] }
0x134f   :  { %2579 = vrot.lane.b32.xlu0 %v4825_v8, %s3958_s13 }
0x1350   :  { %2581 = vrot.lane.b32.xlu1 %v4830_v53, %s3958_s13  ;;  %v3270_v51 = vadd.f32 %v3693_v31, %v3269_v28 }
0x1352   :  { %v3274_v40 = vsel %vm3273_vm13, %v3693_v31, %v3270_v51 }
0x1353   :  { %v3279_v21 = vsel %vm3276_vm14, %v3278_v50, %v3274_v40 }
0x1354   :  { %v3299_v38 = vsub.f32 1.0, %v3279_v21  ;;  %v3312_v55 = vmul.f32 %v3279_v21, %v4830_v53 }
0x13b1   :  { %v3303_v12 = vpop.permute.xlu0 %3302 }
0x13b2   :  { %v3305_v54 = vpop.permute.xlu1 %3304  ;;  %v3309_v56 = vmul.f32 %v3303_v12, %v3298_v11 }
0x13b3   :  { %v3306_v48 = vsel %vm563_vm0, %v3303_v12, %v3305_v54 }
0x13b4   :  { %v3310_v63 = vmul.f32 %v3306_v48, %v3299_v38  ;;  %v3313_v30 = vadd.f32 %v3311_v45, %v3309_v56 }
0x13b6   :  { %3317 = vrot.lane.b32.xlu2 %v3313_v30, %s3958_s13  ;;  %v3314_v25 = vadd.f32 %v3312_v55, %v3310_v63 }
0x13b8   :  { %3319 = vrot.lane.b32.xlu0 %v3314_v25, %s3958_s13 }
0x13b9   :  { %v1105_v18 = vpop.permute.xlu0 %1104 }
0x13ba   :  { %v1842_v58 = vpop.permute.xlu1 %1841  ;;  %v1106_v0 = vsel %vm497_vm9, %v1103_v61, %v1105_v18 }
0x13bb   :  { %v1845_v8 = vsel %vm497_vm9, %v1842_v58, %v1844_v52  ;;  %1109 = vst.msk [vmem:[#allocation2] sm:$0x1] %vm1108_vm1, %v1106_v0 }
0x13bc   :  { %1847 = vst.msk [vmem:[#allocation2 + $0x1] sm:$0x1] %vm1108_vm1, %v1845_v8 }
0x13c1   :  { %v2580_v49 = vpop.permute.xlu0 %2579 }
0x13c2   :  { %v2582_v26 = vpop.permute.xlu1 %2581 }
0x13c3   :  { %v2583_v53 = vsel %vm497_vm9, %v2580_v49, %v2582_v26 }
0x13c4   :  { %2585 = vst.msk [vmem:[#allocation2 + $0x2] sm:$0x1] %vm1108_vm1, %v2583_v53 }
0x1410   :  { %v3318_v6 = vpop.permute.xlu2 %3317 }
0x142a   :  { %v3320_v7 = vpop.permute.xlu0 %3319 }
0x142b   :  { %v3321_v5 = vsel %vm497_vm9, %v3318_v6, %v3320_v7  ;;  %vm3429_vm9 = vcmask 35840  }
0x142c   :  { %3323 = vst.msk [vmem:[#allocation2 + $0x3] sm:$0x1] %vm1108_vm1, %v3321_v5 }
0x1433   :  { %v3324_v36 = vld [vmem:[#allocation2] sm:$0xf] }
0x1434   :  { %3361 = vmatmul.f32.vlgmr.msrb.gmra.mxu0 %v3324_v36 }
0x14b1   :  { %v3362_v24 = vpop.f32.mrf.mxu0 }
0x14b2   :  { %v3363_v22 = vadd.f32 %v3555_v46, %v3362_v24 }
0x14b4   :  { %v3365_v43 = vmax.f32 %v3363_v22, 0.0 }
0x14b6   :  { %3536 = vmatmul.msk.f32.vlgmr.msra.gmra.mxu1 %vm563_vm0, %v3365_v43 }
0x1533   :  { %v3394_v35 = vpop.f32.mrf.mxu1 }
0x1534   :  { %v3395_v31 = vadd.f32 %v3556_v47, %v3394_v35 }
0x1536   :  { %v3397_v37 = vmax.f32 %v3395_v31, 0.0 }
0x1538   :  { %3537 = vmatmul.msk.f32.vlgmr.msra.gmra.mxu2 %vm563_vm0, %v3397_v37 }
0x15bb   :  { %v3426_v28 = vpop.f32.mrf.mxu2 }
0x15bc   :  { %v3427_v51 = vadd.f32 %v3557_v9, %v3426_v28 }
0x15be   :  { %3430 = vst.msk [vmem:[#allocation19] sm:$0xf] %vm3429_vm9, %v3427_v51 }
0x15bf   :  { %3441 = dma.vmem_to_hbm [thread:$0]  %s3437_s15, 64, %s3439_s5, [#allocation6]  }
0x15c0   :  { %3944 = dma.done.wait [#allocation6], 64  }
0x15c1   :  { %3945 = vsyncadd [#allocation6], 4294967232 }
0x15c2   :  { %3446 = vsyncpa [#allocation5], 1 }
0x15c3   :  { %3447 = vsyncpa [#allocation8], 1 }
0x15c4   :  { %3448 = vsyncpa [#allocation11], 1 }
0x15c5   :  { %3449 = vsyncpa [#allocation14], 1 }
0x15c6   :  { %3450 = vsyncpa [#allocation17], 1 }
0x15c7   :  { %3451 = vsyncpa [#allocation6], 1 }

</bundles_post_ra>
